<compile_context>
chip_gen: v5e
topology: v5e:2x2
jax: 0.10.0
libtpu: 0.0.40
codegen_flags: <defaults>
</compile_context>

<pallas_src>
import jax
import jax.numpy as jnp
from jax.experimental import pallas as pl
from jax.experimental.pallas import tpu as pltpu


def convnet_head_kernel(x_ref, w1_ref, b1_ref, w2_ref, b2_ref, lin_ref, out_ref):
    # x_ref : [TN, HW, C]   backbone features, channels on lanes
    # w1_ref: [C, H1]       W1^T * (1/HW), pre-scaled on host    b1_ref: [1, H1] f32
    # w2_ref: [H1, NCP]     W2^T, class dim padded to 128        b2_ref: [1, NCP] f32
    #
    # Global average pool: reduce over HW first, accumulating in f32 (explicit f32
    # accumulation also covers v5e's lack of a bf16 VPU path). This is a tiny
    # reduction and stays hidden under the x-tile DMA.
    pooled = jnp.sum(x_ref[...].astype(jnp.float32), axis=1)          # [TN, C] f32
    pooled = pooled.astype(w1_ref.dtype)                              # bf16 (or f32) for MXU

    # linear1 (pre-activation). 1/HW is already folded into w1_ref, so
    # sum_hw(x) @ (W1^T / HW) + b1 == mean_hw(x) @ W1^T + b1 == `lin`.
    lin = jnp.dot(pooled, w1_ref[...],
                  preferred_element_type=jnp.float32) + b1_ref[...]   # [TN, H1] f32
    lin_ref[...] = lin.astype(lin_ref.dtype)

    # ReLU + linear2 (class dim padded to a lane-dense width).
    h = jnp.maximum(lin, 0.0).astype(w2_ref.dtype)
    out = jnp.dot(h, w2_ref[...],
                  preferred_element_type=jnp.float32) + b2_ref[...]   # [TN, NCP] f32
    out_ref[...] = out.astype(out_ref.dtype)


def convnet_head(x_nhwc, w1, b1, w2, b2, *, tn=None, compute_dtype=jnp.bfloat16):
    """Fused avgpool + linear1 + ReLU + linear2 head.

    x_nhwc: [N, H, W, C=2048] backbone feature map (NHWC, TPU-native layout).
    w1: [512, 2048], b1: [512], w2: [num_classes, 512], b2: [num_classes]
    (PyTorch nn.Linear convention: weight = [out_features, in_features]).
    Returns (lin, out) = ([N, 512], [N, num_classes]), both float32.
    """
    N, H, W, C = x_nhwc.shape
    HW = H * W
    H1 = w1.shape[0]             # 512
    NC = w2.shape[0]             # num_classes
    NCP = 128                    # lane-dense padded class width

    # Free reshape in HBM: [N, H, W, C] -> [N, HW, C]; channels stay on lanes.
    # Cast the streamed feature map to the compute dtype (bf16 by default) to halve
    # HBM traffic on this DMA-bound kernel.
    x = x_nhwc.reshape(N, HW, C).astype(compute_dtype)

    # --- choose batch tile TN: target ~8 MiB x tile, TN multiple of 8 when tiling.
    itemsize = jnp.dtype(compute_dtype).itemsize
    if tn is None:
        row_bytes = HW * C * itemsize
        target_tile_bytes = 8 << 20
        tn = max(1, target_tile_bytes // row_bytes)
    tn = int(tn)

    # Keep >= 2 grid steps whenever the batch allows (v7x megacore sharding of the
    # "parallel" batch axis across its 2 TensorCores).
    half = ((N // 2) // 8) * 8
    if half >= 8:
        tn = min(tn, half)

    if tn >= N:
        tn = N
    else:
        tn = max(8, (tn // 8) * 8)

    # Pad the batch so the grid tiles it evenly (padded rows sliced off below).
    n_pad = (-N) % tn
    if n_pad:
        x = jnp.pad(x, ((0, n_pad), (0, 0), (0, 0)))
    Np = N + n_pad
    grid = (pl.cdiv(Np, tn),)

    # Weights: transpose to [in, out] and cast to the compute dtype. Fold the 1/HW
    # average-pool scale into w1t on the host (no in-kernel multiply). Pad the class
    # dim of w2/b2 to NCP lanes with zeros; biases stay f32.
    w1t = (jnp.transpose(w1).astype(jnp.float32) * (1.0 / HW)).astype(compute_dtype)  # [C, H1]
    w2t = jnp.transpose(w2).astype(compute_dtype)                                     # [H1, NC]
    w2t = jnp.pad(w2t, ((0, 0), (0, NCP - NC)))                                       # [H1, NCP]
    b1_2d = b1.reshape(1, H1).astype(jnp.float32)
    b2_2d = jnp.pad(b2.reshape(1, NC), ((0, 0), (0, NCP - NC))).astype(jnp.float32)

    grid_spec = pltpu.PrefetchScalarGridSpec(
        num_scalar_prefetch=0,
        grid=grid,
        in_specs=[
            # x tile pipelines (double-buffered DMA) over the batch axis.
            pl.BlockSpec((tn, HW, C), lambda i: (i, 0, 0)),
            # Weights/biases: same block every step -> VMEM-resident, no re-DMA.
            pl.BlockSpec((C, H1), lambda i: (0, 0)),
            pl.BlockSpec((1, H1), lambda i: (0, 0)),
            pl.BlockSpec((H1, NCP), lambda i: (0, 0)),
            pl.BlockSpec((1, NCP), lambda i: (0, 0)),
        ],
        out_specs=[
            pl.BlockSpec((tn, H1), lambda i: (i, 0)),
            pl.BlockSpec((tn, NCP), lambda i: (i, 0)),
        ],
    )

    lin, out = pl.pallas_call(
        convnet_head_kernel,
        out_shape=(
            jax.ShapeDtypeStruct((Np, H1), jnp.float32),
            jax.ShapeDtypeStruct((Np, NCP), jnp.float32),
        ),
        grid_spec=grid_spec,
        compiler_params=pltpu.CompilerParams(
            dimension_semantics=("parallel",),
            # Above v5e's 16 MiB scoped default, below v7x's 64 MiB physical VMEM.
            vmem_limit_bytes=48 << 20,
        ),
    )(x, w1t, b1_2d, w2t, b2_2d)

    # Strip batch padding and the lane padding of the class dimension.
    return lin[:N], out[:N, :NC]


def _reference(x_nhwc, w1, b1, w2, b2):
    # Pure-JAX reference mirroring the PyTorch forward (on NHWC features), in f32.
    pooled = jnp.mean(x_nhwc.astype(jnp.float32), axis=(1, 2))     # avgpool+flatten -> [N, 2048]
    lin = pooled @ w1.T + b1                                       # linear1 (pre-ReLU)
    out = jnp.maximum(lin, 0.0) @ w2.T + b2                        # relu + linear2
    return lin, out


if __name__ == "__main__":
    num_classes = 5
    N, H, W, C = 2, 4, 4, 2048   # small spatial map; C fixed by ResNet50 / linear1

    key = jax.random.PRNGKey(0)
    kx, kw1, kb1, kw2, kb2 = jax.random.split(key, 5)

    x = jax.random.normal(kx, (N, H, W, C), dtype=jnp.float32)

    # Deterministic parameter init (PyTorch Linear shape conventions).
    w1 = jax.random.normal(kw1, (512, 2048), dtype=jnp.float32) * (1.0 / jnp.sqrt(2048.0))
    b1 = jax.random.normal(kb1, (512,), dtype=jnp.float32) * 0.01
    w2 = jax.random.normal(kw2, (num_classes, 512), dtype=jnp.float32) * (1.0 / jnp.sqrt(512.0))
    b2 = jax.random.normal(kb2, (num_classes,), dtype=jnp.float32) * 0.01

    lin_ref, out_ref = _reference(x, w1, b1, w2, b2)

    # Default (recommended) bf16-fed path: f32-accumulated, bf16 inputs -> looser tol.
    lin_bf, out_bf = convnet_head(x, w1, b1, w2, b2)               # compute_dtype=bf16
    jax.block_until_ready((lin_bf, out_bf))
    assert lin_bf.shape == (N, 512) and out_bf.shape == (N, num_classes)
    assert jnp.allclose(lin_bf, lin_ref, atol=3e-2, rtol=3e-2)
    assert jnp.allclose(out_bf, out_ref, atol=3e-2, rtol=3e-2)

    # f32 path for a tight numerical check of the kernel structure.
    lin_f32, out_f32 = convnet_head(x, w1, b1, w2, b2, compute_dtype=jnp.float32)
    jax.block_until_ready((lin_f32, out_f32))
    assert jnp.allclose(lin_f32, lin_ref, atol=1e-3, rtol=1e-3)
    assert jnp.allclose(out_f32, out_ref, atol=1e-3, rtol=1e-3)

    print("KERNEL_OK")
</pallas_src>

<mosaic_0001>
module attributes {stable_mosaic.version = 11 : i64} {
  func.func @convnet_head_kernel(%arg0: i32, %arg1: memref<2x16x2048xbf16, #tpu.memory_space<vmem>>, %arg2: memref<2048x512xbf16, #tpu.memory_space<vmem>>, %arg3: memref<1x512xf32, #tpu.memory_space<vmem>>, %arg4: memref<512x128xbf16, #tpu.memory_space<vmem>>, %arg5: memref<1x128xf32, #tpu.memory_space<vmem>>, %arg6: memref<2x512xf32, #tpu.memory_space<vmem>>, %arg7: memref<2x128xf32, #tpu.memory_space<vmem>>) attributes {dimension_semantics = [#tpu.dimension_semantics<parallel>], iteration_bounds = array<i64: 1>, scalar_prefetch = 0 : i64, scratch_operands = 0 : i64, tpu.core_type = #tpu.core_type<tc>, window_params = [{transform_indices = @transform_0, window_bounds = array<i64: 2, 16, 2048>}, {pipeline_mode = #tpu.pipeline_mode<synchronous>, transform_indices = @transform_1, window_bounds = array<i64: 2048, 512>}, {pipeline_mode = #tpu.pipeline_mode<synchronous>, transform_indices = @transform_2, window_bounds = array<i64: 1, 512>}, {pipeline_mode = #tpu.pipeline_mode<synchronous>, transform_indices = @transform_3, window_bounds = array<i64: 512, 128>}, {pipeline_mode = #tpu.pipeline_mode<synchronous>, transform_indices = @transform_4, window_bounds = array<i64: 1, 128>}, {transform_indices = @transform_5, window_bounds = array<i64: 2, 512>}, {transform_indices = @transform_6, window_bounds = array<i64: 2, 128>}]} {
    %c0 = arith.constant 0 : index
    %c0_0 = arith.constant 0 : index
    %c0_1 = arith.constant 0 : index
    %0 = vector.load %arg1[%c0, %c0_0, %c0_1] : memref<2x16x2048xbf16, #tpu.memory_space<vmem>>, vector<2x16x2048xbf16>
    %1 = arith.extf %0 : vector<2x16x2048xbf16> to vector<2x16x2048xf32>
    %cst = arith.constant dense<0.000000e+00> : vector<2x2048xf32>
    %2 = vector.multi_reduction <add>, %1, %cst [1] : vector<2x16x2048xf32> to vector<2x2048xf32>
    %3 = arith.truncf %2 : vector<2x2048xf32> to vector<2x2048xbf16>
    %c0_2 = arith.constant 0 : index
    %c0_3 = arith.constant 0 : index
    %4 = vector.load %arg2[%c0_2, %c0_3] : memref<2048x512xbf16, #tpu.memory_space<vmem>>, vector<2048x512xbf16>
    %cst_4 = arith.constant dense<0.000000e+00> : vector<2x512xf32>
    %5 = tpu.matmul %3, %4, %cst_4 {dimension_numbers = #tpu.dot_dimension_numbers<[1], [0], [0], [1], [0, 0, 1, 1], [], []>} : vector<2x2048xbf16>, vector<2048x512xbf16>, vector<2x512xf32> -> vector<2x512xf32>
    %c0_5 = arith.constant 0 : index
    %c0_6 = arith.constant 0 : index
    %6 = vector.load %arg3[%c0_5, %c0_6] : memref<1x512xf32, #tpu.memory_space<vmem>>, vector<1x512xf32>
    %7 = vector.broadcast %6 : vector<1x512xf32> to vector<2x512xf32>
    %8 = arith.addf %5, %7 : vector<2x512xf32>
    %c0_7 = arith.constant 0 : index
    %c0_8 = arith.constant 0 : index
    %9 = vector.load %arg6[%c0_7, %c0_8] : memref<2x512xf32, #tpu.memory_space<vmem>>, vector<2x512xf32>
    tpu.vector_store %arg6[%c0_7, %c0_8], %8 {strides = array<i32>} : memref<2x512xf32, #tpu.memory_space<vmem>>, vector<2x512xf32>,
    %cst_9 = arith.constant 0.000000e+00 : f32
    %10 = vector.broadcast %cst_9 : f32 to vector<2x512xf32>
    %11 = arith.maximumf %8, %10 : vector<2x512xf32>
    %12 = arith.truncf %11 : vector<2x512xf32> to vector<2x512xbf16>
    %c0_10 = arith.constant 0 : index
    %c0_11 = arith.constant 0 : index
    %13 = vector.load %arg4[%c0_10, %c0_11] : memref<512x128xbf16, #tpu.memory_space<vmem>>, vector<512x128xbf16>
    %cst_12 = arith.constant dense<0.000000e+00> : vector<2x128xf32>
    %14 = tpu.matmul %12, %13, %cst_12 {dimension_numbers = #tpu.dot_dimension_numbers<[1], [0], [0], [1], [0, 0, 1, 1], [], []>} : vector<2x512xbf16>, vector<512x128xbf16>, vector<2x128xf32> -> vector<2x128xf32>
    %c0_13 = arith.constant 0 : index
    %c0_14 = arith.constant 0 : index
    %15 = vector.load %arg5[%c0_13, %c0_14] : memref<1x128xf32, #tpu.memory_space<vmem>>, vector<1x128xf32>
    %16 = vector.broadcast %15 : vector<1x128xf32> to vector<2x128xf32>
    %17 = arith.addf %14, %16 : vector<2x128xf32>
    %c0_15 = arith.constant 0 : index
    %c0_16 = arith.constant 0 : index
    %18 = vector.load %arg7[%c0_15, %c0_16] : memref<2x128xf32, #tpu.memory_space<vmem>>, vector<2x128xf32>
    tpu.vector_store %arg7[%c0_15, %c0_16], %17 {strides = array<i32>} : memref<2x128xf32, #tpu.memory_space<vmem>>, vector<2x128xf32>,
    return
  }
  func.func @transform_0(%arg0: i32) -> (i32, i32, i32) {
    %c0_i32 = arith.constant 0 : i32
    %c0_i32_0 = arith.constant 0 : i32
    %c0_i32_1 = arith.constant 0 : i32
    return %arg0, %c0_i32, %c0_i32_0 : i32, i32, i32
  }
  func.func @transform_1(%arg0: i32) -> (i32, i32) {
    %c0_i32 = arith.constant 0 : i32
    %c0_i32_0 = arith.constant 0 : i32
    %c0_i32_1 = arith.constant 0 : i32
    return %c0_i32, %c0_i32_0 : i32, i32
  }
  func.func @transform_2(%arg0: i32) -> (i32, i32) {
    %c0_i32 = arith.constant 0 : i32
    %c0_i32_0 = arith.constant 0 : i32
    %c0_i32_1 = arith.constant 0 : i32
    return %c0_i32, %c0_i32_0 : i32, i32
  }
  func.func @transform_3(%arg0: i32) -> (i32, i32) {
    %c0_i32 = arith.constant 0 : i32
    %c0_i32_0 = arith.constant 0 : i32
    %c0_i32_1 = arith.constant 0 : i32
    return %c0_i32, %c0_i32_0 : i32, i32
  }
  func.func @transform_4(%arg0: i32) -> (i32, i32) {
    %c0_i32 = arith.constant 0 : i32
    %c0_i32_0 = arith.constant 0 : i32
    %c0_i32_1 = arith.constant 0 : i32
    return %c0_i32, %c0_i32_0 : i32, i32
  }
  func.func @transform_5(%arg0: i32) -> (i32, i32) {
    %c0_i32 = arith.constant 0 : i32
    %c0_i32_0 = arith.constant 0 : i32
    return %arg0, %c0_i32 : i32, i32
  }
  func.func @transform_6(%arg0: i32) -> (i32, i32) {
    %c0_i32 = arith.constant 0 : i32
    %c0_i32_0 = arith.constant 0 : i32
    return %arg0, %c0_i32 : i32, i32
  }
}

</mosaic_0001>

<bundles_post_ra>
// kernel: tpu_custom_call.1
= control target key start
LH: loop header
LB: loop body
LE: loop exit
PB: predicated region body
PF: predicated region fallthrough
CT: control target
= control target key end

     0   :  { %12 = vsyncpa [#allocation3], 0  ;;  %s8620_s0 = inlined_call_operand.hbm [shape: bf16[2,16,2048], index: 0, kind: input, shape index: {}]   ;;  %s8621_s1 = inlined_call_operand.hbm [shape: bf16[2048,512], index: 1, kind: input, shape index: {}]   ;;  %s8622_s2 = inlined_call_operand.hbm [shape: f32[1,512], index: 2, kind: input, shape index: {}]   ;;  %s8623_s3 = inlined_call_operand.hbm [shape: bf16[512,128], index: 3, kind: input, shape index: {}]   ;;  %s8624_s4 = inlined_call_operand.hbm [shape: f32[1,128], index: 4, kind: input, shape index: {}]   ;;  %s8625_s5 = inlined_call_operand.hbm [shape: f32[2,512], index: 5, kind: output, shape index: {0}]   ;;  %s8626_s6 = inlined_call_operand.hbm [shape: f32[2,128], index: 6, kind: output, shape index: {1}]  }
   0x1   :  { %13 = vsyncpa [#allocation6], 0 }
   0x2   :  { %14 = vsyncpa [#allocation9], 0 }
   0x3   :  { %15 = vsyncpa [#allocation4], 0  ;;  %s34_s23 = sshll.u32 %s8621_s1, 4  ;;  %s35_s23 = int_to_ptr.hbm [resolvable:$true] %s34_s23 }
   0x4   :  { %16 = vsyncpa [#allocation13], 0  ;;  %s7761_s24 = smov [#allocation5]   ;;  %s7762_s26 = smov 256  }
   0x5   :  { %s36_s25 = sshll.u32 %s7761_s24, 4  ;;  %s7763_s27 = smov 16   ;;  %s37_s25 = int_to_ptr.vmem [resolvable:$true] %s36_s25 }
   0x6   :  { %42 = dma.hbm_to_vmem [thread:$0]  %s35_s23, 65536, %s37_s25, [#allocation6], %s7762_s26, %s7762_s26, %s7763_s27  }
   0x7   :  { %s58_s30 = sshll.u32 %s8623_s3, 4  ;;  %s7764_s7 = smov [#allocation8]   ;;  %s59_s30 = int_to_ptr.hbm [resolvable:$true] %s58_s30 }
   0x8   :  { %s60_s8 = sshll.u32 %s7764_s7, 4  ;;  %s7765_s9 = smov 64   ;;  %s61_s8 = int_to_ptr.vmem [resolvable:$true] %s60_s8 }
   0x9   :  { %s7766_s10 = smov 4   ;;  %s21_s12 = sshll.u32 %s8620_s0, 4  ;;  %s22_s12 = int_to_ptr.hbm [resolvable:$true] %s21_s12 }
   0xa   :  { %66 = dma.hbm_to_vmem [thread:$0]  %s59_s30, 4096, %s61_s8, [#allocation9], %s7765_s9, %s7765_s9, %s7766_s10  }
   0xb   :  { %s7767_s13 = smov [#allocation2]   ;;  %s7768_s15 = smov 1024  }
   0xc   :  { %s23_s14 = sshll.u32 %s7767_s13, 4  ;;  %s48_s3 = sshll.u32 %s8622_s2, 4  ;;  %s24_s14 = int_to_ptr.vmem [resolvable:$true] %s23_s14  ;;  %s49_s3 = int_to_ptr.hbm [resolvable:$true] %s48_s3 }
   0xd   :  { %29 = dma.hbm_to_vmem [thread:$0]  %s22_s12, 4096, %s24_s14, [#allocation3], %s7768_s15, %s7768_s15, %s7765_s9  }
   0xe   :  { %s7769_s18 = smov [#allocation7]   ;;  %s72_s22 = sshll.u32 %s8624_s4, 4  ;;  %s73_s22 = int_to_ptr.hbm [resolvable:$true] %s72_s22 }
   0xf   :  { %s50_s19 = sshll.u32 %s7769_s18, 4  ;;  %s7770_s0 = smov [#allocation10]   ;;  %s51_s19 = int_to_ptr.vmem [resolvable:$true] %s50_s19 }
  0x10   :  { %53 = dma.hbm_to_vmem [thread:$0]  %s49_s3, 64, %s51_s19, [#allocation6]  }
  0x11   :  { %s74_s23 = sshll.u32 %s7770_s0, 4  ;;  %s75_s23 = int_to_ptr.vmem [resolvable:$true] %s74_s23 }
  0x12   :  { %77 = dma.hbm_to_vmem [thread:$0]  %s73_s22, 16, %s75_s23, [#allocation9]  }
  0x13   :  { %7751 = dma.done.wait [#allocation3], 4096  }
  0x14   :  { %7752 = vsyncadd [#allocation3], 4294963200 }
  0x15   :  { %7753 = dma.done.wait [#allocation6], 65600  }
  0x16   :  { %7754 = vsyncadd [#allocation6], 4294901696 }
  0x17   :  { %7755 = dma.done.wait [#allocation9], 4112  }
  0x18   :  { %7756 = vsyncadd [#allocation9], 4294963184  ;;  %v4962_v0 = vld [vmem:[#allocation5 + $0xe0] sm:$0xf]  ;;  %v7054_v1 = vld [vmem:[#allocation5 + $0xec] sm:$0xf0] }
  0x19   :  { %v5090_v2 = vld [vmem:[#allocation5 + $0x1e0] sm:$0xf]  ;;  %v4963_v3 = vor.u32 %v7054_v1, %v4962_v0  ;;  %v7086_v4 = vld [vmem:[#allocation5 + $0x1ec] sm:$0xf0]  ;;  %vm1036_vm0 = vcmask 1041409   ;;  %vm4484_vm1 = vcmask 1041408  }
  0x1a   :  { %v5218_v5 = vld [vmem:[#allocation5 + $0x2e0] sm:$0xf]  ;;  %v7118_v6 = vld [vmem:[#allocation5 + $0x2ec] sm:$0xf0]  ;;  %v5091_v7 = vor.u32 %v7086_v4, %v5090_v2  ;;  %vm4486_vm2 = vcmask 1045508   ;;  %vm4488_vm3 = vcmask 1043456  }
  0x1b   :  { %v5219_v8 = vor.u32 %v7118_v6, %v5218_v5  ;;  %v5346_v9 = vld [vmem:[#allocation5 + $0x3e0] sm:$0xf]  ;;  %v7150_v10 = vld [vmem:[#allocation5 + $0x3ec] sm:$0xf0]  ;;  %3645 = vmatpush.bf16.msra.mxu0 %v4963_v3  ;;  %s7771_s2 = smov [#allocation11]   ;;  %s4820_s26 = sshll.u32 %s8625_s5, 4  ;;  %s4821_s26 = int_to_ptr.hbm [resolvable:$true] %s4820_s26 }
  0x1c   :  { %v4946_v11 = vld [vmem:[#allocation5 + $0xc0] sm:$0xf]  ;;  %v5347_v12 = vor.u32 %v7150_v10, %v5346_v9  ;;  %v7050_v13 = vld [vmem:[#allocation5 + $0xcc] sm:$0xf0]  ;;  %3658 = vmatpush.bf16.msra.mxu1 %v5091_v7  ;;  %s4818_s4 = sshll.u32 %s7771_s2, 4  ;;  %s7772_s27 = smov [#allocation12]   ;;  %s4819_s4 = int_to_ptr.vmem [resolvable:$true] %s4818_s4 }
  0x1d   :  { %v5074_v14 = vld [vmem:[#allocation5 + $0x1c0] sm:$0xf]  ;;  %v7082_v15 = vld [vmem:[#allocation5 + $0x1cc] sm:$0xf0]  ;;  %3671 = vmatpush.bf16.msra.mxu2 %v5219_v8  ;;  %v4947_v16 = vor.u32 %v7050_v13, %v4946_v11  ;;  %s4829_s28 = sshll.u32 %s7772_s27, 4  ;;  %s4831_s7 = sshll.u32 %s8626_s6, 4  ;;  %s4830_s28 = int_to_ptr.vmem [resolvable:$true] %s4829_s28  ;;  %s4832_s7 = int_to_ptr.hbm [resolvable:$true] %s4831_s7 }
  0x1e   :  { %v5075_v17 = vor.u32 %v7082_v15, %v5074_v14  ;;  %v5202_v18 = vld [vmem:[#allocation5 + $0x2c0] sm:$0xf]  ;;  %v7114_v19 = vld [vmem:[#allocation5 + $0x2cc] sm:$0xf0]  ;;  %3684 = vmatpush.bf16.msra.mxu3 %v5347_v12 }
  0x1f   :  { %v5330_v20 = vld [vmem:[#allocation5 + $0x3c0] sm:$0xf]  ;;  %v5203_v21 = vor.u32 %v7114_v19, %v5202_v18  ;;  %v7146_v22 = vld [vmem:[#allocation5 + $0x3cc] sm:$0xf0]  ;;  %3646 = vmatpush.bf16.msra.mxu0 %v4947_v16 }
  0x20   :  { %v4930_v23 = vld [vmem:[#allocation5 + $0xa0] sm:$0xf]  ;;  %v7046_v24 = vld [vmem:[#allocation5 + $0xac] sm:$0xf0]  ;;  %v5331_v25 = vor.u32 %v7146_v22, %v5330_v20  ;;  %3659 = vmatpush.bf16.msra.mxu1 %v5075_v17 }
  0x21   :  { %v5058_v26 = vld [vmem:[#allocation5 + $0x1a0] sm:$0xf]  ;;  %v7078_v27 = vld [vmem:[#allocation5 + $0x1ac] sm:$0xf0]  ;;  %v4931_v29 = vor.u32 %v7046_v24, %v4930_v23  ;;  %3672 = vmatpush.bf16.msra.mxu2 %v5203_v21 }
  0x22   :  { %v5186_v28 = vld [vmem:[#allocation5 + $0x2a0] sm:$0xf]  ;;  %v7110_v30 = vld [vmem:[#allocation5 + $0x2ac] sm:$0xf0]  ;;  %v5059_v33 = vor.u32 %v7078_v27, %v5058_v26  ;;  %3685 = vmatpush.bf16.msra.mxu3 %v5331_v25 }
  0x23   :  { %v5314_v31 = vld [vmem:[#allocation5 + $0x3a0] sm:$0xf]  ;;  %v7142_v32 = vld [vmem:[#allocation5 + $0x3ac] sm:$0xf0]  ;;  %v5187_v34 = vor.u32 %v7110_v30, %v5186_v28  ;;  %3647 = vmatpush.bf16.msra.mxu0 %v4931_v29 }
  0x24   :  { %v4914_v35 = vld [vmem:[#allocation5 + $0x80] sm:$0xf]  ;;  %v7042_v36 = vld [vmem:[#allocation5 + $0x8c] sm:$0xf0]  ;;  %v5315_v38 = vor.u32 %v7142_v32, %v5314_v31  ;;  %3660 = vmatpush.bf16.msra.mxu1 %v5059_v33 }
  0x25   :  { %v5042_v37 = vld [vmem:[#allocation5 + $0x180] sm:$0xf]  ;;  %v7074_v39 = vld [vmem:[#allocation5 + $0x18c] sm:$0xf0]  ;;  %v4915_v44 = vor.u32 %v7042_v36, %v4914_v35  ;;  %3673 = vmatpush.bf16.msra.mxu2 %v5187_v34 }
  0x26   :  { %v5170_v40 = vld [vmem:[#allocation5 + $0x280] sm:$0xf]  ;;  %v7106_v41 = vld [vmem:[#allocation5 + $0x28c] sm:$0xf0]  ;;  %v5043_v45 = vor.u32 %v7074_v39, %v5042_v37  ;;  %3686 = vmatpush.bf16.msra.mxu3 %v5315_v38 }
  0x27   :  { %v5298_v42 = vld [vmem:[#allocation5 + $0x380] sm:$0xf]  ;;  %v7138_v43 = vld [vmem:[#allocation5 + $0x38c] sm:$0xf0]  ;;  %v5171_v46 = vor.u32 %v7106_v41, %v5170_v40  ;;  %3648 = vmatpush.bf16.msra.mxu0 %v4915_v44 }
  0x28   :  { %v4898_v47 = vld [vmem:[#allocation5 + $0x60] sm:$0xf]  ;;  %v7038_v48 = vld [vmem:[#allocation5 + $0x6c] sm:$0xf0]  ;;  %v5299_v50 = vor.u32 %v7138_v43, %v5298_v42  ;;  %3661 = vmatpush.bf16.msra.mxu1 %v5043_v45 }
  0x29   :  { %v5026_v49 = vld [vmem:[#allocation5 + $0x160] sm:$0xf]  ;;  %v7070_v51 = vld [vmem:[#allocation5 + $0x16c] sm:$0xf0]  ;;  %v4899_v56 = vor.u32 %v7038_v48, %v4898_v47  ;;  %3674 = vmatpush.bf16.msra.mxu2 %v5171_v46 }
  0x2a   :  { %v5154_v52 = vld [vmem:[#allocation5 + $0x260] sm:$0xf]  ;;  %v7102_v53 = vld [vmem:[#allocation5 + $0x26c] sm:$0xf0]  ;;  %v5027_v57 = vor.u32 %v7070_v51, %v5026_v49  ;;  %3687 = vmatpush.bf16.msra.mxu3 %v5299_v50 }
  0x2b   :  { %v5282_v54 = vld [vmem:[#allocation5 + $0x360] sm:$0xf]  ;;  %v7134_v55 = vld [vmem:[#allocation5 + $0x36c] sm:$0xf0]  ;;  %v5155_v58 = vor.u32 %v7102_v53, %v5154_v52  ;;  %3649 = vmatpush.bf16.msra.mxu0 %v4899_v56 }
  0x2c   :  { %v4882_v59 = vld [vmem:[#allocation5 + $0x40] sm:$0xf]  ;;  %v7034_v60 = vld [vmem:[#allocation5 + $0x4c] sm:$0xf0]  ;;  %v5283_v62 = vor.u32 %v7134_v55, %v5282_v54  ;;  %3662 = vmatpush.bf16.msra.mxu1 %v5027_v57 }
  0x2d   :  { %v5010_v61 = vld [vmem:[#allocation5 + $0x140] sm:$0xf]  ;;  %v7066_v63 = vld [vmem:[#allocation5 + $0x14c] sm:$0xf0]  ;;  %v4883_v4 = vor.u32 %v7034_v60, %v4882_v59  ;;  %3675 = vmatpush.bf16.msra.mxu2 %v5155_v58 }
  0x2e   :  { %v5138_v0 = vld [vmem:[#allocation5 + $0x240] sm:$0xf]  ;;  %v7098_v1 = vld [vmem:[#allocation5 + $0x24c] sm:$0xf0]  ;;  %v5011_v6 = vor.u32 %v7066_v63, %v5010_v61  ;;  %3688 = vmatpush.bf16.msra.mxu3 %v5283_v62 }
  0x2f   :  { %v5266_v2 = vld [vmem:[#allocation5 + $0x340] sm:$0xf]  ;;  %v7130_v3 = vld [vmem:[#allocation5 + $0x34c] sm:$0xf0]  ;;  %v5139_v7 = vor.u32 %v7098_v1, %v5138_v0  ;;  %3650 = vmatpush.bf16.msra.mxu0 %v4883_v4 }
  0x30   :  { %v4866_v5 = vld [vmem:[#allocation5 + $0x20] sm:$0xf]  ;;  %v7030_v8 = vld [vmem:[#allocation5 + $0x2c] sm:$0xf0]  ;;  %v5267_v11 = vor.u32 %v7130_v3, %v5266_v2  ;;  %3663 = vmatpush.bf16.msra.mxu1 %v5011_v6 }
  0x31   :  { %v4994_v9 = vld [vmem:[#allocation5 + $0x120] sm:$0xf]  ;;  %v7062_v10 = vld [vmem:[#allocation5 + $0x12c] sm:$0xf0]  ;;  %v4867_v18 = vor.u32 %v7030_v8, %v4866_v5  ;;  %3676 = vmatpush.bf16.msra.mxu2 %v5139_v7 }
  0x32   :  { %v5122_v12 = vld [vmem:[#allocation5 + $0x220] sm:$0xf]  ;;  %v7094_v13 = vld [vmem:[#allocation5 + $0x22c] sm:$0xf0]  ;;  %v4995_v23 = vor.u32 %v7062_v10, %v4994_v9  ;;  %3689 = vmatpush.bf16.msra.mxu3 %v5267_v11 }
  0x33   :  { %v5250_v14 = vld [vmem:[#allocation5 + $0x320] sm:$0xf]  ;;  %v7126_v15 = vld [vmem:[#allocation5 + $0x32c] sm:$0xf0]  ;;  %v5123_v24 = vor.u32 %v7094_v13, %v5122_v12  ;;  %3651 = vmatpush.bf16.msra.mxu0 %v4867_v18 }
  0x34   :  { %v4850_v16 = vld [vmem:[#allocation5] sm:$0xf]  ;;  %v7026_v17 = vld [vmem:[#allocation5 + $0xc] sm:$0xf0]  ;;  %v5251_v28 = vor.u32 %v7126_v15, %v5250_v14  ;;  %3664 = vmatpush.bf16.msra.mxu1 %v4995_v23 }
  0x35   :  { %v4978_v19 = vld [vmem:[#allocation5 + $0x100] sm:$0xf]  ;;  %v7058_v20 = vld [vmem:[#allocation5 + $0x10c] sm:$0xf0]  ;;  %v4851_v35 = vor.u32 %v7026_v17, %v4850_v16  ;;  %3677 = vmatpush.bf16.msra.mxu2 %v5123_v24 }
  0x36   :  { %v5106_v21 = vld [vmem:[#allocation5 + $0x200] sm:$0xf]  ;;  %v7090_v22 = vld [vmem:[#allocation5 + $0x20c] sm:$0xf0]  ;;  %v4979_v39 = vor.u32 %v7058_v20, %v4978_v19  ;;  %3690 = vmatpush.bf16.msra.mxu3 %v5251_v28 }
  0x37   :  { %v5234_v25 = vld [vmem:[#allocation5 + $0x300] sm:$0xf]  ;;  %v7122_v26 = vld [vmem:[#allocation5 + $0x30c] sm:$0xf0]  ;;  %v5107_v40 = vor.u32 %v7090_v22, %v5106_v21  ;;  %3652 = vmatpush.bf16.msra.mxu0 %v4851_v35 }
  0x38   :  { %v5474_v27 = vld [vmem:[#allocation5 + $0x4e0] sm:$0xf]  ;;  %v7182_v29 = vld [vmem:[#allocation5 + $0x4ec] sm:$0xf0]  ;;  %v5235_v47 = vor.u32 %v7122_v26, %v5234_v25  ;;  %3665 = vmatpush.bf16.msra.mxu1 %v4979_v39  ;;  %v99_v39 = vld [vmem:[#allocation2 + $0x8] sm:$0xff] }
  0x39   :  { %v5602_v30 = vld [vmem:[#allocation5 + $0x5e0] sm:$0xf]  ;;  %v7214_v31 = vld [vmem:[#allocation5 + $0x5ec] sm:$0xf0]  ;;  %v5475_v48 = vor.u32 %v7182_v29, %v5474_v27  ;;  %3678 = vmatpush.bf16.msra.mxu2 %v5107_v40  ;;  %v107_v40 = vld [vmem:[#allocation2 + $0x48] sm:$0xff] }
  0x3a   :  { %v5730_v32 = vld [vmem:[#allocation5 + $0x6e0] sm:$0xf]  ;;  %v7246_v33 = vld [vmem:[#allocation5 + $0x6ec] sm:$0xf0]  ;;  %v5603_v55 = vor.u32 %v7214_v31, %v5602_v30  ;;  %3691 = vmatpush.bf16.msra.mxu3 %v5235_v47  ;;  %v133_v47 = vunpack.c.h.bf16 %v99_v39 }
  0x3b   :  { %v5858_v34 = vld [vmem:[#allocation5 + $0x7e0] sm:$0xf]  ;;  %v7278_v36 = vld [vmem:[#allocation5 + $0x7ec] sm:$0xf0]  ;;  %v5731_v56 = vor.u32 %v7246_v33, %v5730_v32  ;;  %3697 = vmatpush.bf16.msrb.mxu0 %v5475_v48 }
  0x3c   :  { %v7823_v37 = vld [vmem:[#allocation5 + $0x4c0] sm:$0xf]  ;;  %v7825_v38 = vld [vmem:[#allocation5 + $0x4cc] sm:$0xf0]  ;;  %v5859_v0 = vor.u32 %v7278_v36, %v5858_v34  ;;  %3710 = vmatpush.bf16.msrb.mxu1 %v5603_v55 }
  0x3d   :  { %v7827_v41 = vld [vmem:[#allocation5 + $0x5c0] sm:$0xf]  ;;  %v7829_v42 = vld [vmem:[#allocation5 + $0x5cc] sm:$0xf0]  ;;  %v5459_v4 = vor.u32 %v7825_v38, %v7823_v37  ;;  %3723 = vmatpush.bf16.msrb.mxu2 %v5731_v56 }
  0x3e   :  { %v7831_v43 = vld [vmem:[#allocation5 + $0x6c0] sm:$0xf]  ;;  %v7833_v44 = vld [vmem:[#allocation5 + $0x6cc] sm:$0xf0]  ;;  %v5587_v8 = vor.u32 %v7829_v42, %v7827_v41  ;;  %3736 = vmatpush.bf16.msrb.mxu3 %v5859_v0  ;;  %v115_v42 = vld [vmem:[#allocation2 + $0x88] sm:$0xff] }
  0x3f   :  { %v7835_v45 = vld [vmem:[#allocation5 + $0x7c0] sm:$0xf]  ;;  %v7837_v46 = vld [vmem:[#allocation5 + $0x7cc] sm:$0xf0]  ;;  %v5715_v9 = vor.u32 %v7833_v44, %v7831_v43  ;;  %3698 = vmatpush.bf16.msrb.mxu0 %v5459_v4  ;;  %v123_v43 = vld [vmem:[#allocation2 + $0xc8] sm:$0xff]  ;;  %v132_v44 = vunpack.c.l.bf16 %v99_v39  ;;  %v164_v48 = vunpack.c.l.bf16 %v115_v42 }
  0x40   :  { %v7839_v49 = vld [vmem:[#allocation5 + $0x4a0] sm:$0xf]  ;;  %v7841_v50 = vld [vmem:[#allocation5 + $0x4ac] sm:$0xf0]  ;;  %v5843_v10 = vor.u32 %v7837_v46, %v7835_v45  ;;  %3711 = vmatpush.bf16.msrb.mxu1 %v5587_v8  ;;  %v148_v45 = vunpack.c.l.bf16 %v107_v40  ;;  %v181_v39 = vunpack.c.h.bf16 %v123_v43 }
  0x41   :  { %v7843_v51 = vld [vmem:[#allocation5 + $0x5a0] sm:$0xf]  ;;  %v7845_v52 = vld [vmem:[#allocation5 + $0x5ac] sm:$0xf0]  ;;  %v5443_v14 = vor.u32 %v7841_v50, %v7839_v49  ;;  %3724 = vmatpush.bf16.msrb.mxu2 %v5715_v9  ;;  %v180_v49 = vunpack.c.l.bf16 %v123_v43 }
  0x42   :  { %v7847_v53 = vld [vmem:[#allocation5 + $0x6a0] sm:$0xf]  ;;  %v7849_v54 = vld [vmem:[#allocation5 + $0x6ac] sm:$0xf0]  ;;  %v5571_v15 = vor.u32 %v7845_v52, %v7843_v51  ;;  %3737 = vmatpush.bf16.msrb.mxu3 %v5843_v10  ;;  %v208_v55 = vadd.f32 %v148_v45, %v132_v44  ;;  %v165_v10 = vunpack.c.h.bf16 %v115_v42 }
  0x43   :  { %v7851_v57 = vld [vmem:[#allocation5 + $0x7a0] sm:$0xf]  ;;  %v7853_v58 = vld [vmem:[#allocation5 + $0x7ac] sm:$0xf0]  ;;  %v5699_v16 = vor.u32 %v7849_v54, %v7847_v53  ;;  %v149_v54 = vunpack.c.h.bf16 %v107_v40  ;;  %3699 = vmatpush.bf16.msrb.mxu0 %v5443_v14  ;;  %v320_v9 = vadd.f32 %v180_v49, %v164_v48 }
  0x44   :  { %v7855_v59 = vld [vmem:[#allocation5 + $0x480] sm:$0xf]  ;;  %v7857_v60 = vld [vmem:[#allocation5 + $0x48c] sm:$0xf0]  ;;  %v5827_v20 = vor.u32 %v7853_v58, %v7851_v57  ;;  %3712 = vmatpush.bf16.msrb.mxu1 %v5571_v15  ;;  %v209_v45 = vrot.slane %v208_v55, 4 }
  0x45   :  { %v7859_v61 = vld [vmem:[#allocation5 + $0x580] sm:$0xf]  ;;  %v7861_v62 = vld [vmem:[#allocation5 + $0x58c] sm:$0xf0]  ;;  %v5427_v21 = vor.u32 %v7857_v60, %v7855_v59  ;;  %v215_v41 = vadd.f32 %v149_v54, %v133_v47  ;;  %3725 = vmatpush.bf16.msrb.mxu2 %v5699_v16  ;;  %v321_v42 = vrot.slane %v320_v9, 4  ;;  %v327_v47 = vadd.f32 %v181_v39, %v165_v10  ;;  %v8007_v39 = vld [vmem:[#allocation2 + $0x18] sm:$0xff] }
  0x46   :  { %v7863_v63 = vld [vmem:[#allocation5 + $0x680] sm:$0xf]  ;;  %v7865_v1 = vld [vmem:[#allocation5 + $0x68c] sm:$0xf0]  ;;  %v5555_v22 = vor.u32 %v7861_v62, %v7859_v61  ;;  %3738 = vmatpush.bf16.msrb.mxu3 %v5827_v20  ;;  %v210_v49 = vadd.f32 %v209_v45, %v208_v55 }
  0x47   :  { %v7867_v2 = vld [vmem:[#allocation5 + $0x780] sm:$0xf]  ;;  %v7869_v3 = vld [vmem:[#allocation5 + $0x78c] sm:$0xf0]  ;;  %v5683_v23 = vor.u32 %v7865_v1, %v7863_v63  ;;  %v216_v43 = vrot.slane %v215_v41, 4  ;;  %3700 = vmatpush.bf16.msrb.mxu0 %v5427_v21  ;;  %v322_v54 = vadd.f32 %v321_v42, %v320_v9 }
  0x48   :  { %v7873_v5 = vld [vmem:[#allocation5 + $0x460] sm:$0xf]  ;;  %v7875_v6 = vld [vmem:[#allocation5 + $0x46c] sm:$0xf0]  ;;  %v5811_v27 = vor.u32 %v7869_v3, %v7867_v2  ;;  %3713 = vmatpush.bf16.msrb.mxu1 %v5555_v22  ;;  %v211_v55 = vrot.slane %v210_v49, 2 }
  0x49   :  { %v7877_v7 = vld [vmem:[#allocation5 + $0x560] sm:$0xf]  ;;  %v7885_v11 = vld [vmem:[#allocation5 + $0x56c] sm:$0xf0]  ;;  %v5411_v28 = vor.u32 %v7875_v6, %v7873_v5  ;;  %3726 = vmatpush.bf16.msrb.mxu2 %v5683_v23  ;;  %v323_v60 = vrot.slane %v322_v54, 2 }
  0x4a   :  { %v7887_v12 = vld [vmem:[#allocation5 + $0x660] sm:$0xf]  ;;  %v7889_v13 = vld [vmem:[#allocation5 + $0x66c] sm:$0xf0]  ;;  %v5539_v29 = vor.u32 %v7885_v11, %v7877_v7  ;;  %3739 = vmatpush.bf16.msrb.mxu3 %v5811_v27  ;;  %v212_v61 = vadd.f32 %v211_v55, %v210_v49 }
  0x4b   :  { %v7897_v17 = vld [vmem:[#allocation5 + $0x760] sm:$0xf]  ;;  %v7899_v18 = vld [vmem:[#allocation5 + $0x76c] sm:$0xf0]  ;;  %3701 = vmatpush.bf16.msrb.mxu0 %v5411_v28  ;;  %v324_v1 = vadd.f32 %v323_v60, %v322_v54  ;;  %v8647_v3 = vor.u32 %v7889_v13, %v7887_v12 }
  0x4c   :  { %v7901_v19 = vld [vmem:[#allocation5 + $0x440] sm:$0xf]  ;;  %v7911_v24 = vld [vmem:[#allocation5 + $0x44c] sm:$0xf0]  ;;  %3714 = vmatpush.bf16.msrb.mxu1 %v5539_v29  ;;  %v213_v27 = vrot.slane %v212_v61, 1  ;;  %v8648_v5 = vor.u32 %v7899_v18, %v7897_v17 }
  0x4d   :  { %v7913_v25 = vld [vmem:[#allocation5 + $0x540] sm:$0xf]  ;;  %v7915_v26 = vld [vmem:[#allocation5 + $0x54c] sm:$0xf0]  ;;  %3727 = vmatpush.bf16.msrb.mxu2 %v8647_v3  ;;  %v325_v6 = vrot.slane %v324_v1, 1  ;;  %v8649_v12 = vor.u32 %v7911_v24, %v7901_v19  ;;  %v136_v19 = vunpack.c.l.bf16 %v8007_v39 }
  0x4e   :  { %v7925_v31 = vld [vmem:[#allocation5 + $0x640] sm:$0xf]  ;;  %v7927_v32 = vld [vmem:[#allocation5 + $0x64c] sm:$0xf0]  ;;  %3740 = vmatpush.bf16.msrb.mxu3 %v8648_v5  ;;  %v214_v7 = vadd.f32 %v213_v27, %v212_v61  ;;  %v8650_v17 = vor.u32 %v7915_v26, %v7913_v25 }
  0x4f   :  { %v7929_v33 = vld [vmem:[#allocation5 + $0x740] sm:$0xf]  ;;  %v7939_v38 = vld [vmem:[#allocation5 + $0x74c] sm:$0xf0]  ;;  %3702 = vmatpush.bf16.msrb.mxu0 %v8649_v12  ;;  %v326_v13 = vadd.f32 %v325_v6, %v324_v1  ;;  %v8651_v18 = vor.u32 %v7927_v32, %v7925_v31 }
  0x50   :  { %v7943_v46 = vld [vmem:[#allocation2] sm:$0xff]  ;;  %v7957_v4 = vld [vmem:[#allocation5 + $0x42c] sm:$0xf0]  ;;  %3715 = vmatpush.bf16.msrb.mxu1 %v8650_v17  ;;  %v420_v49 = vpack.c.bf16 %v214_v7, %v214_v7  ;;  %v8652_v24 = vor.u32 %v7939_v38, %v7929_v33 }
  0x51   :  { %v7945_v50 = vld [vmem:[#allocation2 + $0x40] sm:$0xff]  ;;  %v130_v53 = vunpack.c.l.bf16 %v7943_v46  ;;  %v7961_v37 = vld [vmem:[#allocation5 + $0x52c] sm:$0xf0]  ;;  %v131_v59 = vunpack.c.h.bf16 %v7943_v46  ;;  %3728 = vmatpush.bf16.msrb.mxu2 %v8651_v18 }
  0x52   :  { %v7947_v51 = vld [vmem:[#allocation2 + $0x80] sm:$0xff]  ;;  %v146_v56 = vunpack.c.l.bf16 %v7945_v50  ;;  %v7965_v44 = vld [vmem:[#allocation5 + $0x62c] sm:$0xf0]  ;;  %v147_v9 = vunpack.c.h.bf16 %v7945_v50  ;;  %3741 = vmatpush.bf16.msrb.mxu3 %v8652_v24  ;;  %v1006_v31 = vunpack.c.l.b16 %v420_v49  ;;  %v8068_v49 = vld [vmem:[#allocation2 + $0xd8] sm:$0xff] }
  0x53   :  { %v7949_v52 = vld [vmem:[#allocation2 + $0xc0] sm:$0xff]  ;;  %v162_v57 = vunpack.c.l.bf16 %v7947_v51  ;;  %v7971_v14 = vld [vmem:[#allocation5 + $0x72c] sm:$0xf0]  ;;  %v163_v63 = vunpack.c.h.bf16 %v7947_v51 }
  0x54   :  { %v178_v58 = vunpack.c.l.bf16 %v7949_v52  ;;  %v7955_v0 = vld [vmem:[#allocation5 + $0x420] sm:$0xf]  ;;  %v194_v36 = vadd.f32 %v146_v56, %v130_v53  ;;  %v217_v56 = vadd.f32 %v216_v43, %v215_v41  ;;  %v179_v2 = vunpack.c.h.bf16 %v7949_v52  ;;  %v8024_v61 = vld [vmem:[#allocation5 + $0x70c] sm:$0xf0] }
  0x55   :  { %v7959_v8 = vld [vmem:[#allocation5 + $0x520] sm:$0xf]  ;;  %v5379_v34 = vor.u32 %v7957_v4, %v7955_v0  ;;  %v201_v50 = vadd.f32 %v147_v9, %v131_v59  ;;  %v7310_v1 = vld [vmem:[#allocation5 + $0x8ec] sm:$0xf0] }
  0x56   :  { %v7963_v40 = vld [vmem:[#allocation5 + $0x620] sm:$0xf]  ;;  %v306_v35 = vadd.f32 %v178_v58, %v162_v57  ;;  %v5507_v48 = vor.u32 %v7961_v37, %v7959_v8  ;;  %v195_v15 = vrot.slane %v194_v36, 4  ;;  %v328_v57 = vrot.slane %v327_v47, 4  ;;  %v7374_v4 = vld [vmem:[#allocation5 + $0xaec] sm:$0xf0] }
  0x57   :  { %v7969_v30 = vld [vmem:[#allocation5 + $0x720] sm:$0xf]  ;;  %v5635_v53 = vor.u32 %v7965_v44, %v7963_v40  ;;  %v218_v21 = vrot.slane %v217_v56, 2  ;;  %v313_v52 = vadd.f32 %v179_v2, %v163_v63  ;;  %v202_v45 = vrot.slane %v201_v50, 4  ;;  %3703 = vmatpush.bf16.msrb.mxu0 %v5379_v34  ;;  %v8047_v40 = vld [vmem:[#allocation5 + $0x8cc] sm:$0xf0] }
  0x58   :  { %v307_v16 = vrot.slane %v306_v35, 4  ;;  %v5763_v20 = vor.u32 %v7971_v14, %v7969_v30  ;;  %v196_v58 = vadd.f32 %v195_v15, %v194_v36  ;;  %v329_v41 = vadd.f32 %v328_v57, %v327_v47  ;;  %v5362_v54 = vld [vmem:[#allocation5 + $0x400] sm:$0xf]  ;;  %3716 = vmatpush.bf16.msrb.mxu1 %v5507_v48  ;;  %v8054_v7 = vld [vmem:[#allocation5 + $0x9cc] sm:$0xf0] }
  0x59   :  { %v219_v23 = vadd.f32 %v218_v21, %v217_v56  ;;  %v314_v47 = vrot.slane %v313_v52, 4  ;;  %v7154_v56 = vld [vmem:[#allocation5 + $0x40c] sm:$0xf0]  ;;  %v436_v57 = vpack.c.bf16 %v326_v13, %v326_v13  ;;  %v203_v25 = vadd.f32 %v202_v45, %v201_v50  ;;  %v5490_v26 = vld [vmem:[#allocation5 + $0x500] sm:$0xf]  ;;  %3729 = vmatpush.bf16.msrb.mxu2 %v5635_v53  ;;  %v8039_v50 = vld [vmem:[#allocation2 + $0x58] sm:$0xff] }
  0x5a   :  { %v308_v10 = vadd.f32 %v307_v16, %v306_v35  ;;  %v197_v62 = vrot.slane %v196_v58, 2  ;;  %v330_v35 = vrot.slane %v329_v41, 2  ;;  %v5618_v59 = vld [vmem:[#allocation5 + $0x600] sm:$0xf]  ;;  %v5363_v0 = vor.u32 %v7154_v56, %v5362_v54  ;;  %3742 = vmatpush.bf16.msrb.mxu3 %v5763_v20  ;;  %v7402_v13 = vld [vmem:[#allocation5 + $0xbcc] sm:$0xf0] }
  0x5b   :  { %v220_v28 = vrot.slane %v219_v23, 1  ;;  %v315_v21 = vadd.f32 %v314_v47, %v313_v52  ;;  %v8022_v9 = vld [vmem:[#allocation5 + $0x700] sm:$0xf]  ;;  %v204_v38 = vrot.slane %v203_v25, 2 }
  0x5c   :  { %v309_v22 = vrot.slane %v308_v10, 2  ;;  %v198_v36 = vadd.f32 %v197_v62, %v196_v58  ;;  %v331_v51 = vadd.f32 %v330_v35, %v329_v41  ;;  %v7218_v41 = vld [vmem:[#allocation5 + $0x60c] sm:$0xf0]  ;;  %v1022_v62 = vunpack.c.l.b16 %v436_v57  ;;  %v5986_v63 = vld [vmem:[#allocation5 + $0x8e0] sm:$0xf]  ;;  %3704 = vmatpush.bf16.msrb.mxu0 %v5363_v0 }
  0x5d   :  { %v221_v42 = vadd.f32 %v220_v28, %v219_v23  ;;  %v8029_v23 = vld [vmem:[#allocation5 + $0x9e0] sm:$0xf]  ;;  %v8031_v35 = vld [vmem:[#allocation5 + $0x9ec] sm:$0xf0]  ;;  %v316_v27 = vrot.slane %v315_v21, 2  ;;  %v205_v37 = vadd.f32 %v204_v38, %v203_v25  ;;  %v5619_v52 = vor.u32 %v7218_v41, %v5618_v59 }
  0x5e   :  { %v310_v46 = vadd.f32 %v309_v22, %v308_v10  ;;  %v199_v11 = vrot.slane %v198_v36, 1  ;;  %v332_v43 = vrot.slane %v331_v51, 1  ;;  %v7186_v10 = vld [vmem:[#allocation5 + $0x50c] sm:$0xf0]  ;;  %v6242_v34 = vld [vmem:[#allocation5 + $0xae0] sm:$0xf]  ;;  %v1039_v5 = vsel %vm1036_vm0, %v1022_v62, %v1006_v31 }
  0x5f   :  { %v421_v58 = vpack.c.bf16 %v221_v42, %v221_v42  ;;  %v5491_v8 = vor.u32 %v7186_v10, %v5490_v26  ;;  %v8045_v48 = vld [vmem:[#allocation5 + $0x8c0] sm:$0xf]  ;;  %v8051_v53 = vpack.c.b16 %v1039_v5, %v1039_v5  ;;  %v206_v20 = vrot.slane %v205_v37, 1  ;;  %v8061_v42 = vld [vmem:[#allocation2 + $0x98] sm:$0xff]  ;;  %3730 = vmatpush.bf16.msrb.mxu2 %v5619_v52 }
  0x60   :  { %v311_v29 = vrot.slane %v310_v46, 1  ;;  %v200_v15 = vadd.f32 %v199_v11, %v198_v36  ;;  %v333_v55 = vadd.f32 %v332_v43, %v331_v51  ;;  %v6370_v36 = vld [vmem:[#allocation5 + $0xbe0] sm:$0xf]  ;;  %v317_v51 = vadd.f32 %v316_v27, %v315_v21  ;;  %v7398_v21 = vld [vmem:[#allocation5 + $0xbac] sm:$0xf0] }
  0x61   :  { %v1007_v33 = vunpack.c.l.b16 %v421_v58  ;;  %v8049_v44 = vld [vmem:[#allocation5 + $0x9c0] sm:$0xf]  ;;  %v5747_v45 = vor.u32 %v8024_v61, %v8022_v9  ;;  %3679 = vmatmul.bf16.vlgmr.msra.gmra.mxu2 %v8051_v53  ;;  %3717 = vmatpush.bf16.msrb.mxu1 %v5491_v8  ;;  %v5987_v17 = vor.u32 %v7310_v1, %v5986_v63  ;;  %v6115_v18 = vor.u32 %v8031_v35, %v8029_v23  ;;  %v8074_v58 = vld [vmem:[#allocation5 + $0x9ac] sm:$0xf0] }
  0x62   :  { %v312_v16 = vadd.f32 %v311_v29, %v310_v46  ;;  %v418_v32 = vpack.c.bf16 %v200_v15, %v200_v15  ;;  %v437_v22 = vpack.c.bf16 %v333_v55, %v333_v55  ;;  %v7406_v46 = vld [vmem:[#allocation5 + $0xbec] sm:$0xf0]  ;;  %v6226_v11 = vld [vmem:[#allocation5 + $0xac0] sm:$0xf]  ;;  %v318_v47 = vrot.slane %v317_v51, 1 }
  0x63   :  { %v7370_v29 = vld [vmem:[#allocation5 + $0xacc] sm:$0xf0]  ;;  %v6354_v12 = vld [vmem:[#allocation5 + $0xbc0] sm:$0xf]  ;;  %v207_v54 = vadd.f32 %v206_v20, %v205_v37  ;;  %v6243_v56 = vor.u32 %v7374_v4, %v6242_v34  ;;  %v6371_v24 = vor.u32 %v7406_v46, %v6370_v36  ;;  %v152_v57 = vunpack.c.l.bf16 %v8039_v50  ;;  %3743 = vmatpush.bf16.msrb.mxu3 %v5747_v45 }
  0x64   :  { %v434_v60 = vpack.c.bf16 %v312_v16, %v312_v16  ;;  %v1004_v2 = vunpack.c.l.b16 %v418_v32  ;;  %v1023_v6 = vunpack.c.l.b16 %v437_v22  ;;  %v5954_v15 = vld [vmem:[#allocation5 + $0x8a0] sm:$0xf]  ;;  %v7302_v16 = vld [vmem:[#allocation5 + $0x8ac] sm:$0xf0]  ;;  %v319_v26 = vadd.f32 %v318_v47, %v317_v51 }
  0x65   :  { %v8072_v55 = vld [vmem:[#allocation5 + $0x9a0] sm:$0xf]  ;;  %v5971_v10 = vor.u32 %v8047_v40, %v8045_v48  ;;  %v6099_v59 = vor.u32 %v8054_v7, %v8049_v44  ;;  %v168_v31 = vunpack.c.l.bf16 %v8061_v42  ;;  %v7366_v32 = vld [vmem:[#allocation5 + $0xaac] sm:$0xf0]  ;;  %v419_v41 = vpack.c.bf16 %v207_v54, %v207_v54  ;;  %3775 = vmatpush.bf16.msra.mxu2 %v6243_v56 }
  0x66   :  { %v1020_v3 = vunpack.c.l.b16 %v434_v60  ;;  %v1040_v14 = vsel %vm1036_vm0, %v1023_v6, %v1007_v33  ;;  %v6210_v25 = vld [vmem:[#allocation5 + $0xaa0] sm:$0xf]  ;;  %v6227_v9 = vor.u32 %v7370_v29, %v6226_v11  ;;  %v6355_v61 = vor.u32 %v7402_v13, %v6354_v12  ;;  %v100_v22 = vld [vmem:[#allocation2 + $0x10] sm:$0xff] }
  0x67   :  { %v8064_v43 = vpack.c.b16 %v1040_v14, %v1040_v14  ;;  %v6338_v60 = vld [vmem:[#allocation5 + $0xba0] sm:$0xf]  ;;  %v184_v62 = vunpack.c.l.bf16 %v8068_v49  ;;  %v108_v33 = vld [vmem:[#allocation2 + $0x50] sm:$0xff]  ;;  %v435_v38 = vpack.c.bf16 %v319_v26, %v319_v26  ;;  %v236_v63 = vadd.f32 %v152_v57, %v136_v19 }
  0x68   :  { %v1037_v28 = vsel %vm1036_vm0, %v1020_v3, %v1004_v2  ;;  %v5955_v1 = vor.u32 %v7302_v16, %v5954_v15  ;;  %v6083_v2 = vor.u32 %v8074_v58, %v8072_v55  ;;  %v116_v3 = vld [vmem:[#allocation2 + $0x90] sm:$0xff]  ;;  %v1005_v0 = vunpack.c.l.b16 %v419_v41 }
  0x69   :  { %v8056_v30 = vpack.c.b16 %v1037_v28, %v1037_v28  ;;  %8654 = vst [vmem:[#allocation20_spill] sm:$0xff] %v8064_v43  ;;  %3692 = vmatmul.bf16.vlgmr.msra.gmra.mxu3 %v8064_v43  ;;  %v124_v27 = vld [vmem:[#allocation2 + $0xd0] sm:$0xff]  ;;  %v348_v34 = vadd.f32 %v184_v62, %v168_v31  ;;  %v6211_v4 = vor.u32 %v7366_v32, %v6210_v25  ;;  %v1021_v46 = vunpack.c.l.b16 %v435_v38 }
  0x6a   :  { %3788 = vmatpush.bf16.msra.mxu3 %v6371_v24  ;;  %v6339_v36 = vor.u32 %v7398_v21, %v6338_v60  ;;  %v237_v5 = vrot.slane %v236_v63, 4  ;;  %v134_v6 = vunpack.c.l.bf16 %v100_v22  ;;  %v150_v37 = vunpack.c.l.bf16 %v108_v33  ;;  %3776 = vmatpush.bf16.msra.mxu2 %v6227_v9  ;;  %v7294_v55 = vld [vmem:[#allocation5 + $0x86c] sm:$0xf0] }
  0x6b   :  { %8653 = vst [vmem:[#allocation19_spill] sm:$0xff] %v8056_v30  ;;  %3653 = vmatmul.bf16.vlgmr.msra.gmra.mxu0 %v8056_v30  ;;  %v349_v8 = vrot.slane %v348_v34, 4  ;;  %v166_v48 = vunpack.c.l.bf16 %v116_v3  ;;  %v182_v40 = vunpack.c.l.bf16 %v124_v27  ;;  %v137_v19 = vunpack.c.h.bf16 %v8007_v39 }
  0x6c   :  { %3749 = vmatpush.bf16.msra.mxu0 %v5987_v17  ;;  %v1038_v28 = vsel %vm1036_vm0, %v1021_v46, %v1005_v0  ;;  %v238_v51 = vadd.f32 %v237_v5, %v236_v63  ;;  %v222_v52 = vadd.f32 %v150_v37, %v134_v6  ;;  %v153_v11 = vunpack.c.h.bf16 %v8039_v50  ;;  %v5938_v5 = vld [vmem:[#allocation5 + $0x880] sm:$0xf]  ;;  %v7298_v6 = vld [vmem:[#allocation5 + $0x88c] sm:$0xf0] }
  0x6d   :  { %v8090_v29 = vpack.c.b16 %v1038_v28, %v1038_v28  ;;  %v350_v14 = vadd.f32 %v349_v8, %v348_v34  ;;  %v334_v20 = vadd.f32 %v182_v40, %v166_v48  ;;  %v169_v45 = vunpack.c.h.bf16 %v8061_v42  ;;  %v6066_v8 = vld [vmem:[#allocation5 + $0x980] sm:$0xf]  ;;  %v7330_v48 = vld [vmem:[#allocation5 + $0x98c] sm:$0xf0] }
  0x6e   :  { %3789 = vmatpush.bf16.msra.mxu3 %v6355_v61  ;;  %v239_v12 = vrot.slane %v238_v51, 2  ;;  %v223_v13 = vrot.slane %v222_v52, 4  ;;  %v185_v47 = vunpack.c.h.bf16 %v8068_v49  ;;  %v243_v17 = vadd.f32 %v153_v11, %v137_v19  ;;  %3777 = vmatpush.bf16.msra.mxu2 %v6211_v4  ;;  %v7362_v11 = vld [vmem:[#allocation5 + $0xa8c] sm:$0xf0] }
  0x6f   :  { %3666 = vmatmul.bf16.vlgmr.msra.gmra.mxu1 %v8090_v29  ;;  %v351_v39 = vrot.slane %v350_v14, 2  ;;  %v335_v15 = vrot.slane %v334_v20, 4  ;;  %v135_v16 = vunpack.c.h.bf16 %v100_v22  ;;  %v151_v54 = vunpack.c.h.bf16 %v108_v33 }
  0x70   :  { %3750 = vmatpush.bf16.msra.mxu0 %v5971_v10  ;;  %3762 = vmatpush.bf16.msra.mxu1 %v6115_v18  ;;  %v240_v50 = vadd.f32 %v239_v12, %v238_v51  ;;  %v224_v42 = vadd.f32 %v223_v13, %v222_v52  ;;  %v244_v56 = vrot.slane %v243_v17, 4  ;;  %v355_v24 = vadd.f32 %v185_v47, %v169_v45  ;;  %v6194_v52 = vld [vmem:[#allocation5 + $0xa80] sm:$0xf] }
  0x71   :  { %v352_v57 = vadd.f32 %v351_v39, %v350_v14  ;;  %v336_v25 = vadd.f32 %v335_v15, %v334_v20  ;;  %v167_v49 = vunpack.c.h.bf16 %v116_v3  ;;  %v183_v26 = vunpack.c.h.bf16 %v124_v27  ;;  %v6322_v14 = vld [vmem:[#allocation5 + $0xb80] sm:$0xf]  ;;  %v7394_v20 = vld [vmem:[#allocation5 + $0xb8c] sm:$0xf0] }
  0x72   :  { %3790 = vmatpush.bf16.msra.mxu3 %v6339_v36  ;;  %v241_v10 = vrot.slane %v240_v50, 1  ;;  %v225_v31 = vrot.slane %v224_v42, 2  ;;  %v245_v32 = vadd.f32 %v244_v56, %v243_v17  ;;  %v356_v60 = vrot.slane %v355_v24, 4  ;;  %v5922_v17 = vld [vmem:[#allocation5 + $0x860] sm:$0xf] }
  0x73   :  { %v353_v21 = vrot.slane %v352_v57, 1  ;;  %v337_v41 = vrot.slane %v336_v25, 2  ;;  %v229_v9 = vadd.f32 %v151_v54, %v135_v16  ;;  %v341_v61 = vadd.f32 %v183_v26, %v167_v49  ;;  %v8105_v16 = vld [vmem:[#allocation5 + $0x960] sm:$0xf]  ;;  %v8107_v54 = vld [vmem:[#allocation5 + $0x96c] sm:$0xf0] }
  0x74   :  { %3751 = vmatpush.bf16.msra.mxu0 %v5955_v1  ;;  %3763 = vmatpush.bf16.msra.mxu1 %v6099_v59  ;;  %v242_v23 = vadd.f32 %v241_v10, %v240_v50  ;;  %v226_v35 = vadd.f32 %v225_v31, %v224_v42  ;;  %v246_v18 = vrot.slane %v245_v32, 2  ;;  %v357_v62 = vadd.f32 %v356_v60, %v355_v24  ;;  %v8109_v50 = vld [vmem:[#allocation5 + $0xa60] sm:$0xf]  ;;  %v8111_v42 = vld [vmem:[#allocation5 + $0xa6c] sm:$0xf0] }
  0x75   :  { %v354_v22 = vadd.f32 %v353_v21, %v352_v57  ;;  %v338_v33 = vadd.f32 %v337_v41, %v336_v25  ;;  %v230_v38 = vrot.slane %v229_v9, 4  ;;  %v342_v63 = vrot.slane %v341_v61, 4  ;;  %v8115_v49 = vld [vmem:[#allocation5 + $0xb60] sm:$0xf]  ;;  %v8117_v26 = vld [vmem:[#allocation5 + $0xb6c] sm:$0xf0] }
  0x76   :  { %v424_v1 = vpack.c.bf16 %v242_v23, %v242_v23  ;;  %v227_v3 = vrot.slane %v226_v35, 1  ;;  %v247_v27 = vadd.f32 %v246_v18, %v245_v32  ;;  %v358_v0 = vrot.slane %v357_v62, 2  ;;  %v8119_v10 = vld [vmem:[#allocation5 + $0x840] sm:$0xf]  ;;  %v8121_v31 = vld [vmem:[#allocation5 + $0x84c] sm:$0xf0] }
  0x77   :  { %v440_v34 = vpack.c.bf16 %v354_v22, %v354_v22  ;;  %v339_v4 = vrot.slane %v338_v33, 1  ;;  %v231_v36 = vadd.f32 %v230_v38, %v229_v9  ;;  %v343_v46 = vadd.f32 %v342_v63, %v341_v61  ;;  %v8123_v9 = vld [vmem:[#allocation5 + $0x940] sm:$0xf]  ;;  %v8125_v61 = vld [vmem:[#allocation5 + $0x94c] sm:$0xf0] }
  0x78   :  { %v1010_v44 = vunpack.c.l.b16 %v424_v1  ;;  %3764 = vmatpush.bf16.msra.mxu1 %v6083_v2  ;;  %v228_v7 = vadd.f32 %v227_v3, %v226_v35  ;;  %v248_v59 = vrot.slane %v247_v27, 1  ;;  %v359_v37 = vadd.f32 %v358_v0, %v357_v62  ;;  %v8127_v23 = vld [vmem:[#allocation5 + $0xa40] sm:$0xf]  ;;  %v8129_v35 = vld [vmem:[#allocation5 + $0xa4c] sm:$0xf0] }
  0x79   :  { %v1026_v40 = vunpack.c.l.b16 %v440_v34  ;;  %v340_v19 = vadd.f32 %v339_v4, %v338_v33  ;;  %v232_v28 = vrot.slane %v231_v36, 2  ;;  %v344_v51 = vrot.slane %v343_v46, 2  ;;  %v8131_v18 = vld [vmem:[#allocation5 + $0xb40] sm:$0xf]  ;;  %v8134_v63 = vld [vmem:[#allocation5 + $0xb4c] sm:$0xf0] }
  0x7a   :  { %v422_v45 = vpack.c.bf16 %v228_v7, %v228_v7  ;;  %v249_v12 = vadd.f32 %v248_v59, %v247_v27  ;;  %v360_v13 = vrot.slane %v359_v37, 1  ;;  %v5939_v47 = vor.u32 %v7298_v6, %v5938_v5  ;;  %v8136_v1 = vld [vmem:[#allocation5 + $0x820] sm:$0xf]  ;;  %v8138_v3 = vld [vmem:[#allocation5 + $0x82c] sm:$0xf0] }
  0x7b   :  { %v1043_v58 = vsel %vm1036_vm0, %v1026_v40, %v1010_v44  ;;  %v438_v2 = vpack.c.bf16 %v340_v19, %v340_v19  ;;  %v233_v39 = vadd.f32 %v232_v28, %v231_v36  ;;  %v345_v15 = vadd.f32 %v344_v51, %v343_v46  ;;  %v8141_v36 = vld [vmem:[#allocation5 + $0x920] sm:$0xf]  ;;  %v8143_v46 = vld [vmem:[#allocation5 + $0x92c] sm:$0xf0] }
  0x7c   :  { %v8113_v56 = vpack.c.b16 %v1043_v58, %v1043_v58  ;;  %v1008_v24 = vunpack.c.l.b16 %v422_v45  ;;  %v361_v57 = vadd.f32 %v360_v13, %v359_v37  ;;  %v425_v25 = vpack.c.bf16 %v249_v12, %v249_v12  ;;  %3752 = vmatpush.bf16.msra.mxu0 %v5939_v47  ;;  %v8145_v5 = vld [vmem:[#allocation5 + $0xa20] sm:$0xf]  ;;  %v8147_v6 = vld [vmem:[#allocation5 + $0xa2c] sm:$0xf0] }
  0x7d   :  { %v1024_v32 = vunpack.c.l.b16 %v438_v2  ;;  %v234_v60 = vrot.slane %v233_v39, 1  ;;  %v346_v21 = vrot.slane %v345_v15, 1  ;;  %v6067_v41 = vor.u32 %v7330_v48, %v6066_v8  ;;  %v8149_v44 = vld [vmem:[#allocation5 + $0xb20] sm:$0xf]  ;;  %v8151_v7 = vld [vmem:[#allocation5 + $0xb2c] sm:$0xf0] }
  0x7e   :  { %8655 = vst [vmem:[#allocation21_spill] sm:$0xff] %v8113_v56  ;;  %3731 = vmatmul.bf16.vlgmr.msrb.gmra.mxu2 %v8113_v56  ;;  %v441_v62 = vpack.c.bf16 %v361_v57, %v361_v57  ;;  %v1011_v22 = vunpack.c.l.b16 %v425_v25  ;;  %v6195_v33 = vor.u32 %v7362_v11, %v6194_v52  ;;  %v6323_v38 = vor.u32 %v7394_v20, %v6322_v14  ;;  %v8153_v59 = vld [vmem:[#allocation2 + $0x20] sm:$0xff]  ;;  %v8163_v28 = vld [vmem:[#allocation5 + $0x80c] sm:$0xf0] }
  0x7f   :  { %v1041_v27 = vsel %vm1036_vm0, %v1024_v32, %v1008_v24  ;;  %v235_v0 = vadd.f32 %v234_v60, %v233_v39  ;;  %v347_v34 = vadd.f32 %v346_v21, %v345_v15  ;;  %3765 = vmatpush.bf16.msra.mxu1 %v6067_v41  ;;  %v5923_v4 = vor.u32 %v7294_v55, %v5922_v17  ;;  %v8161_v19 = vld [vmem:[#allocation5 + $0x800] sm:$0xf]  ;;  %v8167_v52 = vld [vmem:[#allocation5 + $0x90c] sm:$0xf0] }
  0x80   :  { %v8155_v37 = vpack.c.b16 %v1041_v27, %v1041_v27  ;;  %v1027_v8 = vunpack.c.l.b16 %v441_v62  ;;  %3778 = vmatpush.bf16.msra.mxu2 %v6195_v33  ;;  %3791 = vmatpush.bf16.msra.mxu3 %v6323_v38  ;;  %v6051_v48 = vor.u32 %v8107_v54, %v8105_v16  ;;  %v6179_v40 = vor.u32 %v8111_v42, %v8109_v50  ;;  %v8165_v51 = vld [vmem:[#allocation5 + $0x900] sm:$0xf]  ;;  %v8177_v47 = vld [vmem:[#allocation5 + $0xa0c] sm:$0xf0]  ;;  %v103_v33 = vld [vmem:[#allocation2 + $0x28] sm:$0xff] }
  0x81   :  { %v8169_v11 = vld [vmem:[#allocation2 + $0x60] sm:$0xff]  ;;  %v423_v14 = vpack.c.bf16 %v235_v0, %v235_v0  ;;  %v439_v20 = vpack.c.bf16 %v347_v34, %v347_v34  ;;  %3753 = vmatpush.bf16.msra.mxu0 %v5923_v4  ;;  %v6307_v45 = vor.u32 %v8117_v26, %v8115_v49  ;;  %v5907_v12 = vor.u32 %v8121_v31, %v8119_v10  ;;  %v8189_v15 = vld [vmem:[#allocation5 + $0xb0c] sm:$0xf0]  ;;  %v111_v38 = vld [vmem:[#allocation2 + $0x68] sm:$0xff] }
  0x82   :  { %8656 = vst [vmem:[#allocation22_spill] sm:$0xff] %v8155_v37  ;;  %v8175_v13 = vld [vmem:[#allocation5 + $0xa00] sm:$0xf]  ;;  %3705 = vmatmul.bf16.vlgmr.msrb.gmra.mxu0 %v8155_v37  ;;  %v1044_v55 = vsel %vm1036_vm0, %v1027_v8, %v1011_v22  ;;  %v6035_v58 = vor.u32 %v8125_v61, %v8123_v9  ;;  %v6163_v2 = vor.u32 %v8129_v35, %v8127_v23  ;;  %v8193_v54 = vld [vmem:[#allocation5 + $0xcec] sm:$0xf0]  ;;  %v138_v61 = vunpack.c.l.bf16 %v8153_v59  ;;  %v119_v0 = vld [vmem:[#allocation2 + $0xa8] sm:$0xff] }
  0x83   :  { %v8179_v17 = vld [vmem:[#allocation5 + $0xb00] sm:$0xf]  ;;  %v6291_v39 = vor.u32 %v8134_v63, %v8131_v18  ;;  %v8197_v42 = vpack.c.b16 %v1044_v55, %v1044_v55  ;;  %v1009_v24 = vunpack.c.l.b16 %v423_v14  ;;  %v1025_v57 = vunpack.c.l.b16 %v439_v20  ;;  %3766 = vmatpush.bf16.msra.mxu1 %v6051_v48  ;;  %v8203_v26 = vld [vmem:[#allocation5 + $0xdec] sm:$0xf0]  ;;  %v127_v34 = vld [vmem:[#allocation2 + $0xe8] sm:$0xff] }
  0x84   :  { %v8191_v16 = vld [vmem:[#allocation5 + $0xce0] sm:$0xf]  ;;  %v5891_v25 = vor.u32 %v8138_v3, %v8136_v1  ;;  %3779 = vmatpush.bf16.msra.mxu2 %v6179_v40  ;;  %3792 = vmatpush.bf16.msra.mxu3 %v6307_v45  ;;  %v6019_v31 = vor.u32 %v8143_v46, %v8141_v36  ;;  %v6147_v32 = vor.u32 %v8147_v6, %v8145_v5  ;;  %v8213_v21 = vld [vmem:[#allocation5 + $0xeec] sm:$0xf0]  ;;  %v154_v22 = vunpack.c.l.bf16 %v8169_v11 }
  0x85   :  { %v8195_v50 = vld [vmem:[#allocation2 + $0xa0] sm:$0xff]  ;;  %8657 = vst [vmem:[#allocation23_spill] sm:$0xff] %v8197_v42  ;;  %v6275_v60 = vor.u32 %v8151_v7, %v8149_v44  ;;  %v8217_v9 = vld [vmem:[#allocation5 + $0xfec] sm:$0xf0]  ;;  %3744 = vmatmul.bf16.vlgmr.msrb.gmra.mxu3 %v8197_v42  ;;  %v1042_v23 = vsel %vm1036_vm0, %v1025_v57, %v1009_v24  ;;  %3754 = vmatpush.bf16.msra.mxu0 %v5907_v12  ;;  %v140_v7 = vunpack.c.l.bf16 %v103_v33  ;;  %v156_v8 = vunpack.c.l.bf16 %v111_v38 }
  0x86   :  { %v8201_v49 = vld [vmem:[#allocation5 + $0xde0] sm:$0xf]  ;;  %v5875_v35 = vor.u32 %v8163_v28, %v8161_v19  ;;  %v6003_v18 = vor.u32 %v8167_v52, %v8165_v51  ;;  %v8227_v63 = vpack.c.b16 %v1042_v23, %v1042_v23  ;;  %v6131_v1 = vor.u32 %v8177_v47, %v8175_v13 }
  0x87   :  { %v8205_v10 = vld [vmem:[#allocation5 + $0xee0] sm:$0xf]  ;;  %v6259_v3 = vor.u32 %v8189_v15, %v8179_v17  ;;  %v6499_v27 = vor.u32 %v8193_v54, %v8191_v16  ;;  %3767 = vmatpush.bf16.msra.mxu1 %v6035_v58  ;;  %v6627_v4 = vor.u32 %v8203_v26, %v8201_v49  ;;  %v170_v5 = vunpack.c.l.bf16 %v8195_v50 }
  0x88   :  { %v8215_v41 = vld [vmem:[#allocation5 + $0xfe0] sm:$0xf]  ;;  %8658 = vst [vmem:[#allocation24_spill] sm:$0xff] %v8227_v63  ;;  %v6755_v36 = vor.u32 %v8213_v21, %v8205_v10  ;;  %3718 = vmatmul.bf16.vlgmr.msrb.gmra.mxu1 %v8227_v63  ;;  %3780 = vmatpush.bf16.msra.mxu2 %v6163_v2  ;;  %v250_v44 = vadd.f32 %v154_v22, %v138_v61  ;;  %v172_v48 = vunpack.c.l.bf16 %v119_v0  ;;  %v188_v40 = vunpack.c.l.bf16 %v127_v34 }
  0x89   :  { %v126_v62 = vld [vmem:[#allocation2 + $0xe0] sm:$0xff]  ;;  %v6883_v46 = vor.u32 %v8217_v9, %v8215_v41  ;;  %3793 = vmatpush.bf16.msra.mxu3 %v6291_v39  ;;  %3755 = vmatpush.bf16.msra.mxu0 %v5891_v25  ;;  %v139_v19 = vunpack.c.h.bf16 %v8153_v59  ;;  %v155_v28 = vunpack.c.h.bf16 %v8169_v11  ;;  %v264_v14 = vadd.f32 %v156_v8, %v140_v7 }
  0x8a   :  { %v186_v6 = vunpack.c.l.bf16 %v126_v62  ;;  %v251_v51 = vrot.slane %v250_v44, 4  ;;  %v171_v20 = vunpack.c.h.bf16 %v8195_v50  ;;  %v376_v45 = vadd.f32 %v188_v40, %v172_v48  ;;  %v6482_v48 = vld [vmem:[#allocation5 + $0xcc0] sm:$0xf] }
  0x8b   :  { %3768 = vmatpush.bf16.msra.mxu1 %v6019_v31  ;;  %v187_v12 = vunpack.c.h.bf16 %v126_v62  ;;  %v257_v13 = vadd.f32 %v155_v28, %v139_v19  ;;  %v141_v47 = vunpack.c.h.bf16 %v103_v33  ;;  %v265_v58 = vrot.slane %v264_v14, 4 }
  0x8c   :  { %v362_v52 = vadd.f32 %v186_v6, %v170_v5  ;;  %3781 = vmatpush.bf16.msra.mxu2 %v6147_v32  ;;  %v252_v17 = vadd.f32 %v251_v51, %v250_v44  ;;  %v157_v2 = vunpack.c.h.bf16 %v111_v38  ;;  %v377_v59 = vrot.slane %v376_v45, 4 }
  0x8d   :  { %3794 = vmatpush.bf16.msra.mxu3 %v6275_v60  ;;  %3756 = vmatpush.bf16.msra.mxu0 %v5875_v35  ;;  %v258_v39 = vrot.slane %v257_v13, 4  ;;  %v369_v11 = vadd.f32 %v187_v12, %v171_v20  ;;  %v173_v15 = vunpack.c.h.bf16 %v119_v0  ;;  %v266_v50 = vadd.f32 %v265_v58, %v264_v14  ;;  %v6610_v14 = vld [vmem:[#allocation5 + $0xdc0] sm:$0xf] }
  0x8e   :  { %v363_v55 = vrot.slane %v362_v52, 4  ;;  %v253_v16 = vrot.slane %v252_v17, 2  ;;  %v189_v24 = vunpack.c.h.bf16 %v127_v34  ;;  %v378_v57 = vadd.f32 %v377_v59, %v376_v45 }
  0x8f   :  { %3769 = vmatpush.bf16.msra.mxu1 %v6003_v18  ;;  %v259_v25 = vadd.f32 %v258_v39, %v257_v13  ;;  %v370_v49 = vrot.slane %v369_v11, 4  ;;  %v271_v26 = vadd.f32 %v157_v2, %v141_v47  ;;  %v267_v32 = vrot.slane %v266_v50, 2  ;;  %v7466_v47 = vld [vmem:[#allocation5 + $0xdcc] sm:$0xf0] }
  0x90   :  { %v364_v54 = vadd.f32 %v363_v55, %v362_v52  ;;  %3782 = vmatpush.bf16.msra.mxu2 %v6131_v1  ;;  %v254_v10 = vadd.f32 %v253_v16, %v252_v17  ;;  %v383_v60 = vadd.f32 %v189_v24, %v173_v15  ;;  %v379_v21 = vrot.slane %v378_v57, 2  ;;  %v7434_v52 = vld [vmem:[#allocation5 + $0xccc] sm:$0xf0]  ;;  %v6738_v17 = vld [vmem:[#allocation5 + $0xec0] sm:$0xf] }
  0x91   :  { %3801 = vmatpush.bf16.msrb.mxu0 %v6499_v27  ;;  %3795 = vmatpush.bf16.msra.mxu3 %v6259_v3  ;;  %v260_v41 = vrot.slane %v259_v25, 2  ;;  %v371_v9 = vadd.f32 %v370_v49, %v369_v11  ;;  %v272_v61 = vrot.slane %v271_v26, 4  ;;  %v268_v18 = vadd.f32 %v267_v32, %v266_v50  ;;  %v7498_v55 = vld [vmem:[#allocation5 + $0xecc] sm:$0xf0]  ;;  %v8246_v11 = vld [vmem:[#allocation5 + $0xfc0] sm:$0xf] }
  0x92   :  { %v365_v31 = vrot.slane %v364_v54, 2  ;;  %v255_v23 = vrot.slane %v254_v10, 1  ;;  %v384_v62 = vrot.slane %v383_v60, 4  ;;  %v380_v22 = vadd.f32 %v379_v21, %v378_v57  ;;  %v8248_v15 = vld [vmem:[#allocation5 + $0xfcc] sm:$0xf0] }
  0x93   :  { %3814 = vmatpush.bf16.msrb.mxu1 %v6627_v4  ;;  %v261_v33 = vadd.f32 %v260_v41, %v259_v25  ;;  %v372_v38 = vrot.slane %v371_v9, 2  ;;  %v273_v1 = vadd.f32 %v272_v61, %v271_v26  ;;  %v269_v34 = vrot.slane %v268_v18, 1  ;;  %v8250_v57 = vld [vmem:[#allocation5 + $0xca0] sm:$0xf]  ;;  %v8252_v25 = vld [vmem:[#allocation5 + $0xcac] sm:$0xf0] }
  0x94   :  { %3827 = vmatpush.bf16.msrb.mxu2 %v6755_v36  ;;  %v366_v35 = vadd.f32 %v365_v31, %v364_v54  ;;  %v256_v27 = vadd.f32 %v255_v23, %v254_v10  ;;  %v385_v4 = vadd.f32 %v384_v62, %v383_v60  ;;  %v381_v5 = vrot.slane %v380_v22, 1  ;;  %v8254_v49 = vld [vmem:[#allocation5 + $0xda0] sm:$0xf]  ;;  %v8256_v26 = vld [vmem:[#allocation5 + $0xdac] sm:$0xf0] }
  0x95   :  { %3840 = vmatpush.bf16.msrb.mxu3 %v6883_v46  ;;  %v262_v3 = vrot.slane %v261_v33, 1  ;;  %v373_v36 = vadd.f32 %v372_v38, %v371_v9  ;;  %v274_v6 = vrot.slane %v273_v1, 2  ;;  %v270_v8 = vadd.f32 %v269_v34, %v268_v18  ;;  %v8258_v21 = vld [vmem:[#allocation5 + $0xea0] sm:$0xf]  ;;  %v8260_v41 = vld [vmem:[#allocation5 + $0xeac] sm:$0xf0] }
  0x96   :  { %v367_v0 = vrot.slane %v366_v35, 1  ;;  %v426_v7 = vpack.c.bf16 %v256_v27, %v256_v27  ;;  %v386_v46 = vrot.slane %v385_v4, 2  ;;  %v382_v40 = vadd.f32 %v381_v5, %v380_v22  ;;  %v8262_v9 = vld [vmem:[#allocation5 + $0xfa0] sm:$0xf]  ;;  %v8264_v61 = vld [vmem:[#allocation5 + $0xfac] sm:$0xf0] }
  0x97   :  { %v263_v19 = vadd.f32 %v262_v3, %v261_v33  ;;  %v374_v28 = vrot.slane %v373_v36, 1  ;;  %v275_v51 = vadd.f32 %v274_v6, %v273_v1  ;;  %v428_v12 = vpack.c.bf16 %v270_v8, %v270_v8  ;;  %v8266_v23 = vld [vmem:[#allocation2 + $0x30] sm:$0xff]  ;;  %v8269_v33 = vld [vmem:[#allocation5 + $0xc80] sm:$0xf] }
  0x98   :  { %v368_v44 = vadd.f32 %v367_v0, %v366_v35  ;;  %v1012_v45 = vunpack.c.l.b16 %v426_v7  ;;  %v387_v13 = vadd.f32 %v386_v46, %v385_v4  ;;  %v444_v58 = vpack.c.bf16 %v382_v40, %v382_v40  ;;  %v8271_v38 = vld [vmem:[#allocation5 + $0xc8c] sm:$0xf0]  ;;  %v8273_v1 = vld [vmem:[#allocation5 + $0xd80] sm:$0xf] }
  0x99   :  { %v375_v2 = vadd.f32 %v374_v28, %v373_v36  ;;  %v427_v59 = vpack.c.bf16 %v263_v19, %v263_v19  ;;  %v276_v39 = vrot.slane %v275_v51, 1  ;;  %v1014_v54 = vunpack.c.l.b16 %v428_v12  ;;  %v8275_v27 = vld [vmem:[#allocation5 + $0xd8c] sm:$0xf0]  ;;  %v8277_v0 = vld [vmem:[#allocation5 + $0xe80] sm:$0xf] }
  0x9a   :  { %v442_v20 = vpack.c.bf16 %v368_v44, %v368_v44  ;;  %v388_v50 = vrot.slane %v387_v13, 1  ;;  %v6483_v24 = vor.u32 %v7434_v52, %v6482_v48  ;;  %v1030_v10 = vunpack.c.l.b16 %v444_v58  ;;  %v8279_v34 = vld [vmem:[#allocation5 + $0xe8c] sm:$0xf0]  ;;  %v8281_v4 = vld [vmem:[#allocation5 + $0xf80] sm:$0xf] }
  0x9b   :  { %v443_v31 = vpack.c.bf16 %v375_v2, %v375_v2  ;;  %v1013_v32 = vunpack.c.l.b16 %v427_v59  ;;  %v277_v60 = vadd.f32 %v276_v39, %v275_v51  ;;  %v6611_v62 = vor.u32 %v7466_v47, %v6610_v14  ;;  %v8283_v5 = vld [vmem:[#allocation5 + $0xf8c] sm:$0xf0]  ;;  %v8288_v7 = vld [vmem:[#allocation5 + $0xc60] sm:$0xf] }
  0x9c   :  { %v1028_v16 = vunpack.c.l.b16 %v442_v20  ;;  %v389_v18 = vadd.f32 %v388_v50, %v387_v13  ;;  %3802 = vmatpush.bf16.msrb.mxu0 %v6483_v24  ;;  %v6739_v22 = vor.u32 %v7498_v55, %v6738_v17  ;;  %v1047_v36 = vsel %vm1036_vm0, %v1030_v10, %v1014_v54  ;;  %v8290_v8 = vld [vmem:[#allocation5 + $0xc6c] sm:$0xf0]  ;;  %v8292_v46 = vld [vmem:[#allocation5 + $0xd60] sm:$0xf] }
  0x9d   :  { %v1029_v6 = vunpack.c.l.b16 %v443_v31  ;;  %v429_v44 = vpack.c.bf16 %v277_v60, %v277_v60  ;;  %v8294_v48 = vld [vmem:[#allocation5 + $0xd6c] sm:$0xf0]  ;;  %v8296_v40 = vpack.c.b16 %v1047_v36, %v1047_v36  ;;  %3815 = vmatpush.bf16.msrb.mxu1 %v6611_v62  ;;  %v6867_v28 = vor.u32 %v8248_v15, %v8246_v11  ;;  %v8300_v51 = vld [vmem:[#allocation5 + $0xe60] sm:$0xf] }
  0x9e   :  { %v1045_v35 = vsel %vm1036_vm0, %v1028_v16, %v1012_v45  ;;  %v445_v19 = vpack.c.bf16 %v389_v18, %v389_v18  ;;  %3828 = vmatpush.bf16.msrb.mxu2 %v6739_v22  ;;  %v8302_v52 = vld [vmem:[#allocation5 + $0xe6c] sm:$0xf0]  ;;  %v8304_v14 = vld [vmem:[#allocation5 + $0xf60] sm:$0xf]  ;;  %v142_v47 = vunpack.c.l.bf16 %v8266_v23  ;;  %v6467_v58 = vor.u32 %v8252_v25, %v8250_v57 }
  0x9f   :  { %v8285_v3 = vpack.c.b16 %v1045_v35, %v1045_v35  ;;  %8660 = vst [vmem:[#allocation26_spill] sm:$0xff] %v8296_v40  ;;  %v8306_v20 = vld [vmem:[#allocation5 + $0xf6c] sm:$0xf0]  ;;  %v8308_v45 = vld [vmem:[#allocation5 + $0xc40] sm:$0xf]  ;;  %v1046_v17 = vsel %vm1036_vm0, %v1029_v6, %v1013_v32  ;;  %v1015_v55 = vunpack.c.l.b16 %v429_v44  ;;  %v6595_v2 = vor.u32 %v8256_v26, %v8254_v49  ;;  %3783 = vmatmul.bf16.vlgmr.msra.gmra.mxu2 %v8296_v40 }
  0xa0   :  { %v8310_v12 = vld [vmem:[#allocation5 + $0xc4c] sm:$0xf0]  ;;  %v8321_v59 = vld [vmem:[#allocation5 + $0xd40] sm:$0xf]  ;;  %v8338_v57 = vpack.c.b16 %v1046_v17, %v1046_v17  ;;  %v1031_v25 = vunpack.c.l.b16 %v445_v19  ;;  %3841 = vmatpush.bf16.msrb.mxu3 %v6867_v28  ;;  %v6723_v49 = vor.u32 %v8260_v41, %v8258_v21  ;;  %v6851_v26 = vor.u32 %v8264_v61, %v8262_v9  ;;  %3803 = vmatpush.bf16.msrb.mxu0 %v6467_v58  ;;  %v8405_v58 = vld [vmem:[#allocation5 + $0x2e4] sm:$0xf] }
  0xa1   :  { %8659 = vst [vmem:[#allocation25_spill] sm:$0xff] %v8285_v3  ;;  %v8312_v13 = vld [vmem:[#allocation2 + $0x70] sm:$0xff]  ;;  %3757 = vmatmul.bf16.vlgmr.msra.gmra.mxu0 %v8285_v3  ;;  %v8325_v11 = vld [vmem:[#allocation5 + $0xe40] sm:$0xf]  ;;  %v6451_v21 = vor.u32 %v8271_v38, %v8269_v33  ;;  %v6579_v41 = vor.u32 %v8275_v27, %v8273_v1  ;;  %v6707_v9 = vor.u32 %v8279_v34, %v8277_v0 }
  0xa2   :  { %v8323_v39 = vld [vmem:[#allocation5 + $0xd4c] sm:$0xf0]  ;;  %v8329_v16 = vld [vmem:[#allocation5 + $0xf40] sm:$0xf]  ;;  %8661 = vst [vmem:[#allocation27_spill] sm:$0xff] %v8338_v57  ;;  %v6835_v61 = vor.u32 %v8283_v5, %v8281_v4  ;;  %3770 = vmatmul.bf16.vlgmr.msra.gmra.mxu1 %v8338_v57  ;;  %v1048_v1 = vsel %vm1036_vm0, %v1031_v25, %v1015_v55  ;;  %3829 = vmatpush.bf16.msrb.mxu2 %v6723_v49  ;;  %v158_v28 = vunpack.c.l.bf16 %v8312_v13  ;;  %v105_v49 = vld [vmem:[#allocation2 + $0x38] sm:$0xff] }
  0xa3   :  { %v8327_v15 = vld [vmem:[#allocation5 + $0xe4c] sm:$0xf0]  ;;  %v8333_v50 = vld [vmem:[#allocation5 + $0xc20] sm:$0xf]  ;;  %v6435_v27 = vor.u32 %v8290_v8, %v8288_v7  ;;  %v6563_v0 = vor.u32 %v8294_v48, %v8292_v46  ;;  %v8388_v4 = vld [vmem:[#allocation5 + $0xe4] sm:$0xf]  ;;  %v8393_v17 = vpack.c.b16 %v1048_v1, %v1048_v1  ;;  %3816 = vmatpush.bf16.msrb.mxu1 %v6595_v2  ;;  %v6691_v55 = vor.u32 %v8302_v52, %v8300_v51 }
  0xa4   :  { %v8331_v54 = vld [vmem:[#allocation5 + $0xf4c] sm:$0xf0]  ;;  %v8344_v10 = vld [vmem:[#allocation5 + $0xd20] sm:$0xf]  ;;  %v8390_v5 = vld [vmem:[#allocation5 + $0xf0] sm:$0xf0]  ;;  %v6819_v7 = vor.u32 %v8306_v20, %v8304_v14  ;;  %v6419_v8 = vor.u32 %v8310_v12, %v8308_v45  ;;  %3842 = vmatpush.bf16.msrb.mxu3 %v6851_v26  ;;  %v6547_v25 = vor.u32 %v8323_v39, %v8321_v59  ;;  %v6675_v2 = vor.u32 %v8327_v15, %v8325_v11 }
  0xa5   :  { %v8335_v24 = vld [vmem:[#allocation5 + $0xc2c] sm:$0xf0]  ;;  %v8348_v32 = vld [vmem:[#allocation5 + $0xe20] sm:$0xf]  ;;  %8662 = vst [vmem:[#allocation28_spill] sm:$0xff] %v8393_v17  ;;  %3796 = vmatmul.bf16.vlgmr.msra.gmra.mxu3 %v8393_v17  ;;  %3804 = vmatpush.bf16.msrb.mxu0 %v6451_v21  ;;  %v113_v26 = vld [vmem:[#allocation2 + $0x78] sm:$0xff]  ;;  %v278_v59 = vadd.f32 %v158_v28, %v142_v47  ;;  %v144_v17 = vunpack.c.l.bf16 %v105_v49  ;;  %v143_v51 = vunpack.c.h.bf16 %v8266_v23  ;;  %v145_v47 = vunpack.c.h.bf16 %v105_v49 }
  0xa6   :  { %v8346_v31 = vld [vmem:[#allocation5 + $0xd2c] sm:$0xf0]  ;;  %v8352_v35 = vld [vmem:[#allocation5 + $0xf20] sm:$0xf]  ;;  %v8401_v46 = vld [vmem:[#allocation5 + $0x1e4] sm:$0xf]  ;;  %3830 = vmatpush.bf16.msrb.mxu2 %v6707_v9  ;;  %v160_v57 = vunpack.c.l.bf16 %v113_v26  ;;  %v159_v9 = vunpack.c.h.bf16 %v8312_v13  ;;  %v161_v43 = vunpack.c.h.bf16 %v113_v26 }
  0xa7   :  { %v8350_v60 = vld [vmem:[#allocation5 + $0xe2c] sm:$0xf0]  ;;  %v8366_v22 = vld [vmem:[#allocation5 + $0xc00] sm:$0xf]  ;;  %v8403_v48 = vld [vmem:[#allocation5 + $0x1f0] sm:$0xf0]  ;;  %3817 = vmatpush.bf16.msrb.mxu1 %v6579_v41 }
  0xa8   :  { %v8354_v18 = vld [vmem:[#allocation5 + $0xf2c] sm:$0xf0]  ;;  %v8370_v6 = vld [vmem:[#allocation5 + $0xd00] sm:$0xf]  ;;  %v8415_v14 = vld [vmem:[#allocation5 + $0x2f0] sm:$0xf0]  ;;  %3843 = vmatpush.bf16.msrb.mxu3 %v6835_v61  ;;  %v292_v42 = vadd.f32 %v160_v57, %v144_v17  ;;  %v285_v63 = vadd.f32 %v159_v9, %v143_v51 }
  0xa9   :  { %v8356_v62 = vld [vmem:[#allocation2 + $0xb0] sm:$0xff]  ;;  %v8374_v19 = vld [vmem:[#allocation5 + $0xe00] sm:$0xf]  ;;  %v8417_v20 = vld [vmem:[#allocation5 + $0x3e4] sm:$0xf]  ;;  %3805 = vmatpush.bf16.msrb.mxu0 %v6435_v27  ;;  %v279_v3 = vrot.slane %v278_v59, 4  ;;  %v8667_v26 = vor.u32 %v8354_v18, %v8352_v35  ;;  %v8670_v35 = vor.u32 %v8388_v4, %v8390_v5  ;;  %v8674_v5 = vor.u32 %v8401_v46, %v8403_v48 }
  0xaa   :  { %v8368_v36 = vld [vmem:[#allocation5 + $0xc0c] sm:$0xf0]  ;;  %v8378_v38 = vld [vmem:[#allocation5 + $0xf00] sm:$0xf]  ;;  %v8419_v45 = vld [vmem:[#allocation5 + $0x3f0] sm:$0xf0]  ;;  %v174_v15 = vunpack.c.l.bf16 %v8356_v62  ;;  %3831 = vmatpush.bf16.msrb.mxu2 %v6691_v55  ;;  %v175_v21 = vunpack.c.h.bf16 %v8356_v62 }
  0xab   :  { %v8372_v44 = vld [vmem:[#allocation5 + $0xd0c] sm:$0xf0]  ;;  %v121_v52 = vld [vmem:[#allocation2 + $0xb8] sm:$0xff]  ;;  %3818 = vmatpush.bf16.msrb.mxu1 %v6563_v0  ;;  %v280_v28 = vadd.f32 %v279_v3, %v278_v59  ;;  %v293_v56 = vrot.slane %v292_v42, 4  ;;  %v286_v30 = vrot.slane %v285_v63, 4  ;;  %v8663_v3 = vor.u32 %v8331_v54, %v8329_v16 }
  0xac   :  { %v8376_v33 = vld [vmem:[#allocation5 + $0xe0c] sm:$0xf0]  ;;  %v129_v39 = vld [vmem:[#allocation2 + $0xf8] sm:$0xff]  ;;  %v176_v41 = vunpack.c.l.bf16 %v121_v52  ;;  %3844 = vmatpush.bf16.msrb.mxu3 %v6819_v7  ;;  %v177_v55 = vunpack.c.h.bf16 %v121_v52  ;;  %v8666_v52 = vor.u32 %v8346_v31, %v8344_v10  ;;  %v8668_v9 = vor.u32 %v8368_v36, %v8366_v22 }
  0xad   :  { %v8386_v34 = vld [vmem:[#allocation5 + $0xf0c] sm:$0xf0]  ;;  %v192_v40 = vunpack.c.l.bf16 %v129_v39  ;;  %3806 = vmatpush.bf16.msrb.mxu0 %v6419_v8  ;;  %v294_v17 = vadd.f32 %v293_v56, %v292_v42  ;;  %v193_v62 = vunpack.c.h.bf16 %v129_v39  ;;  %v287_v0 = vadd.f32 %v286_v30, %v285_v63 }
  0xae   :  { %v128_v11 = vld [vmem:[#allocation2 + $0xf0] sm:$0xff]  ;;  %3832 = vmatpush.bf16.msrb.mxu2 %v6675_v2  ;;  %v8665_v30 = vor.u32 %v8350_v60, %v8348_v32  ;;  %v8671_v22 = vor.u32 %v8372_v44, %v8370_v6  ;;  %v8672_v36 = vor.u32 %v8405_v58, %v8415_v14  ;;  %v8673_v4 = vor.u32 %v8386_v34, %v8378_v38  ;;  %v7080_v58 = vld [vmem:[#allocation5 + $0x1c4] sm:$0xf] }
  0xaf   :  { %v190_v12 = vunpack.c.l.bf16 %v128_v11  ;;  %v404_v61 = vadd.f32 %v192_v40, %v176_v41  ;;  %v191_v37 = vunpack.c.h.bf16 %v128_v11  ;;  %3819 = vmatpush.bf16.msrb.mxu1 %v6547_v25  ;;  %v299_v11 = vadd.f32 %v161_v43, %v145_v47  ;;  %v5076_v14 = vld [vmem:[#allocation5 + $0x1d0] sm:$0xf0]  ;;  %v7112_v38 = vld [vmem:[#allocation5 + $0x2c4] sm:$0xf] }
  0xb0   :  { %3845 = vmatpush.bf16.msrb.mxu3 %v8663_v3  ;;  %v295_v59 = vrot.slane %v294_v17, 2  ;;  %v288_v56 = vrot.slane %v287_v0, 2  ;;  %v8669_v47 = vor.u32 %v8376_v33, %v8374_v19  ;;  %v5204_v34 = vld [vmem:[#allocation5 + $0x2d0] sm:$0xf0] }
  0xb1   :  { %v390_v1 = vadd.f32 %v190_v12, %v174_v15  ;;  %v405_v23 = vrot.slane %v404_v61, 4  ;;  %v397_v13 = vadd.f32 %v191_v37, %v175_v21  ;;  %v281_v12 = vrot.slane %v280_v28, 2 }
  0xb2   :  { %v411_v15 = vadd.f32 %v193_v62, %v177_v55  ;;  %v8664_v37 = vor.u32 %v8335_v24, %v8333_v50  ;;  %v300_v25 = vrot.slane %v299_v11, 4  ;;  %3833 = vmatpush.bf16.msrb.mxu2 %v8665_v30  ;;  %v296_v16 = vadd.f32 %v295_v59, %v294_v17  ;;  %v7144_v59 = vld [vmem:[#allocation5 + $0x3c4] sm:$0xf]  ;;  %v4932_v30 = vld [vmem:[#allocation5 + $0xb0] sm:$0xf0] }
  0xb3   :  { %v391_v27 = vrot.slane %v390_v1, 4  ;;  %v406_v40 = vadd.f32 %v405_v23, %v404_v61  ;;  %v398_v51 = vrot.slane %v397_v13, 4  ;;  %v282_v7 = vadd.f32 %v281_v12, %v280_v28  ;;  %3820 = vmatpush.bf16.msrb.mxu1 %v8666_v52  ;;  %v7048_v12 = vld [vmem:[#allocation5 + $0xc4] sm:$0xf] }
  0xb4   :  { %3807 = vmatpush.bf16.msrb.mxu0 %v8664_v37  ;;  %v412_v54 = vrot.slane %v411_v15, 4  ;;  %v289_v49 = vadd.f32 %v288_v56, %v287_v0  ;;  %v301_v24 = vadd.f32 %v300_v25, %v299_v11  ;;  %3846 = vmatpush.bf16.msrb.mxu3 %v8667_v26  ;;  %v297_v32 = vrot.slane %v296_v16, 1  ;;  %v7044_v25 = vld [vmem:[#allocation5 + $0xa4] sm:$0xf]  ;;  %v5188_v26 = vld [vmem:[#allocation5 + $0x2b0] sm:$0xf0] }
  0xb5   :  { %v392_v57 = vadd.f32 %v391_v27, %v390_v1  ;;  %v407_v2 = vrot.slane %v406_v40, 2  ;;  %v399_v42 = vadd.f32 %v398_v51, %v397_v13  ;;  %v283_v43 = vrot.slane %v282_v7, 1  ;;  %v7108_v52 = vld [vmem:[#allocation5 + $0x2a4] sm:$0xf] }
  0xb6   :  { %v413_v60 = vadd.f32 %v412_v54, %v411_v15  ;;  %v290_v61 = vrot.slane %v289_v49, 1  ;;  %v302_v31 = vrot.slane %v301_v24, 2  ;;  %3834 = vmatpush.bf16.msrb.mxu2 %v8669_v47  ;;  %v298_v27 = vadd.f32 %v297_v32, %v296_v16  ;;  %v7076_v16 = vld [vmem:[#allocation5 + $0x1a4] sm:$0xf]  ;;  %v5060_v54 = vld [vmem:[#allocation5 + $0x1b0] sm:$0xf0] }
  0xb7   :  { %v393_v8 = vrot.slane %v392_v57, 2  ;;  %v408_v39 = vadd.f32 %v407_v2, %v406_v40  ;;  %v400_v50 = vrot.slane %v399_v42, 2  ;;  %v284_v1 = vadd.f32 %v283_v43, %v282_v7  ;;  %3821 = vmatpush.bf16.msrb.mxu1 %v8671_v22 }
  0xb8   :  { %3808 = vmatpush.bf16.msrb.mxu0 %v8668_v9  ;;  %v414_v23 = vrot.slane %v413_v60, 2  ;;  %v291_v55 = vadd.f32 %v290_v61, %v289_v49  ;;  %v303_v33 = vadd.f32 %v302_v31, %v301_v24  ;;  %3847 = vmatpush.bf16.msrb.mxu3 %v8673_v4  ;;  %v432_v17 = vpack.c.bf16 %v298_v27, %v298_v27  ;;  %v4916_v61 = vld [vmem:[#allocation5 + $0x90] sm:$0xf0] }
  0xb9   :  { %v394_v63 = vadd.f32 %v393_v8, %v392_v57  ;;  %v409_v41 = vrot.slane %v408_v39, 1  ;;  %v401_v10 = vadd.f32 %v400_v50, %v399_v42  ;;  %v430_v28 = vpack.c.bf16 %v284_v1, %v284_v1  ;;  %v4948_v57 = vld [vmem:[#allocation5 + $0xd0] sm:$0xf0]  ;;  %v7140_v1 = vld [vmem:[#allocation5 + $0x3a4] sm:$0xf] }
  0xba   :  { %3879 = vmatpush.bf16.msra.mxu2 %v8672_v36  ;;  %v415_v62 = vadd.f32 %v414_v23, %v413_v60  ;;  %v8675_v40 = vor.u32 %v8417_v20, %v8419_v45  ;;  %v431_v11 = vpack.c.bf16 %v291_v55, %v291_v55  ;;  %v304_v3 = vrot.slane %v303_v33, 1  ;;  %v5332_v42 = vld [vmem:[#allocation5 + $0x3d0] sm:$0xf0] }
  0xbb   :  { %v395_v21 = vrot.slane %v394_v63, 1  ;;  %v410_v13 = vadd.f32 %v409_v41, %v408_v39  ;;  %v402_v19 = vrot.slane %v401_v10, 1  ;;  %3866 = vmatpush.bf16.msra.mxu1 %v8674_v5  ;;  %v1016_v44 = vunpack.c.l.b16 %v430_v28  ;;  %v7040_v41 = vld [vmem:[#allocation5 + $0x84] sm:$0xf]  ;;  %v5172_v28 = vld [vmem:[#allocation5 + $0x290] sm:$0xf0] }
  0xbc   :  { %3853 = vmatpush.bf16.msra.mxu0 %v8670_v35  ;;  %3892 = vmatpush.bf16.msra.mxu3 %v8675_v40  ;;  %v1018_v8 = vunpack.c.l.b16 %v432_v17  ;;  %v416_v46 = vrot.slane %v415_v62, 1  ;;  %v4951_v48 = vor.u32 %v7048_v12, %v4948_v57  ;;  %v1017_v2 = vunpack.c.l.b16 %v431_v11  ;;  %v5044_v55 = vld [vmem:[#allocation5 + $0x190] sm:$0xf0]  ;;  %v7036_v5 = vld [vmem:[#allocation5 + $0x64] sm:$0xf] }
  0xbd   :  { %v396_v18 = vadd.f32 %v395_v21, %v394_v63  ;;  %v448_v0 = vpack.c.bf16 %v410_v13, %v410_v13  ;;  %v403_v51 = vadd.f32 %v402_v19, %v401_v10  ;;  %v305_v56 = vadd.f32 %v304_v3, %v303_v33  ;;  %v5316_v21 = vld [vmem:[#allocation5 + $0x3b0] sm:$0xf0]  ;;  %v7072_v13 = vld [vmem:[#allocation5 + $0x184] sm:$0xf] }
  0xbe   :  { %v417_v45 = vadd.f32 %v416_v46, %v415_v62  ;;  %v5079_v43 = vor.u32 %v7080_v58, %v5076_v14  ;;  %v5207_v63 = vor.u32 %v7112_v38, %v5204_v34  ;;  %v5335_v9 = vor.u32 %v7144_v59, %v5332_v42  ;;  %v7136_v33 = vld [vmem:[#allocation5 + $0x384] sm:$0xf]  ;;  %v5300_v12 = vld [vmem:[#allocation5 + $0x390] sm:$0xf0] }
  0xbf   :  { %v446_v6 = vpack.c.bf16 %v396_v18, %v396_v18  ;;  %v1034_v15 = vunpack.c.l.b16 %v448_v0  ;;  %v447_v37 = vpack.c.bf16 %v403_v51, %v403_v51  ;;  %v433_v24 = vpack.c.bf16 %v305_v56, %v305_v56  ;;  %v7104_v18 = vld [vmem:[#allocation5 + $0x284] sm:$0xf]  ;;  %v5156_v58 = vld [vmem:[#allocation5 + $0x270] sm:$0xf0] }
  0xc0   :  { %3854 = vmatpush.bf16.msra.mxu0 %v4951_v48  ;;  %v449_v60 = vpack.c.bf16 %v417_v45, %v417_v45  ;;  %3867 = vmatpush.bf16.msra.mxu1 %v5079_v43  ;;  %v4935_v47 = vor.u32 %v7044_v25, %v4932_v30  ;;  %v5063_v35 = vor.u32 %v7076_v16, %v5060_v54  ;;  %v7100_v62 = vld [vmem:[#allocation5 + $0x264] sm:$0xf]  ;;  %v5028_v0 = vld [vmem:[#allocation5 + $0x170] sm:$0xf0] }
  0xc1   :  { %v1032_v7 = vunpack.c.l.b16 %v446_v6  ;;  %v1051_v49 = vsel %vm1036_vm0, %v1034_v15, %v1018_v8  ;;  %v1033_v50 = vunpack.c.l.b16 %v447_v37  ;;  %3880 = vmatpush.bf16.msra.mxu2 %v5207_v63  ;;  %v1019_v31 = vunpack.c.l.b16 %v433_v24  ;;  %3893 = vmatpush.bf16.msra.mxu3 %v5335_v9  ;;  %v4900_v6 = vld [vmem:[#allocation5 + $0x70] sm:$0xf0]  ;;  %v7068_v40 = vld [vmem:[#allocation5 + $0x164] sm:$0xf] }
  0xc2   :  { %v8493_v32 = vpack.c.b16 %v1051_v49, %v1051_v49  ;;  %v1035_v23 = vunpack.c.l.b16 %v449_v60  ;;  %v5191_v22 = vor.u32 %v7108_v52, %v5188_v26  ;;  %v5319_v36 = vor.u32 %v7140_v1, %v5316_v21  ;;  %v7132_v11 = vld [vmem:[#allocation5 + $0x364] sm:$0xf]  ;;  %v5284_v3 = vld [vmem:[#allocation5 + $0x370] sm:$0xf0] }
  0xc3   :  { %v1049_v20 = vsel %vm1036_vm0, %v1032_v7, %v1016_v44  ;;  %v1050_v10 = vsel %vm1036_vm0, %v1033_v50, %v1017_v2  ;;  %v4919_v19 = vor.u32 %v7040_v41, %v4916_v61  ;;  %v5175_v4 = vor.u32 %v7104_v18, %v5172_v28  ;;  %v7032_v34 = vld [vmem:[#allocation5 + $0x44] sm:$0xf]  ;;  %v4884_v7 = vld [vmem:[#allocation5 + $0x50] sm:$0xf0] }
  0xc4   :  { %v8490_v39 = vpack.c.b16 %v1049_v20, %v1049_v20  ;;  %3835 = vmatmul.bf16.vlgmr.msrb.gmra.mxu2 %v8493_v32  ;;  %v8498_v27 = vpack.c.b16 %v1050_v10, %v1050_v10  ;;  %3855 = vmatpush.bf16.msra.mxu0 %v4935_v47  ;;  %v1052_v57 = vsel %vm1036_vm0, %v1035_v23, %v1019_v31  ;;  %v7096_v46 = vld [vmem:[#allocation5 + $0x244] sm:$0xf]  ;;  %v5140_v48 = vld [vmem:[#allocation5 + $0x250] sm:$0xf0] }
  0xc5   :  { %3881 = vmatpush.bf16.msra.mxu2 %v5191_v22  ;;  %v8502_v44 = vpack.c.b16 %v1052_v57, %v1052_v57  ;;  %3868 = vmatpush.bf16.msra.mxu1 %v5063_v35  ;;  %v5047_v17 = vor.u32 %v7072_v13, %v5044_v55  ;;  %v5303_v14 = vor.u32 %v7136_v33, %v5300_v12  ;;  %v7064_v15 = vld [vmem:[#allocation5 + $0x144] sm:$0xf]  ;;  %v5012_v37 = vld [vmem:[#allocation5 + $0x150] sm:$0xf0] }
  0xc6   :  { %3809 = vmatmul.bf16.vlgmr.msrb.gmra.mxu0 %v8490_v39  ;;  %3822 = vmatmul.bf16.vlgmr.msrb.gmra.mxu1 %v8498_v27  ;;  %v4903_v51 = vor.u32 %v7036_v5, %v4900_v6  ;;  %v5159_v38 = vor.u32 %v7100_v62, %v5156_v58  ;;  %v5031_v8 = vor.u32 %v7068_v40, %v5028_v0  ;;  %v7128_v56 = vld [vmem:[#allocation5 + $0x344] sm:$0xf]  ;;  %v5268_v42 = vld [vmem:[#allocation5 + $0x350] sm:$0xf0] }
  0xc7   :  { %3894 = vmatpush.bf16.msra.mxu3 %v5319_v36  ;;  %v5287_v59 = vor.u32 %v7132_v11, %v5284_v3  ;;  %v4887_v2 = vor.u32 %v7032_v34, %v4884_v7  ;;  %v5143_v25 = vor.u32 %v7096_v46, %v5140_v48  ;;  %v7028_v30 = vld [vmem:[#allocation5 + $0x24] sm:$0xf]  ;;  %v4868_v20 = vld [vmem:[#allocation5 + $0x30] sm:$0xf0]  ;;  %v5015_v45 = vor.u32 %v7064_v15, %v5012_v37 }
  0xc8   :  { %3848 = vmatmul.bf16.vlgmr.msrb.gmra.mxu3 %v8502_v44  ;;  %3856 = vmatpush.bf16.msra.mxu0 %v4919_v19  ;;  %v7092_v43 = vld [vmem:[#allocation5 + $0x224] sm:$0xf]  ;;  %v5124_v63 = vld [vmem:[#allocation5 + $0x230] sm:$0xf0]  ;;  %v5271_v16 = vor.u32 %v7128_v56, %v5268_v42  ;;  %v4871_v50 = vor.u32 %v7028_v30, %v4868_v20 }
  0xc9   :  { %3882 = vmatpush.bf16.msra.mxu2 %v5175_v4  ;;  %3869 = vmatpush.bf16.msra.mxu1 %v5047_v17  ;;  %v7060_v54 = vld [vmem:[#allocation5 + $0x124] sm:$0xf]  ;;  %v4996_v52 = vld [vmem:[#allocation5 + $0x130] sm:$0xf0]  ;;  %v5127_v21 = vor.u32 %v7092_v43, %v5124_v63 }
  0xca   :  { %v7124_v49 = vld [vmem:[#allocation5 + $0x324] sm:$0xf]  ;;  %v5252_v24 = vld [vmem:[#allocation5 + $0x330] sm:$0xf0]  ;;  %v4999_v61 = vor.u32 %v7060_v54, %v4996_v52 }
  0xcb   :  { %3895 = vmatpush.bf16.msra.mxu3 %v5303_v14  ;;  %v7024_v26 = vld [vmem:[#allocation5 + $0x4] sm:$0xf]  ;;  %v4852_v1 = vld [vmem:[#allocation5 + $0x10] sm:$0xf0]  ;;  %v5255_v35 = vor.u32 %v7124_v49, %v5252_v24  ;;  %v8677_v49 = vld [vmem:[#allocation20_spill] sm:$0xff] }
  0xcc   :  { %3857 = vmatpush.bf16.msra.mxu0 %v4903_v51  ;;  %v7056_v60 = vld [vmem:[#allocation5 + $0x104] sm:$0xf]  ;;  %v4980_v9 = vld [vmem:[#allocation5 + $0x110] sm:$0xf0]  ;;  %v4855_v22 = vor.u32 %v7024_v26, %v4852_v1 }
  0xcd   :  { %3883 = vmatpush.bf16.msra.mxu2 %v5159_v38  ;;  %3870 = vmatpush.bf16.msra.mxu1 %v5031_v8  ;;  %v7088_v41 = vld [vmem:[#allocation5 + $0x204] sm:$0xf]  ;;  %v5108_v10 = vld [vmem:[#allocation5 + $0x210] sm:$0xf0]  ;;  %v4983_v4 = vor.u32 %v7056_v60, %v4980_v9 }
  0xce   :  { %v7180_v31 = vld [vmem:[#allocation5 + $0x4e4] sm:$0xf]  ;;  %v5476_v47 = vld [vmem:[#allocation5 + $0x4f0] sm:$0xf0]  ;;  %v5111_v19 = vor.u32 %v7088_v41, %v5108_v10 }
  0xcf   :  { %3896 = vmatpush.bf16.msra.mxu3 %v5287_v59  ;;  %v7120_v18 = vld [vmem:[#allocation5 + $0x304] sm:$0xf]  ;;  %v5732_v23 = vld [vmem:[#allocation5 + $0x6f0] sm:$0xf0]  ;;  %v5479_v33 = vor.u32 %v7180_v31, %v5476_v47 }
  0xd0   :  { %3858 = vmatpush.bf16.msra.mxu0 %v4887_v2  ;;  %v7244_v28 = vld [vmem:[#allocation5 + $0x6e4] sm:$0xf]  ;;  %v5236_v36 = vld [vmem:[#allocation5 + $0x310] sm:$0xf0] }
  0xd1   :  { %3884 = vmatpush.bf16.msra.mxu2 %v5143_v25  ;;  %3871 = vmatpush.bf16.msra.mxu1 %v5015_v45  ;;  %v7212_v13 = vld [vmem:[#allocation5 + $0x5e4] sm:$0xf]  ;;  %v5604_v55 = vld [vmem:[#allocation5 + $0x5f0] sm:$0xf0]  ;;  %v5735_v5 = vor.u32 %v7244_v28, %v5732_v23  ;;  %v5239_v62 = vor.u32 %v7120_v18, %v5236_v36 }
  0xd2   :  { %v7276_v12 = vld [vmem:[#allocation5 + $0x7e4] sm:$0xf]  ;;  %v5860_v57 = vld [vmem:[#allocation5 + $0x7f0] sm:$0xf0]  ;;  %v5607_v58 = vor.u32 %v7212_v13, %v5604_v55  ;;  %v962_v13 = vld [vmem:[#allocation7] sm:$0xf] }
  0xd3   :  { %3897 = vmatpush.bf16.msra.mxu3 %v5271_v16  ;;  %v7176_v6 = vld [vmem:[#allocation5 + $0x4c4] sm:$0xf]  ;;  %v5460_v17 = vld [vmem:[#allocation5 + $0x4d0] sm:$0xf0]  ;;  %v5863_v0 = vor.u32 %v7276_v12, %v5860_v57 }
  0xd4   :  { %3859 = vmatpush.bf16.msra.mxu0 %v4871_v50  ;;  %v7240_v14 = vld [vmem:[#allocation5 + $0x6c4] sm:$0xf]  ;;  %v5716_v40 = vld [vmem:[#allocation5 + $0x6d0] sm:$0xf0]  ;;  %v5463_v3 = vor.u32 %v7176_v6, %v5460_v17 }
  0xd5   :  { %3885 = vmatpush.bf16.msra.mxu2 %v5127_v21  ;;  %3872 = vmatpush.bf16.msra.mxu1 %v4999_v61  ;;  %v7208_v51 = vld [vmem:[#allocation5 + $0x5c4] sm:$0xf]  ;;  %v5588_v11 = vld [vmem:[#allocation5 + $0x5d0] sm:$0xf0]  ;;  %v5719_v7 = vor.u32 %v7240_v14, %v5716_v40 }
  0xd6   :  { %v7272_v38 = vld [vmem:[#allocation5 + $0x7c4] sm:$0xf]  ;;  %v5844_v34 = vld [vmem:[#allocation5 + $0x7d0] sm:$0xf0]  ;;  %v5591_v48 = vor.u32 %v7208_v51, %v5588_v11 }
  0xd7   :  { %3898 = vmatpush.bf16.msra.mxu3 %v5255_v35  ;;  %v7172_v8 = vld [vmem:[#allocation5 + $0x4a4] sm:$0xf]  ;;  %v5444_v46 = vld [vmem:[#allocation5 + $0x4b0] sm:$0xf0]  ;;  %v5847_v37 = vor.u32 %v7272_v38, %v5844_v34 }
  0xd8   :  { %3860 = vmatpush.bf16.msra.mxu0 %v4855_v22  ;;  %v7236_v59 = vld [vmem:[#allocation5 + $0x6a4] sm:$0xf]  ;;  %v5700_v15 = vld [vmem:[#allocation5 + $0x6b0] sm:$0xf0]  ;;  %v5447_v42 = vor.u32 %v7172_v8, %v5444_v46 }
  0xd9   :  { %3886 = vmatpush.bf16.msra.mxu2 %v5111_v19  ;;  %3873 = vmatpush.bf16.msra.mxu1 %v4983_v4  ;;  %v7204_v2 = vld [vmem:[#allocation5 + $0x5a4] sm:$0xf]  ;;  %v5572_v56 = vld [vmem:[#allocation5 + $0x5b0] sm:$0xf0]  ;;  %v5703_v20 = vor.u32 %v7236_v59, %v5700_v15 }
  0xda   :  { %v7268_v25 = vld [vmem:[#allocation5 + $0x7a4] sm:$0xf]  ;;  %v5828_v30 = vld [vmem:[#allocation5 + $0x7b0] sm:$0xf0]  ;;  %v5575_v16 = vor.u32 %v7204_v2, %v5572_v56 }
  0xdb   :  { %3899 = vmatpush.bf16.msra.mxu3 %v5239_v62  ;;  %v7168_v45 = vld [vmem:[#allocation5 + $0x484] sm:$0xf]  ;;  %v5428_v43 = vld [vmem:[#allocation5 + $0x490] sm:$0xf0]  ;;  %v5831_v50 = vor.u32 %v7268_v25, %v5828_v30 }
  0xdc   :  { %3905 = vmatpush.bf16.msrb.mxu0 %v5479_v33  ;;  %3887 = vmatmul.bf16.vlgmr.msra.gmra.mxu2 %v8051_v53  ;;  %v8676_v63 = vld [vmem:[#allocation19_spill] sm:$0xff]  ;;  %v7232_v54 = vld [vmem:[#allocation5 + $0x684] sm:$0xf]  ;;  %v5431_v1 = vor.u32 %v7168_v45, %v5428_v43 }
  0xdd   :  { %3931 = vmatpush.bf16.msrb.mxu2 %v5735_v5  ;;  %3918 = vmatpush.bf16.msrb.mxu1 %v5607_v58  ;;  %v5684_v52 = vld [vmem:[#allocation5 + $0x690] sm:$0xf0]  ;;  %v7200_v24 = vld [vmem:[#allocation5 + $0x584] sm:$0xf]  ;;  %v964_v58 = vperm.slane %v962_v13, 0 }
  0xde   :  { %3874 = vmatmul.bf16.vlgmr.msra.gmra.mxu1 %v8090_v29  ;;  %3861 = vmatmul.bf16.vlgmr.msra.gmra.mxu0 %v8676_v63  ;;  %v5556_v26 = vld [vmem:[#allocation5 + $0x590] sm:$0xf0]  ;;  %v7264_v21 = vld [vmem:[#allocation5 + $0x784] sm:$0xf]  ;;  %v5687_v9 = vor.u32 %v7232_v54, %v5684_v52 }
  0xdf   :  { %3944 = vmatpush.bf16.msrb.mxu3 %v5863_v0  ;;  %v5812_v60 = vld [vmem:[#allocation5 + $0x790] sm:$0xf0]  ;;  %v7164_v41 = vld [vmem:[#allocation5 + $0x464] sm:$0xf]  ;;  %v5559_v10 = vor.u32 %v7200_v24, %v5556_v26 }
  0xe0   :  { %3906 = vmatpush.bf16.msrb.mxu0 %v5463_v3  ;;  %3900 = vmatmul.bf16.vlgmr.msra.gmra.mxu3 %v8677_v49  ;;  %v5412_v61 = vld [vmem:[#allocation5 + $0x470] sm:$0xf0]  ;;  %v7228_v31 = vld [vmem:[#allocation5 + $0x664] sm:$0xf]  ;;  %v5815_v35 = vor.u32 %v7264_v21, %v5812_v60 }
  0xe1   :  { %3932 = vmatpush.bf16.msrb.mxu2 %v5719_v7  ;;  %3919 = vmatpush.bf16.msrb.mxu1 %v5591_v48  ;;  %v5668_v47 = vld [vmem:[#allocation5 + $0x670] sm:$0xf0]  ;;  %v7196_v18 = vld [vmem:[#allocation5 + $0x564] sm:$0xf]  ;;  %v5415_v23 = vor.u32 %v7164_v41, %v5412_v61 }
  0xe2   :  { %v5540_v28 = vld [vmem:[#allocation5 + $0x570] sm:$0xf0]  ;;  %v7260_v22 = vld [vmem:[#allocation5 + $0x764] sm:$0xf]  ;;  %v5671_v19 = vor.u32 %v7228_v31, %v5668_v47 }
  0xe3   :  { %3945 = vmatpush.bf16.msrb.mxu3 %v5847_v37  ;;  %v5796_v36 = vld [vmem:[#allocation5 + $0x770] sm:$0xf0]  ;;  %v7160_v33 = vld [vmem:[#allocation5 + $0x444] sm:$0xf]  ;;  %v5543_v57 = vor.u32 %v7196_v18, %v5540_v28 }
  0xe4   :  { %3907 = vmatpush.bf16.msrb.mxu0 %v5447_v42  ;;  %v5396_v12 = vld [vmem:[#allocation5 + $0x450] sm:$0xf0]  ;;  %v7224_v4 = vld [vmem:[#allocation5 + $0x644] sm:$0xf]  ;;  %v5799_v6 = vor.u32 %v7260_v22, %v5796_v36  ;;  %v3680_v38 = vpop.f32.mrf.mxu2 }
  0xe5   :  { %3933 = vmatpush.bf16.msrb.mxu2 %v5703_v20  ;;  %3920 = vmatpush.bf16.msrb.mxu1 %v5575_v16  ;;  %v5652_v5 = vld [vmem:[#allocation5 + $0x650] sm:$0xf0]  ;;  %v7192_v17 = vld [vmem:[#allocation5 + $0x544] sm:$0xf]  ;;  %v5399_v14 = vor.u32 %v7160_v33, %v5396_v12 }
  0xe6   :  { %v5524_v62 = vld [vmem:[#allocation5 + $0x550] sm:$0xf0]  ;;  %v7256_v40 = vld [vmem:[#allocation5 + $0x744] sm:$0xf]  ;;  %v5655_v51 = vor.u32 %v7224_v4, %v5652_v5 }
  0xe7   :  { %3946 = vmatpush.bf16.msrb.mxu3 %v5831_v50  ;;  %v5780_v0 = vld [vmem:[#allocation5 + $0x750] sm:$0xf0]  ;;  %v7156_v11 = vld [vmem:[#allocation5 + $0x424] sm:$0xf]  ;;  %v5527_v34 = vor.u32 %v7192_v17, %v5524_v62 }
  0xe8   :  { %3908 = vmatpush.bf16.msrb.mxu0 %v5431_v1  ;;  %v3654_v55 = vpop.f32.mrf.mxu0  ;;  %v5380_v3 = vld [vmem:[#allocation5 + $0x430] sm:$0xf0]  ;;  %v7220_v7 = vld [vmem:[#allocation5 + $0x624] sm:$0xf]  ;;  %v5783_v46 = vor.u32 %v7256_v40, %v5780_v0 }
  0xe9   :  { %3934 = vmatpush.bf16.msrb.mxu2 %v5687_v9  ;;  %3921 = vmatpush.bf16.msrb.mxu1 %v5559_v10  ;;  %v5636_v8 = vld [vmem:[#allocation5 + $0x630] sm:$0xf0]  ;;  %v7188_v48 = vld [vmem:[#allocation5 + $0x524] sm:$0xf]  ;;  %v3655_v37 = vadd.f32 %v3654_v55, %v964_v58  ;;  %v5383_v56 = vor.u32 %v7156_v11, %v5380_v3 }
  0xea   :  { %v5508_v59 = vld [vmem:[#allocation5 + $0x530] sm:$0xf0]  ;;  %v7252_v15 = vld [vmem:[#allocation5 + $0x724] sm:$0xf]  ;;  %v5639_v45 = vor.u32 %v7220_v7, %v5636_v8 }
  0xeb   :  { %3947 = vmatpush.bf16.msrb.mxu3 %v5815_v35  ;;  %v5764_v42 = vld [vmem:[#allocation5 + $0x730] sm:$0xf0]  ;;  %v7152_v25 = vld [vmem:[#allocation5 + $0x404] sm:$0xf]  ;;  %v5511_v52 = vor.u32 %v7188_v48, %v5508_v59 }
  0xec   :  { %3909 = vmatpush.bf16.msrb.mxu0 %v5415_v23  ;;  %v3693_v2 = vpop.f32.mrf.mxu3  ;;  %v5364_v30 = vld [vmem:[#allocation5 + $0x410] sm:$0xf0]  ;;  %v7184_v43 = vld [vmem:[#allocation5 + $0x504] sm:$0xf]  ;;  %v3667_v1 = vpop.f32.mrf.mxu1  ;;  %v5767_v21 = vor.u32 %v7252_v15, %v5764_v42 }
  0xed   :  { %3935 = vmatpush.bf16.msrb.mxu2 %v5671_v19  ;;  %3922 = vmatpush.bf16.msrb.mxu1 %v5543_v57  ;;  %v5492_v16 = vld [vmem:[#allocation5 + $0x510] sm:$0xf0]  ;;  %v7216_v54 = vld [vmem:[#allocation5 + $0x604] sm:$0xf]  ;;  %v3668_v61 = vadd.f32 %v3667_v1, %v3655_v37  ;;  %v5367_v10 = vor.u32 %v7152_v25, %v5364_v30  ;;  %v3682_v13 = vpop.f32.mrf.mxu2  ;;  %v8679_v30 = vld [vmem:[#allocation24_spill] sm:$0xff] }
  0xee   :  { %v5620_v50 = vld [vmem:[#allocation5 + $0x610] sm:$0xf0]  ;;  %v7308_v24 = vld [vmem:[#allocation5 + $0x8e4] sm:$0xf]  ;;  %v5495_v55 = vor.u32 %v7184_v43, %v5492_v16 }
  0xef   :  { %3948 = vmatpush.bf16.msrb.mxu3 %v5799_v6  ;;  %v5988_v26 = vld [vmem:[#allocation5 + $0x8f0] sm:$0xf0]  ;;  %v7248_v60 = vld [vmem:[#allocation5 + $0x704] sm:$0xf]  ;;  %v5623_v18 = vor.u32 %v7216_v54, %v5620_v50  ;;  %v3681_v36 = vadd.f32 %v3680_v38, %v3668_v61 }
  0xf0   :  { %3910 = vmatpush.bf16.msrb.mxu0 %v5399_v14  ;;  %v3656_v20 = vpop.f32.mrf.mxu0  ;;  %v7372_v9 = vld [vmem:[#allocation5 + $0xae4] sm:$0xf]  ;;  %v6244_v41 = vld [vmem:[#allocation5 + $0xaf0] sm:$0xf0]  ;;  %v5991_v28 = vor.u32 %v7308_v24, %v5988_v26 }
  0xf1   :  { %3936 = vmatpush.bf16.msrb.mxu2 %v5655_v51  ;;  %3923 = vmatpush.bf16.msrb.mxu1 %v5527_v34  ;;  %v5748_v31 = vld [vmem:[#allocation5 + $0x710] sm:$0xf0]  ;;  %v7340_v47 = vld [vmem:[#allocation5 + $0x9e4] sm:$0xf]  ;;  %v6247_v19 = vor.u32 %v7372_v9, %v6244_v41  ;;  %v8509_v17 = vadd.f32 %v3693_v2, %v3681_v36 }
  0xf2   :  { %v6116_v35 = vld [vmem:[#allocation5 + $0x9f0] sm:$0xf0]  ;;  %v7404_v23 = vld [vmem:[#allocation5 + $0xbe4] sm:$0xf]  ;;  %v5751_v57 = vor.u32 %v7248_v60, %v5748_v31 }
  0xf3   :  { %3949 = vmatpush.bf16.msrb.mxu3 %v5783_v46  ;;  %v6372_v22 = vld [vmem:[#allocation5 + $0xbf0] sm:$0xf0]  ;;  %v7304_v33 = vld [vmem:[#allocation5 + $0x8c4] sm:$0xf]  ;;  %v6119_v4 = vor.u32 %v7340_v47, %v6116_v35 }
  0xf4   :  { %3911 = vmatpush.bf16.msrb.mxu0 %v5383_v56  ;;  %v5972_v12 = vld [vmem:[#allocation5 + $0x8d0] sm:$0xf0]  ;;  %v7368_v5 = vld [vmem:[#allocation5 + $0xac4] sm:$0xf]  ;;  %v3695_v62 = vpop.f32.mrf.mxu3  ;;  %v6375_v58 = vor.u32 %v7404_v23, %v6372_v22  ;;  %v3669_v7 = vpop.f32.mrf.mxu1 }
  0xf5   :  { %3937 = vmatpush.bf16.msrb.mxu2 %v5639_v45  ;;  %3924 = vmatpush.bf16.msrb.mxu1 %v5511_v52  ;;  %v6228_v6 = vld [vmem:[#allocation5 + $0xad0] sm:$0xf0]  ;;  %v7336_v14 = vld [vmem:[#allocation5 + $0x9c4] sm:$0xf]  ;;  %v5975_v0 = vor.u32 %v7304_v33, %v5972_v12  ;;  %v8680_v45 = vld [vmem:[#allocation22_spill] sm:$0xff] }
  0xf6   :  { %v6100_v40 = vld [vmem:[#allocation5 + $0x9d0] sm:$0xf0]  ;;  %v7400_v51 = vld [vmem:[#allocation5 + $0xbc4] sm:$0xf]  ;;  %v6231_v3 = vor.u32 %v7368_v5, %v6228_v6 }
  0xf7   :  { %3950 = vmatpush.bf16.msrb.mxu3 %v5767_v21  ;;  %v6356_v11 = vld [vmem:[#allocation5 + $0xbd0] sm:$0xf0]  ;;  %v7300_v38 = vld [vmem:[#allocation5 + $0x8a4] sm:$0xf]  ;;  %v6103_v8 = vor.u32 %v7336_v14, %v6100_v40 }
  0xf8   :  { %3912 = vmatpush.bf16.msrb.mxu0 %v5367_v10  ;;  %v5956_v34 = vld [vmem:[#allocation5 + $0x8b0] sm:$0xf0]  ;;  %v7364_v46 = vld [vmem:[#allocation5 + $0xaa4] sm:$0xf]  ;;  %v6359_v59 = vor.u32 %v7400_v51, %v6356_v11 }
  0xf9   :  { %3938 = vmatpush.bf16.msrb.mxu2 %v5623_v18  ;;  %3925 = vmatpush.bf16.msrb.mxu1 %v5495_v55  ;;  %v6212_v48 = vld [vmem:[#allocation5 + $0xab0] sm:$0xf0]  ;;  %v8678_v15 = vld [vmem:[#allocation21_spill] sm:$0xff]  ;;  %v5959_v56 = vor.u32 %v7300_v38, %v5956_v34 }
  0xfa   :  { %v7332_v37 = vld [vmem:[#allocation5 + $0x9a4] sm:$0xf]  ;;  %v6084_v2 = vld [vmem:[#allocation5 + $0x9b0] sm:$0xf0]  ;;  %v6215_v20 = vor.u32 %v7364_v46, %v6212_v48 }
  0xfb   :  { %3951 = vmatpush.bf16.msrb.mxu3 %v5751_v57  ;;  %v7396_v42 = vld [vmem:[#allocation5 + $0xba4] sm:$0xf]  ;;  %v6340_v25 = vld [vmem:[#allocation5 + $0xbb0] sm:$0xf0]  ;;  %3913 = vmatmul.bf16.vlgmr.msrb.gmra.mxu0 %v8680_v45  ;;  %v6087_v54 = vor.u32 %v7332_v37, %v6084_v2 }
  0xfc   :  { %3957 = vmatpush.bf16.msra.mxu0 %v5991_v28  ;;  %3939 = vmatmul.bf16.vlgmr.msrb.gmra.mxu2 %v8678_v15  ;;  %v7296_v43 = vld [vmem:[#allocation5 + $0x884] sm:$0xf]  ;;  %v5940_v16 = vld [vmem:[#allocation5 + $0x890] sm:$0xf0]  ;;  %v6343_v26 = vor.u32 %v7396_v42, %v6340_v25 }
  0xfd   :  { %3983 = vmatpush.bf16.msra.mxu2 %v6247_v19  ;;  %3970 = vmatpush.bf16.msra.mxu1 %v6119_v4  ;;  %v8681_v52 = vld [vmem:[#allocation23_spill] sm:$0xff]  ;;  %v7360_v50 = vld [vmem:[#allocation5 + $0xa84] sm:$0xf]  ;;  %v5943_v60 = vor.u32 %v7296_v43, %v5940_v16 }
  0xfe   :  { %3926 = vmatmul.bf16.vlgmr.msrb.gmra.mxu1 %v8679_v30  ;;  %3952 = vmatmul.bf16.vlgmr.msrb.gmra.mxu3 %v8681_v52  ;;  %v6196_v24 = vld [vmem:[#allocation5 + $0xa90] sm:$0xf0]  ;;  %v7328_v1 = vld [vmem:[#allocation5 + $0x984] sm:$0xf] }
  0xff   :  { %3996 = vmatpush.bf16.msra.mxu3 %v6375_v58  ;;  %v6068_v21 = vld [vmem:[#allocation5 + $0x990] sm:$0xf0]  ;;  %v7392_v9 = vld [vmem:[#allocation5 + $0xb84] sm:$0xf]  ;;  %v6199_v61 = vor.u32 %v7360_v50, %v6196_v24  ;;  %v3706_v19 = vpop.f32.mrf.mxu0 }
 0x100   :  { %3958 = vmatpush.bf16.msra.mxu0 %v5975_v0  ;;  %v6324_v41 = vld [vmem:[#allocation5 + $0xb90] sm:$0xf0]  ;;  %v7292_v10 = vld [vmem:[#allocation5 + $0x864] sm:$0xf]  ;;  %v6071_v47 = vor.u32 %v7328_v1, %v6068_v21  ;;  %v3707_v12 = vadd.f32 %v3706_v19, %v8509_v17 }
 0x101   :  { %3984 = vmatpush.bf16.msra.mxu2 %v6231_v3  ;;  %3971 = vmatpush.bf16.msra.mxu1 %v6103_v8  ;;  %v5924_v31 = vld [vmem:[#allocation5 + $0x870] sm:$0xf0]  ;;  %v7356_v35 = vld [vmem:[#allocation5 + $0xa64] sm:$0xf]  ;;  %v6327_v28 = vor.u32 %v7392_v9, %v6324_v41  ;;  %v3732_v58 = vpop.f32.mrf.mxu2 }
 0x102   :  { %v6180_v18 = vld [vmem:[#allocation5 + $0xa70] sm:$0xf0]  ;;  %v7324_v23 = vld [vmem:[#allocation5 + $0x964] sm:$0xf]  ;;  %v5927_v36 = vor.u32 %v7292_v10, %v5924_v31 }
 0x103   :  { %3997 = vmatpush.bf16.msra.mxu3 %v6359_v59  ;;  %v6052_v22 = vld [vmem:[#allocation5 + $0x970] sm:$0xf0]  ;;  %v7388_v13 = vld [vmem:[#allocation5 + $0xb64] sm:$0xf]  ;;  %v6183_v33 = vor.u32 %v7356_v35, %v6180_v18 }
 0x104   :  { %3959 = vmatpush.bf16.msra.mxu0 %v5959_v56  ;;  %v6308_v55 = vld [vmem:[#allocation5 + $0xb70] sm:$0xf0]  ;;  %v7288_v57 = vld [vmem:[#allocation5 + $0x844] sm:$0xf]  ;;  %v6055_v5 = vor.u32 %v7324_v23, %v6052_v22 }
 0x105   :  { %3985 = vmatpush.bf16.msra.mxu2 %v6215_v20  ;;  %3972 = vmatpush.bf16.msra.mxu1 %v6087_v54  ;;  %v5908_v4 = vld [vmem:[#allocation5 + $0x850] sm:$0xf0]  ;;  %v7352_v6 = vld [vmem:[#allocation5 + $0xa44] sm:$0xf]  ;;  %v6311_v14 = vor.u32 %v7388_v13, %v6308_v55  ;;  %v3719_v8 = vpop.f32.mrf.mxu1 }
 0x106   :  { %v6164_v62 = vld [vmem:[#allocation5 + $0xa50] sm:$0xf0]  ;;  %v7320_v40 = vld [vmem:[#allocation5 + $0x944] sm:$0xf]  ;;  %v5911_v51 = vor.u32 %v7288_v57, %v5908_v4  ;;  %v3720_v37 = vadd.f32 %v3719_v8, %v3707_v12 }
 0x107   :  { %3998 = vmatpush.bf16.msra.mxu3 %v6343_v26  ;;  %v6036_v0 = vld [vmem:[#allocation5 + $0x950] sm:$0xf0]  ;;  %v7384_v11 = vld [vmem:[#allocation5 + $0xb44] sm:$0xf]  ;;  %v6167_v38 = vor.u32 %v7352_v6, %v6164_v62  ;;  %v3708_v54 = vpop.f32.mrf.mxu0 }
 0x108   :  { %3960 = vmatpush.bf16.msra.mxu0 %v5943_v60  ;;  %v6292_v3 = vld [vmem:[#allocation5 + $0xb50] sm:$0xf0]  ;;  %v7284_v34 = vld [vmem:[#allocation5 + $0x824] sm:$0xf]  ;;  %v6039_v17 = vor.u32 %v7320_v40, %v6036_v0  ;;  %v3733_v50 = vadd.f32 %v3732_v58, %v3720_v37  ;;  %v3745_v26 = vpop.f32.mrf.mxu3 }
 0x109   :  { %3986 = vmatpush.bf16.msra.mxu2 %v6199_v61  ;;  %3973 = vmatpush.bf16.msra.mxu1 %v6071_v47  ;;  %v5892_v7 = vld [vmem:[#allocation5 + $0x830] sm:$0xf0]  ;;  %v7348_v46 = vld [vmem:[#allocation5 + $0xa24] sm:$0xf]  ;;  %v6295_v59 = vor.u32 %v7384_v11, %v6292_v3  ;;  %v3734_v31 = vpop.f32.mrf.mxu2 }
 0x10a   :  { %v6148_v48 = vld [vmem:[#allocation5 + $0xa30] sm:$0xf0]  ;;  %v7316_v2 = vld [vmem:[#allocation5 + $0x924] sm:$0xf]  ;;  %v5895_v25 = vor.u32 %v7284_v34, %v5892_v7  ;;  %v8516_v35 = vadd.f32 %v3745_v26, %v3733_v50  ;;  %v8685_v26 = vld [vmem:[#allocation28_spill] sm:$0xff] }
 0x10b   :  { %3999 = vmatpush.bf16.msra.mxu3 %v6327_v28  ;;  %v6020_v56 = vld [vmem:[#allocation5 + $0x930] sm:$0xf0]  ;;  %v7380_v42 = vld [vmem:[#allocation5 + $0xb24] sm:$0xf]  ;;  %v6151_v24 = vor.u32 %v7348_v46, %v6148_v48 }
 0x10c   :  { %3961 = vmatpush.bf16.msra.mxu0 %v5927_v36  ;;  %v6276_v20 = vld [vmem:[#allocation5 + $0xb30] sm:$0xf0]  ;;  %v7280_v43 = vld [vmem:[#allocation5 + $0x804] sm:$0xf]  ;;  %v6023_v9 = vor.u32 %v7316_v2, %v6020_v56 }
 0x10d   :  { %3987 = vmatpush.bf16.msra.mxu2 %v6183_v33  ;;  %3974 = vmatpush.bf16.msra.mxu1 %v6055_v5  ;;  %v5876_v16 = vld [vmem:[#allocation5 + $0x810] sm:$0xf0]  ;;  %v7312_v1 = vld [vmem:[#allocation5 + $0x904] sm:$0xf]  ;;  %v6279_v47 = vor.u32 %v7380_v42, %v6276_v20  ;;  %v3721_v6 = vpop.f32.mrf.mxu1 }
 0x10e   :  { %v6004_v21 = vld [vmem:[#allocation5 + $0x910] sm:$0xf0]  ;;  %v7344_v60 = vld [vmem:[#allocation5 + $0xa04] sm:$0xf]  ;;  %v5879_v22 = vor.u32 %v7280_v43, %v5876_v16  ;;  %v8683_v16 = vld [vmem:[#allocation26_spill] sm:$0xff] }
 0x10f   :  { %4000 = vmatpush.bf16.msra.mxu3 %v6311_v14  ;;  %v6132_v41 = vld [vmem:[#allocation5 + $0xa10] sm:$0xf0]  ;;  %v7436_v61 = vld [vmem:[#allocation5 + $0xce4] sm:$0xf]  ;;  %v6007_v4 = vor.u32 %v7312_v1, %v6004_v21 }
 0x110   :  { %3962 = vmatpush.bf16.msra.mxu0 %v5911_v51  ;;  %v6500_v10 = vld [vmem:[#allocation5 + $0xcf0] sm:$0xf0]  ;;  %v7376_v18 = vld [vmem:[#allocation5 + $0xb04] sm:$0xf]  ;;  %v6135_v19 = vor.u32 %v7344_v60, %v6132_v41 }
 0x111   :  { %3988 = vmatpush.bf16.msra.mxu2 %v6167_v38  ;;  %3975 = vmatpush.bf16.msra.mxu1 %v6039_v17  ;;  %v7500_v28 = vld [vmem:[#allocation5 + $0xee4] sm:$0xf]  ;;  %v6756_v23 = vld [vmem:[#allocation5 + $0xef0] sm:$0xf0]  ;;  %v6503_v33 = vor.u32 %v7436_v61, %v6500_v10  ;;  %v3747_v17 = vpop.f32.mrf.mxu3 }
 0x112   :  { %v6260_v36 = vld [vmem:[#allocation5 + $0xb10] sm:$0xf0]  ;;  %v7468_v13 = vld [vmem:[#allocation5 + $0xde4] sm:$0xf]  ;;  %v6759_v5 = vor.u32 %v7500_v28, %v6756_v23 }
 0x113   :  { %4001 = vmatpush.bf16.msra.mxu3 %v6295_v59  ;;  %v6628_v55 = vld [vmem:[#allocation5 + $0xdf0] sm:$0xf0]  ;;  %v7532_v12 = vld [vmem:[#allocation5 + $0xfe4] sm:$0xf]  ;;  %v6263_v62 = vor.u32 %v7376_v18, %v6260_v36 }
 0x114   :  { %3963 = vmatpush.bf16.msra.mxu0 %v5895_v25  ;;  %v6884_v57 = vld [vmem:[#allocation5 + $0xff0] sm:$0xf0]  ;;  %v6631_v58 = vor.u32 %v7468_v13, %v6628_v55  ;;  %v7432_v14 = vld [vmem:[#allocation5 + $0xcc4] sm:$0xf] }
 0x115   :  { %3989 = vmatpush.bf16.msra.mxu2 %v6151_v24  ;;  %3976 = vmatpush.bf16.msra.mxu1 %v6023_v9  ;;  %v6484_v40 = vld [vmem:[#allocation5 + $0xcd0] sm:$0xf0]  ;;  %v7464_v0 = vld [vmem:[#allocation5 + $0xdc4] sm:$0xf]  ;;  %v6887_v51 = vor.u32 %v7532_v12, %v6884_v57 }
 0x116   :  { %v6612_v11 = vld [vmem:[#allocation5 + $0xdd0] sm:$0xf0]  ;;  %v7496_v3 = vld [vmem:[#allocation5 + $0xec4] sm:$0xf]  ;;  %v6487_v8 = vor.u32 %v7432_v14, %v6484_v40 }
 0x117   :  { %4002 = vmatpush.bf16.msra.mxu3 %v6279_v47  ;;  %v6740_v38 = vld [vmem:[#allocation5 + $0xed0] sm:$0xf0]  ;;  %v7528_v34 = vld [vmem:[#allocation5 + $0xfc4] sm:$0xf]  ;;  %v6615_v46 = vor.u32 %v7464_v0, %v6612_v11 }
 0x118   :  { %3964 = vmatpush.bf16.msra.mxu0 %v5879_v22  ;;  %v6868_v7 = vld [vmem:[#allocation5 + $0xfd0] sm:$0xf0]  ;;  %v6743_v48 = vor.u32 %v7496_v3, %v6740_v38  ;;  %v7428_v59 = vld [vmem:[#allocation5 + $0xca4] sm:$0xf] }
 0x119   :  { %3990 = vmatpush.bf16.msra.mxu2 %v6135_v19  ;;  %3977 = vmatpush.bf16.msra.mxu1 %v6007_v4  ;;  %v6468_v37 = vld [vmem:[#allocation5 + $0xcb0] sm:$0xf0]  ;;  %v7460_v2 = vld [vmem:[#allocation5 + $0xda4] sm:$0xf]  ;;  %v6871_v42 = vor.u32 %v7528_v34, %v6868_v7 }
 0x11a   :  { %v8682_v56 = vld [vmem:[#allocation25_spill] sm:$0xff]  ;;  %v6596_v25 = vld [vmem:[#allocation5 + $0xdb0] sm:$0xf0]  ;;  %v6471_v1 = vor.u32 %v7428_v59, %v6468_v37 }
 0x11b   :  { %4003 = vmatpush.bf16.msra.mxu3 %v6263_v62  ;;  %3965 = vmatmul.bf16.vlgmr.msra.gmra.mxu0 %v8682_v56  ;;  %v7492_v20 = vld [vmem:[#allocation5 + $0xea4] sm:$0xf]  ;;  %v6724_v43 = vld [vmem:[#allocation5 + $0xeb0] sm:$0xf0]  ;;  %v6599_v21 = vor.u32 %v7460_v2, %v6596_v25 }
 0x11c   :  { %4009 = vmatpush.bf16.msrb.mxu0 %v6503_v33  ;;  %3991 = vmatmul.bf16.vlgmr.msra.gmra.mxu2 %v8683_v16  ;;  %v8684_v54 = vld [vmem:[#allocation27_spill] sm:$0xff]  ;;  %v7524_v50 = vld [vmem:[#allocation5 + $0xfa4] sm:$0xf]  ;;  %v6727_v60 = vor.u32 %v7492_v20, %v6724_v43 }
 0x11d   :  { %4035 = vmatpush.bf16.msrb.mxu2 %v6759_v5  ;;  %4022 = vmatpush.bf16.msrb.mxu1 %v6631_v58  ;;  %v6852_v24 = vld [vmem:[#allocation5 + $0xfb0] sm:$0xf0]  ;;  %v7424_v9 = vld [vmem:[#allocation5 + $0xc84] sm:$0xf] }
 0x11e   :  { %3978 = vmatmul.bf16.vlgmr.msra.gmra.mxu1 %v8684_v54  ;;  %4004 = vmatmul.bf16.vlgmr.msra.gmra.mxu3 %v8685_v26  ;;  %v6452_v41 = vld [vmem:[#allocation5 + $0xc90] sm:$0xf0]  ;;  %v7456_v61 = vld [vmem:[#allocation5 + $0xd84] sm:$0xf]  ;;  %v6855_v10 = vor.u32 %v7524_v50, %v6852_v24  ;;  %v3758_v6 = vpop.f32.mrf.mxu0 }
 0x11f   :  { %4048 = vmatpush.bf16.msrb.mxu3 %v6887_v51  ;;  %v6580_v31 = vld [vmem:[#allocation5 + $0xd90] sm:$0xf0]  ;;  %v7488_v47 = vld [vmem:[#allocation5 + $0xe84] sm:$0xf]  ;;  %v6455_v22 = vor.u32 %v7424_v9, %v6452_v41  ;;  %v3759_v14 = vadd.f32 %v3758_v6, %v8516_v35  ;;  %v3771_v34 = vpop.f32.mrf.mxu1  ;;  %v7055_v6 = vld [vmem:[#allocation5 + $0xf4] sm:$0xf0] }
 0x120   :  { %4010 = vmatpush.bf16.msrb.mxu0 %v6487_v8  ;;  %v6708_v18 = vld [vmem:[#allocation5 + $0xe90] sm:$0xf0]  ;;  %v7520_v28 = vld [vmem:[#allocation5 + $0xf84] sm:$0xf]  ;;  %v6583_v36 = vor.u32 %v7456_v61, %v6580_v31 }
 0x121   :  { %4023 = vmatpush.bf16.msrb.mxu1 %v6615_v46  ;;  %4036 = vmatpush.bf16.msrb.mxu2 %v6743_v48  ;;  %v6836_v23 = vld [vmem:[#allocation5 + $0xf90] sm:$0xf0]  ;;  %v6711_v13 = vor.u32 %v7488_v47, %v6708_v18  ;;  %v7420_v55 = vld [vmem:[#allocation5 + $0xc64] sm:$0xf]  ;;  %v3772_v48 = vadd.f32 %v3771_v34, %v3759_v14  ;;  %v7151_v34 = vld [vmem:[#allocation5 + $0x3f4] sm:$0xf0] }
 0x122   :  { %v6436_v19 = vld [vmem:[#allocation5 + $0xc70] sm:$0xf0]  ;;  %v7452_v33 = vld [vmem:[#allocation5 + $0xd64] sm:$0xf]  ;;  %v6839_v12 = vor.u32 %v7520_v28, %v6836_v23  ;;  %v3784_v50 = vpop.f32.mrf.mxu2 }
 0x123   :  { %4049 = vmatpush.bf16.msrb.mxu3 %v6871_v42  ;;  %v6564_v57 = vld [vmem:[#allocation5 + $0xd70] sm:$0xf0]  ;;  %v7484_v4 = vld [vmem:[#allocation5 + $0xe64] sm:$0xf]  ;;  %v6439_v40 = vor.u32 %v7420_v55, %v6436_v19  ;;  %v3785_v9 = vadd.f32 %v3784_v50, %v3772_v48  ;;  %v7147_v50 = vld [vmem:[#allocation5 + $0x3d4] sm:$0xf0] }
 0x124   :  { %4011 = vmatpush.bf16.msrb.mxu0 %v6471_v1  ;;  %v6692_v5 = vld [vmem:[#allocation5 + $0xe70] sm:$0xf0]  ;;  %v7516_v62 = vld [vmem:[#allocation5 + $0xf64] sm:$0xf]  ;;  %v6567_v0 = vor.u32 %v7452_v33, %v6564_v57 }
 0x125   :  { %4024 = vmatpush.bf16.msrb.mxu1 %v6599_v21  ;;  %4037 = vmatpush.bf16.msrb.mxu2 %v6727_v60  ;;  %v6820_v58 = vld [vmem:[#allocation5 + $0xf70] sm:$0xf0]  ;;  %v6695_v51 = vor.u32 %v7484_v4, %v6692_v5  ;;  %v7416_v11 = vld [vmem:[#allocation5 + $0xc44] sm:$0xf]  ;;  %v4970_v5 = vld [vmem:[#allocation5 + $0xe8] sm:$0xf] }
 0x126   :  { %v6420_v3 = vld [vmem:[#allocation5 + $0xc50] sm:$0xf0]  ;;  %v7448_v38 = vld [vmem:[#allocation5 + $0xd44] sm:$0xf]  ;;  %v6823_v7 = vor.u32 %v7516_v62, %v6820_v58  ;;  %v5098_v62 = vld [vmem:[#allocation5 + $0x1e8] sm:$0xf] }
 0x127   :  { %4050 = vmatpush.bf16.msrb.mxu3 %v6855_v10  ;;  %v6548_v17 = vld [vmem:[#allocation5 + $0xd50] sm:$0xf0]  ;;  %v7480_v8 = vld [vmem:[#allocation5 + $0xe44] sm:$0xf]  ;;  %v6423_v35 = vor.u32 %v7416_v11, %v6420_v3  ;;  %v3760_v10 = vpop.f32.mrf.mxu0  ;;  %v3773_v57 = vpop.f32.mrf.mxu1 }
 0x128   :  { %4012 = vmatpush.bf16.msrb.mxu0 %v6455_v22  ;;  %v6676_v46 = vld [vmem:[#allocation5 + $0xe50] sm:$0xf0]  ;;  %v7512_v59 = vld [vmem:[#allocation5 + $0xf44] sm:$0xf]  ;;  %v6551_v2 = vor.u32 %v7448_v38, %v6548_v17  ;;  %v3797_v4 = vpop.f32.mrf.mxu3  ;;  %v5354_v38 = vld [vmem:[#allocation5 + $0x3e8] sm:$0xf]  ;;  %v4971_v17 = vor.u32 %v7055_v6, %v4970_v5 }
 0x129   :  { %4025 = vmatpush.bf16.msrb.mxu1 %v6583_v36  ;;  %4038 = vmatpush.bf16.msrb.mxu2 %v6711_v13  ;;  %v6804_v37 = vld [vmem:[#allocation5 + $0xf50] sm:$0xf0]  ;;  %v6679_v42 = vor.u32 %v7480_v8, %v6676_v46  ;;  %v7412_v25 = vld [vmem:[#allocation5 + $0xc24] sm:$0xf]  ;;  %v8523_v58 = vadd.f32 %v3797_v4, %v3785_v9  ;;  %v7047_v9 = vld [vmem:[#allocation5 + $0xb4] sm:$0xf0] }
 0x12a   :  { %v6404_v20 = vld [vmem:[#allocation5 + $0xc30] sm:$0xf0]  ;;  %v7444_v43 = vld [vmem:[#allocation5 + $0xd24] sm:$0xf]  ;;  %v6807_v24 = vor.u32 %v7512_v59, %v6804_v37  ;;  %v3786_v8 = vpop.f32.mrf.mxu2  ;;  %v4954_v59 = vld [vmem:[#allocation5 + $0xc8] sm:$0xf] }
 0x12b   :  { %4051 = vmatpush.bf16.msrb.mxu3 %v6839_v12  ;;  %v6532_v1 = vld [vmem:[#allocation5 + $0xd30] sm:$0xf0]  ;;  %v7476_v21 = vld [vmem:[#allocation5 + $0xe24] sm:$0xf]  ;;  %v6407_v31 = vor.u32 %v7412_v25, %v6404_v20  ;;  %v7051_v37 = vld [vmem:[#allocation5 + $0xd4] sm:$0xf0] }
 0x12c   :  { %4013 = vmatpush.bf16.msrb.mxu0 %v6439_v40  ;;  %v6660_v60 = vld [vmem:[#allocation5 + $0xe30] sm:$0xf0]  ;;  %v7508_v41 = vld [vmem:[#allocation5 + $0xf24] sm:$0xf]  ;;  %v6535_v28 = vor.u32 %v7444_v43, %v6532_v1  ;;  %v7087_v40 = vld [vmem:[#allocation5 + $0x1f4] sm:$0xf0] }
 0x12d   :  { %4026 = vmatpush.bf16.msrb.mxu1 %v6567_v0  ;;  %4039 = vmatpush.bf16.msrb.mxu2 %v6695_v51  ;;  %v6788_v61 = vld [vmem:[#allocation5 + $0xf30] sm:$0xf0]  ;;  %v7408_v47 = vld [vmem:[#allocation5 + $0xc04] sm:$0xf]  ;;  %v6663_v23 = vor.u32 %v7476_v21, %v6660_v60  ;;  %v5226_v0 = vld [vmem:[#allocation5 + $0x2e8] sm:$0xf]  ;;  %v5099_v46 = vor.u32 %v7087_v40, %v5098_v62 }
 0x12e   :  { %v6388_v18 = vld [vmem:[#allocation5 + $0xc10] sm:$0xf0]  ;;  %v7440_v22 = vld [vmem:[#allocation5 + $0xd04] sm:$0xf]  ;;  %v6791_v55 = vor.u32 %v7508_v41, %v6788_v61  ;;  %v7119_v51 = vld [vmem:[#allocation5 + $0x2f4] sm:$0xf0] }
 0x12f   :  { %4052 = vmatpush.bf16.msrb.mxu3 %v6823_v7  ;;  %v6516_v36 = vld [vmem:[#allocation5 + $0xd10] sm:$0xf0]  ;;  %v7472_v13 = vld [vmem:[#allocation5 + $0xe04] sm:$0xf]  ;;  %v6391_v14 = vor.u32 %v7408_v47, %v6388_v18  ;;  %v5227_v48 = vor.u32 %v7119_v51, %v5226_v0  ;;  %v5210_v25 = vld [vmem:[#allocation5 + $0x2c8] sm:$0xf] }
 0x130   :  { %4014 = vmatpush.bf16.msrb.mxu0 %v6423_v35  ;;  %v6644_v19 = vld [vmem:[#allocation5 + $0xe10] sm:$0xf0]  ;;  %v7504_v33 = vld [vmem:[#allocation5 + $0xf04] sm:$0xf]  ;;  %v6519_v11 = vor.u32 %v7440_v22, %v6516_v36  ;;  %v5082_v35 = vld [vmem:[#allocation5 + $0x1c8] sm:$0xf]  ;;  %v3799_v61 = vpop.f32.mrf.mxu3 }
 0x131   :  { %4027 = vmatpush.bf16.msrb.mxu1 %v6551_v2  ;;  %4040 = vmatpush.bf16.msrb.mxu2 %v6679_v42  ;;  %v6772_v12 = vld [vmem:[#allocation5 + $0xf10] sm:$0xf0]  ;;  %v6647_v3 = vor.u32 %v7472_v13, %v6644_v19  ;;  %v5355_v2 = vor.u32 %v7151_v34, %v5354_v38  ;;  %v7083_v42 = vld [vmem:[#allocation5 + $0x1d4] sm:$0xf0]  ;;  %v5338_v43 = vld [vmem:[#allocation5 + $0x3c8] sm:$0xf] }
 0x132   :  { %v6775_v7 = vor.u32 %v7504_v33, %v6772_v12  ;;  %v7115_v20 = vld [vmem:[#allocation5 + $0x2d4] sm:$0xf0]  ;;  %v5083_v1 = vor.u32 %v7083_v42, %v5082_v35  ;;  %v4938_v60 = vld [vmem:[#allocation5 + $0xa8] sm:$0xf]  ;;  %v5339_v10 = vor.u32 %v7147_v50, %v5338_v43 }
 0x133   :  { %4053 = vmatpush.bf16.msrb.mxu3 %v6807_v24  ;;  %v4955_v24 = vor.u32 %v7051_v37, %v4954_v59  ;;  %v5211_v21 = vor.u32 %v7115_v20, %v5210_v25  ;;  %v5066_v41 = vld [vmem:[#allocation5 + $0x1a8] sm:$0xf]  ;;  %v7111_v18 = vld [vmem:[#allocation5 + $0x2b4] sm:$0xf0]  ;;  %v4939_v22 = vor.u32 %v7047_v9, %v4938_v60 }
 0x134   :  { %4015 = vmatpush.bf16.msrb.mxu0 %v6407_v31  ;;  %v7079_v31 = vld [vmem:[#allocation5 + $0x1b4] sm:$0xf0]  ;;  %v5194_v47 = vld [vmem:[#allocation5 + $0x2a8] sm:$0xf] }
 0x135   :  { %4028 = vmatpush.bf16.msrb.mxu1 %v6535_v28  ;;  %4041 = vmatpush.bf16.msrb.mxu2 %v6663_v23  ;;  %v5322_v28 = vld [vmem:[#allocation5 + $0x3a8] sm:$0xf]  ;;  %v7143_v23 = vld [vmem:[#allocation5 + $0x3b4] sm:$0xf0]  ;;  %v5067_v36 = vor.u32 %v7079_v31, %v5066_v41  ;;  %v5195_v13 = vor.u32 %v7111_v18, %v5194_v47 }
 0x136   :  { %v7043_v19 = vld [vmem:[#allocation5 + $0x94] sm:$0xf0]  ;;  %v5050_v33 = vld [vmem:[#allocation5 + $0x188] sm:$0xf]  ;;  %v5323_v12 = vor.u32 %v7143_v23, %v5322_v28 }
 0x137   :  { %4054 = vmatpush.bf16.msrb.mxu3 %v6791_v55  ;;  %v4922_v55 = vld [vmem:[#allocation5 + $0x88] sm:$0xf]  ;;  %v7075_v57 = vld [vmem:[#allocation5 + $0x194] sm:$0xf0] }
 0x138   :  { %4016 = vmatpush.bf16.msrb.mxu0 %v6391_v14  ;;  %v5178_v4 = vld [vmem:[#allocation5 + $0x288] sm:$0xf]  ;;  %v7107_v5 = vld [vmem:[#allocation5 + $0x294] sm:$0xf0]  ;;  %v4923_v14 = vor.u32 %v7043_v19, %v4922_v55  ;;  %v5051_v40 = vor.u32 %v7075_v57, %v5050_v33 }
 0x139   :  { %4029 = vmatpush.bf16.msrb.mxu1 %v6519_v11  ;;  %4042 = vmatpush.bf16.msrb.mxu2 %v6647_v3  ;;  %v5306_v6 = vld [vmem:[#allocation5 + $0x388] sm:$0xf]  ;;  %v7139_v62 = vld [vmem:[#allocation5 + $0x394] sm:$0xf0]  ;;  %v5179_v0 = vor.u32 %v7107_v5, %v5178_v4 }
 0x13a   :  { %v4906_v51 = vld [vmem:[#allocation5 + $0x68] sm:$0xf]  ;;  %v7039_v11 = vld [vmem:[#allocation5 + $0x74] sm:$0xf0]  ;;  %v5307_v38 = vor.u32 %v7139_v62, %v5306_v6 }
 0x13b   :  { %4055 = vmatpush.bf16.msrb.mxu3 %v6775_v7  ;;  %4017 = vmatmul.bf16.vlgmr.msrb.gmra.mxu0 %v8490_v39  ;;  %v5034_v3 = vld [vmem:[#allocation5 + $0x168] sm:$0xf]  ;;  %v7071_v34 = vld [vmem:[#allocation5 + $0x174] sm:$0xf0] }
 0x13c   :  { %4061 = vmatpush.bf16.msra.mxu0 %v4971_v17  ;;  %4043 = vmatmul.bf16.vlgmr.msrb.gmra.mxu2 %v8493_v32  ;;  %v5162_v7 = vld [vmem:[#allocation5 + $0x268] sm:$0xf]  ;;  %v7103_v17 = vld [vmem:[#allocation5 + $0x274] sm:$0xf0]  ;;  %v5035_v37 = vor.u32 %v7071_v34, %v5034_v3 }
 0x13d   :  { %4074 = vmatpush.bf16.msra.mxu1 %v5099_v46  ;;  %4087 = vmatpush.bf16.msra.mxu2 %v5227_v48  ;;  %v5290_v8 = vld [vmem:[#allocation5 + $0x368] sm:$0xf]  ;;  %v7135_v46 = vld [vmem:[#allocation5 + $0x374] sm:$0xf0]  ;;  %v4907_v48 = vor.u32 %v7039_v11, %v4906_v51  ;;  %v5163_v35 = vor.u32 %v7103_v17, %v5162_v7 }
 0x13e   :  { %4030 = vmatmul.bf16.vlgmr.msrb.gmra.mxu1 %v8498_v27  ;;  %4056 = vmatmul.bf16.vlgmr.msrb.gmra.mxu3 %v8502_v44  ;;  %v7035_v42 = vld [vmem:[#allocation5 + $0x54] sm:$0xf0]  ;;  %v5018_v25 = vld [vmem:[#allocation5 + $0x148] sm:$0xf]  ;;  %v5291_v43 = vor.u32 %v7135_v46, %v5290_v8 }
 0x13f   :  { %4100 = vmatpush.bf16.msra.mxu3 %v5355_v2  ;;  %v4890_v2 = vld [vmem:[#allocation5 + $0x48] sm:$0xf]  ;;  %v7067_v50 = vld [vmem:[#allocation5 + $0x154] sm:$0xf0] }
 0x140   :  { %4062 = vmatpush.bf16.msra.mxu0 %v4955_v24  ;;  %v5146_v24 = vld [vmem:[#allocation5 + $0x248] sm:$0xf]  ;;  %v7131_v60 = vld [vmem:[#allocation5 + $0x354] sm:$0xf0]  ;;  %v4891_v41 = vor.u32 %v7035_v42, %v4890_v2 }
 0x141   :  { %4075 = vmatpush.bf16.msra.mxu1 %v5083_v1  ;;  %4088 = vmatpush.bf16.msra.mxu2 %v5211_v21  ;;  %v7099_v1 = vld [vmem:[#allocation5 + $0x254] sm:$0xf0]  ;;  %v5274_v21 = vld [vmem:[#allocation5 + $0x348] sm:$0xf] }
 0x142   :  { %v5147_v31 = vor.u32 %v7099_v1, %v5146_v24  ;;  %v4874_v47 = vld [vmem:[#allocation5 + $0x28] sm:$0xf]  ;;  %v7031_v18 = vld [vmem:[#allocation5 + $0x34] sm:$0xf0] }
 0x143   :  { %4101 = vmatpush.bf16.msra.mxu3 %v5339_v10  ;;  %v3810_v59 = vpop.f32.mrf.mxu0  ;;  %v3823_v9 = vpop.f32.mrf.mxu1  ;;  %v5019_v10 = vor.u32 %v7067_v50, %v5018_v25  ;;  %v5002_v28 = vld [vmem:[#allocation5 + $0x128] sm:$0xf]  ;;  %v7063_v23 = vld [vmem:[#allocation5 + $0x134] sm:$0xf0]  ;;  %v4875_v33 = vor.u32 %v7031_v18, %v4874_v47 }
 0x144   :  { %4063 = vmatpush.bf16.msra.mxu0 %v4939_v22  ;;  %v3811_v20 = vadd.f32 %v3810_v59, %v8523_v58  ;;  %v5275_v58 = vor.u32 %v7131_v60, %v5274_v21  ;;  %v5130_v22 = vld [vmem:[#allocation5 + $0x228] sm:$0xf]  ;;  %v7127_v55 = vld [vmem:[#allocation5 + $0x334] sm:$0xf0]  ;;  %v5003_v5 = vor.u32 %v7063_v23, %v5002_v28 }
 0x145   :  { %4076 = vmatpush.bf16.msra.mxu1 %v5067_v36  ;;  %4089 = vmatpush.bf16.msra.mxu2 %v5195_v13  ;;  %v7095_v36 = vld [vmem:[#allocation5 + $0x234] sm:$0xf0]  ;;  %v5258_v13 = vld [vmem:[#allocation5 + $0x328] sm:$0xf] }
 0x146   :  { %v3824_v61 = vadd.f32 %v3823_v9, %v3811_v20  ;;  %v7027_v57 = vld [vmem:[#allocation5 + $0x14] sm:$0xf0]  ;;  %v5131_v6 = vor.u32 %v7095_v36, %v5130_v22  ;;  %v4986_v62 = vld [vmem:[#allocation5 + $0x108] sm:$0xf]  ;;  %v5259_v51 = vor.u32 %v7127_v55, %v5258_v13 }
 0x147   :  { %4102 = vmatpush.bf16.msra.mxu3 %v5323_v12  ;;  %v3836_v19 = vpop.f32.mrf.mxu2  ;;  %v4858_v12 = vld [vmem:[#allocation5 + $0x8] sm:$0xf]  ;;  %v7091_v11 = vld [vmem:[#allocation5 + $0x214] sm:$0xf0] }
 0x148   :  { %4064 = vmatpush.bf16.msra.mxu0 %v4923_v14  ;;  %v3837_v4 = vadd.f32 %v3836_v19, %v3824_v61  ;;  %v7059_v14 = vld [vmem:[#allocation5 + $0x114] sm:$0xf0]  ;;  %v5242_v3 = vld [vmem:[#allocation5 + $0x308] sm:$0xf]  ;;  %v4859_v8 = vor.u32 %v7027_v57, %v4858_v12 }
 0x149   :  { %4077 = vmatpush.bf16.msra.mxu1 %v5051_v40  ;;  %4090 = vmatpush.bf16.msra.mxu2 %v5179_v0  ;;  %v5114_v40 = vld [vmem:[#allocation5 + $0x208] sm:$0xf]  ;;  %v7183_v7 = vld [vmem:[#allocation5 + $0x4f4] sm:$0xf0]  ;;  %v4987_v2 = vor.u32 %v7059_v14, %v4986_v62 }
 0x14a   :  { %v5482_v34 = vld [vmem:[#allocation5 + $0x4e8] sm:$0xf]  ;;  %v7215_v46 = vld [vmem:[#allocation5 + $0x5f4] sm:$0xf0]  ;;  %v5115_v42 = vor.u32 %v7091_v11, %v5114_v40 }
 0x14b   :  { %4103 = vmatpush.bf16.msra.mxu3 %v5307_v38  ;;  %v3812_v0 = vpop.f32.mrf.mxu0  ;;  %v7123_v38 = vld [vmem:[#allocation5 + $0x314] sm:$0xf0]  ;;  %v5610_v17 = vld [vmem:[#allocation5 + $0x5e8] sm:$0xf]  ;;  %v5483_v24 = vor.u32 %v7183_v7, %v5482_v34 }
 0x14c   :  { %4065 = vmatpush.bf16.msra.mxu0 %v4907_v48  ;;  %v5738_v48 = vld [vmem:[#allocation5 + $0x6e8] sm:$0xf]  ;;  %v7247_v59 = vld [vmem:[#allocation5 + $0x6f4] sm:$0xf0]  ;;  %v5243_v50 = vor.u32 %v7123_v38, %v5242_v3  ;;  %v5611_v1 = vor.u32 %v7215_v46, %v5610_v17 }
 0x14d   :  { %4078 = vmatpush.bf16.msra.mxu1 %v5035_v37  ;;  %4091 = vmatpush.bf16.msra.mxu2 %v5163_v35  ;;  %v3825_v37 = vpop.f32.mrf.mxu1  ;;  %v3849_v35 = vpop.f32.mrf.mxu3  ;;  %v5866_v25 = vld [vmem:[#allocation5 + $0x7e8] sm:$0xf]  ;;  %v7279_v20 = vld [vmem:[#allocation5 + $0x7f4] sm:$0xf0]  ;;  %v5739_v21 = vor.u32 %v7247_v59, %v5738_v48  ;;  %v7581_v59 = vld [vmem:[#allocation7] sm:$0xf] }
 0x14e   :  { %v5466_v60 = vld [vmem:[#allocation5 + $0x4c8] sm:$0xf]  ;;  %v7179_v9 = vld [vmem:[#allocation5 + $0x4d4] sm:$0xf0]  ;;  %v5867_v61 = vor.u32 %v7279_v20, %v5866_v25  ;;  %v965_v37 = vperm.slane %v7581_v59, 1 }
 0x14f   :  { %4104 = vmatpush.bf16.msra.mxu3 %v5291_v43  ;;  %v8530_v43 = vadd.f32 %v3849_v35, %v3837_v4  ;;  %v7243_v47 = vld [vmem:[#allocation5 + $0x6d4] sm:$0xf0]  ;;  %v3838_v18 = vpop.f32.mrf.mxu2  ;;  %v5850_v28 = vld [vmem:[#allocation5 + $0x7c8] sm:$0xf]  ;;  %v5467_v23 = vor.u32 %v7179_v9, %v5466_v60 }
 0x150   :  { %4066 = vmatpush.bf16.msra.mxu0 %v4891_v41  ;;  %v5594_v41 = vld [vmem:[#allocation5 + $0x5c8] sm:$0xf]  ;;  %v7175_v55 = vld [vmem:[#allocation5 + $0x4b4] sm:$0xf0] }
 0x151   :  { %4079 = vmatpush.bf16.msra.mxu1 %v5019_v10  ;;  %4092 = vmatpush.bf16.msra.mxu2 %v5147_v31  ;;  %v7211_v10 = vld [vmem:[#allocation5 + $0x5d4] sm:$0xf0]  ;;  %v5722_v31 = vld [vmem:[#allocation5 + $0x6c8] sm:$0xf] }
 0x152   :  { %v5595_v22 = vor.u32 %v7211_v10, %v5594_v41  ;;  %v5723_v36 = vor.u32 %v7243_v47, %v5722_v31  ;;  %v5450_v13 = vld [vmem:[#allocation5 + $0x4a8] sm:$0xf]  ;;  %v7207_v12 = vld [vmem:[#allocation5 + $0x5b4] sm:$0xf0] }
 0x153   :  { %4105 = vmatpush.bf16.msra.mxu3 %v5275_v58  ;;  %v7275_v58 = vld [vmem:[#allocation5 + $0x7d4] sm:$0xf0]  ;;  %v5578_v19 = vld [vmem:[#allocation5 + $0x5a8] sm:$0xf]  ;;  %v5451_v14 = vor.u32 %v7175_v55, %v5450_v13 }
 0x154   :  { %4067 = vmatpush.bf16.msra.mxu0 %v4875_v33  ;;  %v5851_v33 = vor.u32 %v7275_v58, %v5850_v28  ;;  %v5706_v57 = vld [vmem:[#allocation5 + $0x6a8] sm:$0xf]  ;;  %v7239_v4 = vld [vmem:[#allocation5 + $0x6b4] sm:$0xf0]  ;;  %v5579_v40 = vor.u32 %v7207_v12, %v5578_v19 }
 0x155   :  { %4080 = vmatpush.bf16.msra.mxu1 %v5003_v5  ;;  %4093 = vmatpush.bf16.msra.mxu2 %v5131_v6  ;;  %v5834_v5 = vld [vmem:[#allocation5 + $0x7a8] sm:$0xf]  ;;  %v7271_v6 = vld [vmem:[#allocation5 + $0x7b4] sm:$0xf0]  ;;  %v3851_v62 = vpop.f32.mrf.mxu3  ;;  %v5707_v0 = vor.u32 %v7239_v4, %v5706_v57 }
 0x156   :  { %v7171_v11 = vld [vmem:[#allocation5 + $0x494] sm:$0xf0]  ;;  %v5562_v3 = vld [vmem:[#allocation5 + $0x588] sm:$0xf]  ;;  %v5835_v38 = vor.u32 %v7271_v6, %v5834_v5 }
 0x157   :  { %4106 = vmatpush.bf16.msra.mxu3 %v5259_v51  ;;  %v5434_v51 = vld [vmem:[#allocation5 + $0x488] sm:$0xf]  ;;  %v7203_v34 = vld [vmem:[#allocation5 + $0x594] sm:$0xf0] }
 0x158   :  { %4068 = vmatpush.bf16.msra.mxu0 %v4859_v8  ;;  %v5690_v7 = vld [vmem:[#allocation5 + $0x688] sm:$0xf]  ;;  %v7235_v17 = vld [vmem:[#allocation5 + $0x694] sm:$0xf0]  ;;  %v5435_v48 = vor.u32 %v7171_v11, %v5434_v51  ;;  %v5563_v35 = vor.u32 %v7203_v34, %v5562_v3 }
 0x159   :  { %4081 = vmatpush.bf16.msra.mxu1 %v4987_v2  ;;  %4094 = vmatpush.bf16.msra.mxu2 %v5115_v42  ;;  %v5818_v8 = vld [vmem:[#allocation5 + $0x788] sm:$0xf]  ;;  %v7267_v46 = vld [vmem:[#allocation5 + $0x794] sm:$0xf0]  ;;  %v5691_v2 = vor.u32 %v7235_v17, %v5690_v7 }
 0x15a   :  { %v5418_v42 = vld [vmem:[#allocation5 + $0x468] sm:$0xf]  ;;  %v7167_v25 = vld [vmem:[#allocation5 + $0x474] sm:$0xf0] }
 0x15b   :  { %4107 = vmatpush.bf16.msra.mxu3 %v5243_v50  ;;  %4069 = vmatmul.bf16.vlgmr.msra.gmra.mxu0 %v8676_v63  ;;  %v5546_v20 = vld [vmem:[#allocation5 + $0x568] sm:$0xf]  ;;  %v5819_v50 = vor.u32 %v7267_v46, %v5818_v8  ;;  %v3875_v60 = vpop.f32.mrf.mxu1  ;;  %v7263_v41 = vld [vmem:[#allocation5 + $0x774] sm:$0xf0]  ;;  %v5419_v10 = vor.u32 %v7167_v25, %v5418_v42 }
 0x15c   :  { %4113 = vmatpush.bf16.msrb.mxu0 %v5483_v24  ;;  %4095 = vmatmul.bf16.vlgmr.msra.gmra.mxu2 %v8051_v53  ;;  %v7199_v24 = vld [vmem:[#allocation5 + $0x574] sm:$0xf0]  ;;  %v5802_v9 = vld [vmem:[#allocation5 + $0x768] sm:$0xf] }
 0x15d   :  { %4126 = vmatpush.bf16.msrb.mxu1 %v5611_v1  ;;  %4139 = vmatpush.bf16.msrb.mxu2 %v5739_v21  ;;  %v5674_v1 = vld [vmem:[#allocation5 + $0x668] sm:$0xf]  ;;  %v7231_v21 = vld [vmem:[#allocation5 + $0x674] sm:$0xf0]  ;;  %v5547_v47 = vor.u32 %v7199_v24, %v5546_v20 }
 0x15e   :  { %4108 = vmatmul.bf16.vlgmr.msra.gmra.mxu3 %v8677_v49  ;;  %4082 = vmatmul.bf16.vlgmr.msra.gmra.mxu1 %v8090_v29  ;;  %v5675_v18 = vor.u32 %v7231_v21, %v5674_v1  ;;  %v5402_v28 = vld [vmem:[#allocation5 + $0x448] sm:$0xf]  ;;  %v7163_v58 = vld [vmem:[#allocation5 + $0x454] sm:$0xf0] }
 0x15f   :  { %4152 = vmatpush.bf16.msrb.mxu3 %v5867_v61  ;;  %v3862_v61 = vpop.f32.mrf.mxu0  ;;  %v5658_v13 = vld [vmem:[#allocation5 + $0x648] sm:$0xf]  ;;  %v7227_v55 = vld [vmem:[#allocation5 + $0x654] sm:$0xf0]  ;;  %v3888_v57 = vpop.f32.mrf.mxu2  ;;  %v5403_v4 = vor.u32 %v7163_v58, %v5402_v28 }
 0x160   :  { %4114 = vmatpush.bf16.msrb.mxu0 %v5467_v23  ;;  %v3863_v31 = vadd.f32 %v3862_v61, %v965_v37  ;;  %v5530_v23 = vld [vmem:[#allocation5 + $0x548] sm:$0xf]  ;;  %v7259_v12 = vld [vmem:[#allocation5 + $0x754] sm:$0xf0]  ;;  %v5659_v62 = vor.u32 %v7227_v55, %v5658_v13 }
 0x161   :  { %4127 = vmatpush.bf16.msrb.mxu1 %v5595_v22  ;;  %4140 = vmatpush.bf16.msrb.mxu2 %v5723_v36  ;;  %v5803_v22 = vor.u32 %v7263_v41, %v5802_v9  ;;  %v7195_v36 = vld [vmem:[#allocation5 + $0x554] sm:$0xf0]  ;;  %v5642_v3 = vld [vmem:[#allocation5 + $0x628] sm:$0xf] }
 0x162   :  { %v3876_v19 = vadd.f32 %v3875_v60, %v3863_v31  ;;  %v5531_v6 = vor.u32 %v7195_v36, %v5530_v23  ;;  %v7191_v11 = vld [vmem:[#allocation5 + $0x534] sm:$0xf0]  ;;  %v5770_v17 = vld [vmem:[#allocation5 + $0x728] sm:$0xf] }
 0x163   :  { %4153 = vmatpush.bf16.msrb.mxu3 %v5851_v33  ;;  %v5786_v33 = vld [vmem:[#allocation5 + $0x748] sm:$0xf]  ;;  %v3901_v34 = vpop.f32.mrf.mxu3  ;;  %v3877_v7 = vpop.f32.mrf.mxu1  ;;  %v7255_v8 = vld [vmem:[#allocation5 + $0x734] sm:$0xf0] }
 0x164   :  { %4115 = vmatpush.bf16.msrb.mxu0 %v5451_v14  ;;  %v3889_v5 = vadd.f32 %v3888_v57, %v3876_v19  ;;  %v5386_v14 = vld [vmem:[#allocation5 + $0x428] sm:$0xf]  ;;  %v5787_v51 = vor.u32 %v7259_v12, %v5786_v33  ;;  %v7187_v20 = vld [vmem:[#allocation5 + $0x514] sm:$0xf0]  ;;  %v5771_v24 = vor.u32 %v7255_v8, %v5770_v17 }
 0x165   :  { %4128 = vmatpush.bf16.msrb.mxu1 %v5579_v40  ;;  %4141 = vmatpush.bf16.msrb.mxu2 %v5707_v0  ;;  %v7159_v40 = vld [vmem:[#allocation5 + $0x434] sm:$0xf0]  ;;  %v5514_v0 = vld [vmem:[#allocation5 + $0x528] sm:$0xf] }
 0x166   :  { %v8536_v46 = vadd.f32 %v3901_v34, %v3889_v5  ;;  %v5387_v59 = vor.u32 %v7159_v40, %v5386_v14  ;;  %v5370_v37 = vld [vmem:[#allocation5 + $0x408] sm:$0xf]  ;;  %v7219_v1 = vld [vmem:[#allocation5 + $0x614] sm:$0xf0] }
 0x167   :  { %4154 = vmatpush.bf16.msrb.mxu3 %v5835_v38  ;;  %v7223_v38 = vld [vmem:[#allocation5 + $0x634] sm:$0xf0]  ;;  %v5498_v25 = vld [vmem:[#allocation5 + $0x508] sm:$0xf] }
 0x168   :  { %4116 = vmatpush.bf16.msrb.mxu0 %v5435_v48  ;;  %v3864_v48 = vpop.f32.mrf.mxu0  ;;  %v5643_v42 = vor.u32 %v7223_v38, %v5642_v3  ;;  %v5754_v21 = vld [vmem:[#allocation5 + $0x708] sm:$0xf]  ;;  %v7251_v60 = vld [vmem:[#allocation5 + $0x714] sm:$0xf0]  ;;  %v5499_v58 = vor.u32 %v7187_v20, %v5498_v25 }
 0x169   :  { %4129 = vmatpush.bf16.msrb.mxu1 %v5563_v35  ;;  %4142 = vmatpush.bf16.msrb.mxu2 %v5691_v2  ;;  %v7155_v35 = vld [vmem:[#allocation5 + $0x414] sm:$0xf0]  ;;  %v5515_v2 = vor.u32 %v7191_v11, %v5514_v0  ;;  %v5994_v9 = vld [vmem:[#allocation5 + $0x8e8] sm:$0xf]  ;;  %v5755_v13 = vor.u32 %v7251_v60, %v5754_v21 }
 0x16a   :  { %v7311_v41 = vld [vmem:[#allocation5 + $0x8f4] sm:$0xf0]  ;;  %v6122_v61 = vld [vmem:[#allocation5 + $0x9e8] sm:$0xf]  ;;  %v5371_v31 = vor.u32 %v7155_v35, %v5370_v37 }
 0x16b   :  { %4155 = vmatpush.bf16.msrb.mxu3 %v5819_v50  ;;  %v5626_v50 = vld [vmem:[#allocation5 + $0x608] sm:$0xf]  ;;  %v7375_v28 = vld [vmem:[#allocation5 + $0xaf4] sm:$0xf0]  ;;  %v5995_v55 = vor.u32 %v7311_v41, %v5994_v9  ;;  %v3903_v19 = vpop.f32.mrf.mxu3 }
 0x16c   :  { %4117 = vmatpush.bf16.msrb.mxu0 %v5419_v10  ;;  %v3890_v10 = vpop.f32.mrf.mxu2  ;;  %v5627_v23 = vor.u32 %v7219_v1, %v5626_v50  ;;  %v7407_v36 = vld [vmem:[#allocation5 + $0xbf4] sm:$0xf0]  ;;  %v5978_v57 = vld [vmem:[#allocation5 + $0x8c8] sm:$0xf] }
 0x16d   :  { %4130 = vmatpush.bf16.msrb.mxu1 %v5547_v47  ;;  %4143 = vmatpush.bf16.msrb.mxu2 %v5675_v18  ;;  %v7343_v47 = vld [vmem:[#allocation5 + $0x9f4] sm:$0xf0]  ;;  %v6250_v18 = vld [vmem:[#allocation5 + $0xae8] sm:$0xf] }
 0x16e   :  { %v6123_v33 = vor.u32 %v7343_v47, %v6122_v61  ;;  %v6251_v12 = vor.u32 %v7375_v28, %v6250_v18  ;;  %v6106_v5 = vld [vmem:[#allocation5 + $0x9c8] sm:$0xf]  ;;  %v7371_v40 = vld [vmem:[#allocation5 + $0xad4] sm:$0xf0] }
 0x16f   :  { %4156 = vmatpush.bf16.msrb.mxu3 %v5803_v22  ;;  %v6378_v22 = vld [vmem:[#allocation5 + $0xbe8] sm:$0xf]  ;;  %v7303_v7 = vld [vmem:[#allocation5 + $0x8b4] sm:$0xf0] }
 0x170   :  { %4118 = vmatpush.bf16.msrb.mxu0 %v5403_v4  ;;  %v7307_v4 = vld [vmem:[#allocation5 + $0x8d4] sm:$0xf0]  ;;  %v6234_v14 = vld [vmem:[#allocation5 + $0xac8] sm:$0xf] }
 0x171   :  { %4131 = vmatpush.bf16.msrb.mxu1 %v5531_v6  ;;  %4144 = vmatpush.bf16.msrb.mxu2 %v5659_v62  ;;  %v6379_v6 = vor.u32 %v7407_v36, %v6378_v22  ;;  %v7339_v62 = vld [vmem:[#allocation5 + $0x9d4] sm:$0xf0]  ;;  %v6362_v0 = vld [vmem:[#allocation5 + $0xbc8] sm:$0xf]  ;;  %v5979_v11 = vor.u32 %v7307_v4, %v5978_v57  ;;  %v6235_v38 = vor.u32 %v7371_v40, %v6234_v14 }
 0x172   :  { %v6107_v3 = vor.u32 %v7339_v62, %v6106_v5  ;;  %v5962_v34 = vld [vmem:[#allocation5 + $0x8a8] sm:$0xf]  ;;  %v7335_v48 = vld [vmem:[#allocation5 + $0x9b4] sm:$0xf0] }
 0x173   :  { %4157 = vmatpush.bf16.msrb.mxu3 %v5787_v51  ;;  %v7403_v51 = vld [vmem:[#allocation5 + $0xbd4] sm:$0xf0]  ;;  %v6090_v17 = vld [vmem:[#allocation5 + $0x9a8] sm:$0xf] }
 0x174   :  { %4119 = vmatpush.bf16.msrb.mxu0 %v5387_v59  ;;  %v6363_v8 = vor.u32 %v7403_v51, %v6362_v0  ;;  %v6218_v59 = vld [vmem:[#allocation5 + $0xaa8] sm:$0xf]  ;;  %v7367_v37 = vld [vmem:[#allocation5 + $0xab4] sm:$0xf0]  ;;  %v6091_v25 = vor.u32 %v7335_v48, %v6090_v17 }
 0x175   :  { %4132 = vmatpush.bf16.msrb.mxu1 %v5515_v2  ;;  %4145 = vmatpush.bf16.msrb.mxu2 %v5643_v42  ;;  %v6346_v35 = vld [vmem:[#allocation5 + $0xba8] sm:$0xf]  ;;  %v7399_v2 = vld [vmem:[#allocation5 + $0xbb4] sm:$0xf0]  ;;  %v5963_v42 = vor.u32 %v7303_v7, %v5962_v34  ;;  %v6219_v20 = vor.u32 %v7367_v37, %v6218_v59 }
 0x176   :  { %v5946_v50 = vld [vmem:[#allocation5 + $0x888] sm:$0xf]  ;;  %v6347_v21 = vor.u32 %v7399_v2, %v6346_v35  ;;  %v7331_v60 = vld [vmem:[#allocation5 + $0x994] sm:$0xf0] }
 0x177   :  { %4158 = vmatpush.bf16.msrb.mxu3 %v5771_v24  ;;  %v7299_v24 = vld [vmem:[#allocation5 + $0x894] sm:$0xf0]  ;;  %v6074_v1 = vld [vmem:[#allocation5 + $0x988] sm:$0xf] }
 0x178   :  { %4120 = vmatpush.bf16.msrb.mxu0 %v5371_v31  ;;  %v6202_v9 = vld [vmem:[#allocation5 + $0xa88] sm:$0xf]  ;;  %v7363_v41 = vld [vmem:[#allocation5 + $0xa94] sm:$0xf0]  ;;  %v5947_v31 = vor.u32 %v7299_v24, %v5946_v50  ;;  %v6075_v47 = vor.u32 %v7331_v60, %v6074_v1 }
 0x179   :  { %4133 = vmatpush.bf16.msrb.mxu1 %v5499_v58  ;;  %4146 = vmatpush.bf16.msrb.mxu2 %v5627_v23  ;;  %v6330_v61 = vld [vmem:[#allocation5 + $0xb88] sm:$0xf]  ;;  %v7395_v10 = vld [vmem:[#allocation5 + $0xb94] sm:$0xf0]  ;;  %v6203_v18 = vor.u32 %v7363_v41, %v6202_v9 }
 0x17a   :  { %v5930_v28 = vld [vmem:[#allocation5 + $0x868] sm:$0xf]  ;;  %v7295_v58 = vld [vmem:[#allocation5 + $0x874] sm:$0xf0]  ;;  %v6331_v36 = vor.u32 %v7395_v10, %v6330_v61 }
 0x17b   :  { %4159 = vmatpush.bf16.msrb.mxu3 %v5755_v13  ;;  %4121 = vmatmul.bf16.vlgmr.msrb.gmra.mxu0 %v8680_v45  ;;  %v6058_v23 = vld [vmem:[#allocation5 + $0x968] sm:$0xf]  ;;  %v3927_v22 = vpop.f32.mrf.mxu1  ;;  %v7327_v13 = vld [vmem:[#allocation5 + $0x974] sm:$0xf0]  ;;  %v5931_v5 = vor.u32 %v7295_v58, %v5930_v28 }
 0x17c   :  { %4165 = vmatpush.bf16.msra.mxu0 %v5995_v55  ;;  %4147 = vmatmul.bf16.vlgmr.msrb.gmra.mxu2 %v8678_v15  ;;  %v6186_v55 = vld [vmem:[#allocation5 + $0xa68] sm:$0xf]  ;;  %v7359_v19 = vld [vmem:[#allocation5 + $0xa74] sm:$0xf0] }
 0x17d   :  { %4178 = vmatpush.bf16.msra.mxu1 %v6123_v33  ;;  %4191 = vmatpush.bf16.msra.mxu2 %v6251_v12  ;;  %v3914_v33 = vpop.f32.mrf.mxu0  ;;  %v6314_v12 = vld [vmem:[#allocation5 + $0xb68] sm:$0xf]  ;;  %v7391_v57 = vld [vmem:[#allocation5 + $0xb74] sm:$0xf0]  ;;  %v6187_v62 = vor.u32 %v7359_v19, %v6186_v55 }
 0x17e   :  { %4160 = vmatmul.bf16.vlgmr.msrb.gmra.mxu3 %v8681_v52  ;;  %4134 = vmatmul.bf16.vlgmr.msrb.gmra.mxu1 %v8679_v30  ;;  %v3915_v4 = vadd.f32 %v3914_v33, %v8536_v46  ;;  %v5914_v14 = vld [vmem:[#allocation5 + $0x848] sm:$0xf]  ;;  %v7291_v40 = vld [vmem:[#allocation5 + $0x854] sm:$0xf0] }
 0x17f   :  { %4204 = vmatpush.bf16.msra.mxu3 %v6379_v6  ;;  %v6059_v6 = vor.u32 %v7327_v13, %v6058_v23  ;;  %v6042_v0 = vld [vmem:[#allocation5 + $0x948] sm:$0xf]  ;;  %v7355_v34 = vld [vmem:[#allocation5 + $0xa54] sm:$0xf0]  ;;  %v3940_v7 = vpop.f32.mrf.mxu2  ;;  %v5915_v46 = vor.u32 %v7291_v40, %v5914_v14 }
 0x180   :  { %4166 = vmatpush.bf16.msra.mxu0 %v5979_v11  ;;  %v3928_v51 = vadd.f32 %v3927_v22, %v3915_v4  ;;  %v6315_v11 = vor.u32 %v7391_v57, %v6314_v12  ;;  %v6298_v17 = vld [vmem:[#allocation5 + $0xb48] sm:$0xf]  ;;  %v7287_v2 = vld [vmem:[#allocation5 + $0x834] sm:$0xf0] }
 0x181   :  { %4179 = vmatpush.bf16.msra.mxu1 %v6107_v3  ;;  %4192 = vmatpush.bf16.msra.mxu2 %v6235_v38  ;;  %v7323_v3 = vld [vmem:[#allocation5 + $0x954] sm:$0xf0]  ;;  %v6170_v38 = vld [vmem:[#allocation5 + $0xa48] sm:$0xf] }
 0x182   :  { %v3941_v48 = vadd.f32 %v3940_v7, %v3928_v51  ;;  %v6043_v59 = vor.u32 %v7323_v3, %v6042_v0  ;;  %v6171_v37 = vor.u32 %v7355_v34, %v6170_v38  ;;  %v5898_v35 = vld [vmem:[#allocation5 + $0x828] sm:$0xf]  ;;  %v7319_v24 = vld [vmem:[#allocation5 + $0x934] sm:$0xf0] }
 0x183   :  { %4205 = vmatpush.bf16.msra.mxu3 %v6363_v8  ;;  %v7387_v8 = vld [vmem:[#allocation5 + $0xb54] sm:$0xf0]  ;;  %v6154_v1 = vld [vmem:[#allocation5 + $0xa28] sm:$0xf]  ;;  %v5899_v10 = vor.u32 %v7287_v2, %v5898_v35 }
 0x184   :  { %4167 = vmatpush.bf16.msra.mxu0 %v5963_v42  ;;  %v6026_v42 = vld [vmem:[#allocation5 + $0x928] sm:$0xf]  ;;  %v6299_v50 = vor.u32 %v7387_v8, %v6298_v17  ;;  %v7383_v61 = vld [vmem:[#allocation5 + $0xb34] sm:$0xf0] }
 0x185   :  { %4180 = vmatpush.bf16.msra.mxu1 %v6091_v25  ;;  %4193 = vmatpush.bf16.msra.mxu2 %v6219_v20  ;;  %v3953_v25 = vpop.f32.mrf.mxu3  ;;  %v3929_v20 = vpop.f32.mrf.mxu1  ;;  %v6282_v41 = vld [vmem:[#allocation5 + $0xb28] sm:$0xf]  ;;  %v7315_v23 = vld [vmem:[#allocation5 + $0x914] sm:$0xf0] }
 0x186   :  { %v8543_v60 = vadd.f32 %v3953_v25, %v3941_v48  ;;  %v3916_v9 = vpop.f32.mrf.mxu0  ;;  %v6010_v58 = vld [vmem:[#allocation5 + $0x908] sm:$0xf]  ;;  %v7347_v13 = vld [vmem:[#allocation5 + $0xa14] sm:$0xf0] }
 0x187   :  { %4206 = vmatpush.bf16.msra.mxu3 %v6347_v21  ;;  %v7351_v21 = vld [vmem:[#allocation5 + $0xa34] sm:$0xf0]  ;;  %v6138_v22 = vld [vmem:[#allocation5 + $0xa08] sm:$0xf]  ;;  %v3942_v33 = vpop.f32.mrf.mxu2  ;;  %v6011_v40 = vor.u32 %v7315_v23, %v6010_v58 }
 0x188   :  { %4168 = vmatpush.bf16.msra.mxu0 %v5947_v31  ;;  %v5882_v31 = vld [vmem:[#allocation5 + $0x808] sm:$0xf]  ;;  %v6155_v28 = vor.u32 %v7351_v21, %v6154_v1  ;;  %v7379_v19 = vld [vmem:[#allocation5 + $0xb14] sm:$0xf0]  ;;  %v6139_v0 = vor.u32 %v7347_v13, %v6138_v22 }
 0x189   :  { %4181 = vmatpush.bf16.msra.mxu1 %v6075_v47  ;;  %4194 = vmatpush.bf16.msra.mxu2 %v6203_v18  ;;  %v7283_v47 = vld [vmem:[#allocation5 + $0x814] sm:$0xf0]  ;;  %v6027_v18 = vor.u32 %v7319_v24, %v6026_v42  ;;  %v6266_v55 = vld [vmem:[#allocation5 + $0xb08] sm:$0xf] }
 0x18a   :  { %v6506_v12 = vld [vmem:[#allocation5 + $0xce8] sm:$0xf]  ;;  %v7439_v57 = vld [vmem:[#allocation5 + $0xcf4] sm:$0xf0]  ;;  %v6267_v38 = vor.u32 %v7379_v19, %v6266_v55 }
 0x18b   :  { %4207 = vmatpush.bf16.msra.mxu3 %v6331_v36  ;;  %v6283_v36 = vor.u32 %v7383_v61, %v6282_v41  ;;  %v6634_v4 = vld [vmem:[#allocation5 + $0xde8] sm:$0xf]  ;;  %v7503_v14 = vld [vmem:[#allocation5 + $0xef4] sm:$0xf0]  ;;  %v6507_v34 = vor.u32 %v7439_v57, %v6506_v12 }
 0x18c   :  { %4169 = vmatpush.bf16.msra.mxu0 %v5931_v5  ;;  %v5883_v5 = vor.u32 %v7283_v47, %v5882_v31  ;;  %v6890_v51 = vld [vmem:[#allocation5 + $0xfe8] sm:$0xf]  ;;  %v7435_v48 = vld [vmem:[#allocation5 + $0xcd4] sm:$0xf0] }
 0x18d   :  { %4182 = vmatpush.bf16.msra.mxu1 %v6059_v6  ;;  %4195 = vmatpush.bf16.msra.mxu2 %v6187_v62  ;;  %v7471_v6 = vld [vmem:[#allocation5 + $0xdf4] sm:$0xf0]  ;;  %v6762_v62 = vld [vmem:[#allocation5 + $0xee8] sm:$0xf]  ;;  %v3955_v3 = vpop.f32.mrf.mxu3 }
 0x18e   :  { %v6635_v7 = vor.u32 %v7471_v6, %v6634_v4  ;;  %v6763_v17 = vor.u32 %v7503_v14, %v6762_v62  ;;  %v6490_v8 = vld [vmem:[#allocation5 + $0xcc8] sm:$0xf]  ;;  %v7499_v2 = vld [vmem:[#allocation5 + $0xed4] sm:$0xf0] }
 0x18f   :  { %4208 = vmatpush.bf16.msra.mxu3 %v6315_v11  ;;  %v7535_v11 = vld [vmem:[#allocation5 + $0xff4] sm:$0xf0]  ;;  %v6746_v35 = vld [vmem:[#allocation5 + $0xec8] sm:$0xf]  ;;  %v6491_v20 = vor.u32 %v7435_v48, %v6490_v8 }
 0x190   :  { %4170 = vmatpush.bf16.msra.mxu0 %v5915_v46  ;;  %v6618_v46 = vld [vmem:[#allocation5 + $0xdc8] sm:$0xf]  ;;  %v7531_v25 = vld [vmem:[#allocation5 + $0xfd4] sm:$0xf0]  ;;  %v6747_v24 = vor.u32 %v7499_v2, %v6746_v35 }
 0x191   :  { %4183 = vmatpush.bf16.msra.mxu1 %v6043_v59  ;;  %4196 = vmatpush.bf16.msra.mxu2 %v6171_v37  ;;  %v6891_v59 = vor.u32 %v7535_v11, %v6890_v51  ;;  %v7467_v37 = vld [vmem:[#allocation5 + $0xdd4] sm:$0xf0]  ;;  %v6874_v42 = vld [vmem:[#allocation5 + $0xfc8] sm:$0xf] }
 0x192   :  { %v6474_v1 = vld [vmem:[#allocation5 + $0xca8] sm:$0xf]  ;;  %v7431_v21 = vld [vmem:[#allocation5 + $0xcb4] sm:$0xf0]  ;;  %v6875_v41 = vor.u32 %v7531_v25, %v6874_v42 }
 0x193   :  { %4209 = vmatpush.bf16.msra.mxu3 %v6299_v50  ;;  %v6619_v50 = vor.u32 %v7467_v37, %v6618_v46  ;;  %v6602_v9 = vld [vmem:[#allocation5 + $0xda8] sm:$0xf]  ;;  %v7463_v61 = vld [vmem:[#allocation5 + $0xdb4] sm:$0xf0] }
 0x194   :  { %4171 = vmatpush.bf16.msra.mxu0 %v5899_v10  ;;  %v6730_v10 = vld [vmem:[#allocation5 + $0xea8] sm:$0xf]  ;;  %v7495_v31 = vld [vmem:[#allocation5 + $0xeb4] sm:$0xf0]  ;;  %v6603_v58 = vor.u32 %v7463_v61, %v6602_v9 }
 0x195   :  { %4184 = vmatpush.bf16.msra.mxu1 %v6027_v18  ;;  %4197 = vmatpush.bf16.msra.mxu2 %v6155_v28  ;;  %v6858_v47 = vld [vmem:[#allocation5 + $0xfa8] sm:$0xf]  ;;  %v7527_v18 = vld [vmem:[#allocation5 + $0xfb4] sm:$0xf0]  ;;  %v6475_v28 = vor.u32 %v7431_v21, %v6474_v1  ;;  %v6731_v23 = vor.u32 %v7495_v31, %v6730_v10 }
 0x196   :  { %v6458_v22 = vld [vmem:[#allocation5 + $0xc88] sm:$0xf]  ;;  %v6859_v55 = vor.u32 %v7527_v18, %v6858_v47  ;;  %v7459_v19 = vld [vmem:[#allocation5 + $0xd94] sm:$0xf0] }
 0x197   :  { %4210 = vmatpush.bf16.msra.mxu3 %v6283_v36  ;;  %v7427_v36 = vld [vmem:[#allocation5 + $0xc94] sm:$0xf0]  ;;  %v6586_v13 = vld [vmem:[#allocation5 + $0xd88] sm:$0xf] }
 0x198   :  { %4172 = vmatpush.bf16.msra.mxu0 %v5883_v5  ;;  %v6714_v33 = vld [vmem:[#allocation5 + $0xe88] sm:$0xf]  ;;  %v7491_v12 = vld [vmem:[#allocation5 + $0xe94] sm:$0xf0]  ;;  %v3966_v57 = vpop.f32.mrf.mxu0  ;;  %v6459_v62 = vor.u32 %v7427_v36, %v6458_v22 }
 0x199   :  { %4185 = vmatpush.bf16.msra.mxu1 %v6011_v40  ;;  %4198 = vmatpush.bf16.msra.mxu2 %v6139_v0  ;;  %v6842_v4 = vld [vmem:[#allocation5 + $0xf88] sm:$0xf]  ;;  %v7523_v5 = vld [vmem:[#allocation5 + $0xf94] sm:$0xf0]  ;;  %v3967_v6 = vadd.f32 %v3966_v57, %v8543_v60  ;;  %v6587_v40 = vor.u32 %v7459_v19, %v6586_v13  ;;  %v6715_v0 = vor.u32 %v7491_v12, %v6714_v33 }
 0x19a   :  { %v6442_v51 = vld [vmem:[#allocation5 + $0xc68] sm:$0xf]  ;;  %v7423_v11 = vld [vmem:[#allocation5 + $0xc74] sm:$0xf0] }
 0x19b   :  { %4211 = vmatpush.bf16.msra.mxu3 %v6267_v38  ;;  %4173 = vmatmul.bf16.vlgmr.msra.gmra.mxu0 %v8682_v56  ;;  %v3979_v14 = vpop.f32.mrf.mxu1  ;;  %v6570_v3 = vld [vmem:[#allocation5 + $0xd68] sm:$0xf]  ;;  %v6843_v38 = vor.u32 %v7523_v5, %v6842_v4  ;;  %v7487_v8 = vld [vmem:[#allocation5 + $0xe74] sm:$0xf0] }
 0x19c   :  { %4217 = vmatpush.bf16.msrb.mxu0 %v6507_v34  ;;  %4199 = vmatmul.bf16.vlgmr.msra.gmra.mxu2 %v8683_v16  ;;  %v3980_v34 = vadd.f32 %v3979_v14, %v3967_v6  ;;  %v6826_v48 = vld [vmem:[#allocation5 + $0xf68] sm:$0xf]  ;;  %v7519_v46 = vld [vmem:[#allocation5 + $0xf74] sm:$0xf0] }
 0x19d   :  { %4230 = vmatpush.bf16.msrb.mxu1 %v6635_v7  ;;  %4243 = vmatpush.bf16.msrb.mxu2 %v6763_v17  ;;  %v7455_v7 = vld [vmem:[#allocation5 + $0xd74] sm:$0xf0]  ;;  %v6698_v17 = vld [vmem:[#allocation5 + $0xe68] sm:$0xf]  ;;  %v6827_v25 = vor.u32 %v7519_v46, %v6826_v48  ;;  %v7085_v48 = vld [vmem:[#allocation5 + $0x1ec] sm:$0xf] }
 0x19e   :  { %4186 = vmatmul.bf16.vlgmr.msra.gmra.mxu1 %v8684_v54  ;;  %4212 = vmatmul.bf16.vlgmr.msra.gmra.mxu3 %v8685_v26  ;;  %v6571_v60 = vor.u32 %v7455_v7, %v6570_v3  ;;  %v6699_v37 = vor.u32 %v7487_v8, %v6698_v17  ;;  %v6426_v35 = vld [vmem:[#allocation5 + $0xc48] sm:$0xf]  ;;  %v7419_v2 = vld [vmem:[#allocation5 + $0xc54] sm:$0xf0]  ;;  %v7053_v17 = vld [vmem:[#allocation5 + $0xec] sm:$0xf] }
 0x19f   :  { %4256 = vmatpush.bf16.msrb.mxu3 %v6891_v59  ;;  %v6443_v59 = vor.u32 %v7423_v11, %v6442_v51  ;;  %v6554_v42 = vld [vmem:[#allocation5 + $0xd48] sm:$0xf]  ;;  %v7483_v1 = vld [vmem:[#allocation5 + $0xe54] sm:$0xf0]  ;;  %v6427_v31 = vor.u32 %v7419_v2, %v6426_v35  ;;  %v4972_v8 = vld [vmem:[#allocation5 + $0xf8] sm:$0xf0] }
 0x1a0   :  { %4218 = vmatpush.bf16.msrb.mxu0 %v6491_v20  ;;  %v3992_v20 = vpop.f32.mrf.mxu2  ;;  %v7515_v61 = vld [vmem:[#allocation5 + $0xf54] sm:$0xf0]  ;;  %v3968_v10 = vpop.f32.mrf.mxu0  ;;  %v6538_v36 = vld [vmem:[#allocation5 + $0xd28] sm:$0xf]  ;;  %v5228_v35 = vld [vmem:[#allocation5 + $0x2f8] sm:$0xf0] }
 0x1a1   :  { %4231 = vmatpush.bf16.msrb.mxu1 %v6619_v50  ;;  %4244 = vmatpush.bf16.msrb.mxu2 %v6747_v24  ;;  %v7451_v50 = vld [vmem:[#allocation5 + $0xd54] sm:$0xf0]  ;;  %v6682_v24 = vld [vmem:[#allocation5 + $0xe48] sm:$0xf]  ;;  %v3993_v21 = vadd.f32 %v3992_v20, %v3980_v34  ;;  %v4005_v9 = vpop.f32.mrf.mxu3  ;;  %v5356_v20 = vld [vmem:[#allocation5 + $0x3f8] sm:$0xf0] }
 0x1a2   :  { %v7415_v22 = vld [vmem:[#allocation5 + $0xc34] sm:$0xf0]  ;;  %v6666_v19 = vld [vmem:[#allocation5 + $0xe28] sm:$0xf] }
 0x1a3   :  { %4257 = vmatpush.bf16.msrb.mxu3 %v6875_v41  ;;  %v6810_v41 = vld [vmem:[#allocation5 + $0xf48] sm:$0xf]  ;;  %v3981_v47 = vpop.f32.mrf.mxu1  ;;  %v8550_v18 = vadd.f32 %v4005_v9, %v3993_v21  ;;  %v7479_v33 = vld [vmem:[#allocation5 + $0xe34] sm:$0xf0]  ;;  %v7049_v9 = vld [vmem:[#allocation5 + $0xcc] sm:$0xf] }
 0x1a4   :  { %4219 = vmatpush.bf16.msrb.mxu0 %v6475_v28  ;;  %v6555_v28 = vor.u32 %v7451_v50, %v6554_v42  ;;  %v6811_v13 = vor.u32 %v7515_v61, %v6810_v41  ;;  %v6794_v12 = vld [vmem:[#allocation5 + $0xf28] sm:$0xf]  ;;  %v7511_v57 = vld [vmem:[#allocation5 + $0xf34] sm:$0xf0]  ;;  %v6667_v14 = vor.u32 %v7479_v33, %v6666_v19  ;;  %v4956_v41 = vld [vmem:[#allocation5 + $0xd8] sm:$0xf0] }
 0x1a5   :  { %4232 = vmatpush.bf16.msrb.mxu1 %v6603_v58  ;;  %4245 = vmatpush.bf16.msrb.mxu2 %v6731_v23  ;;  %v6683_v58 = vor.u32 %v7483_v1, %v6682_v24  ;;  %v6410_v23 = vld [vmem:[#allocation5 + $0xc28] sm:$0xf]  ;;  %v7411_v6 = vld [vmem:[#allocation5 + $0xc14] sm:$0xf0]  ;;  %v6795_v11 = vor.u32 %v7511_v57, %v6794_v12  ;;  %v4975_v24 = vor.u32 %v7053_v17, %v4972_v8  ;;  %v7081_v61 = vld [vmem:[#allocation5 + $0x1cc] sm:$0xf] }
 0x1a6   :  { %v6411_v4 = vor.u32 %v7415_v22, %v6410_v23  ;;  %v6394_v5 = vld [vmem:[#allocation5 + $0xc08] sm:$0xf]  ;;  %v7475_v3 = vld [vmem:[#allocation5 + $0xe14] sm:$0xf0]  ;;  %v7113_v47 = vld [vmem:[#allocation5 + $0x2cc] sm:$0xf]  ;;  %v4959_v22 = vor.u32 %v7049_v9, %v4956_v41 }
 0x1a7   :  { %4258 = vmatpush.bf16.msrb.mxu3 %v6859_v55  ;;  %v7447_v55 = vld [vmem:[#allocation5 + $0xd34] sm:$0xf0]  ;;  %v6650_v51 = vld [vmem:[#allocation5 + $0xe08] sm:$0xf]  ;;  %v5340_v23 = vld [vmem:[#allocation5 + $0x3d8] sm:$0xf0] }
 0x1a8   :  { %4220 = vmatpush.bf16.msrb.mxu0 %v6459_v62  ;;  %v6539_v62 = vor.u32 %v7447_v55, %v6538_v36  ;;  %v7507_v34 = vld [vmem:[#allocation5 + $0xf14] sm:$0xf0]  ;;  %v3994_v7 = vpop.f32.mrf.mxu2  ;;  %v6651_v42 = vor.u32 %v7475_v3, %v6650_v51  ;;  %v7045_v55 = vld [vmem:[#allocation5 + $0xac] sm:$0xf]  ;;  %v4940_v19 = vld [vmem:[#allocation5 + $0xb8] sm:$0xf0] }
 0x1a9   :  { %4233 = vmatpush.bf16.msrb.mxu1 %v6587_v40  ;;  %4246 = vmatpush.bf16.msrb.mxu2 %v6715_v0  ;;  %v6522_v40 = vld [vmem:[#allocation5 + $0xd08] sm:$0xf]  ;;  %v7443_v0 = vld [vmem:[#allocation5 + $0xd14] sm:$0xf0]  ;;  %v4007_v46 = vpop.f32.mrf.mxu3  ;;  %v7077_v33 = vld [vmem:[#allocation5 + $0x1ac] sm:$0xf] }
 0x1aa   :  { %v6523_v2 = vor.u32 %v7443_v0, %v6522_v40  ;;  %v5068_v57 = vld [vmem:[#allocation5 + $0x1b8] sm:$0xf0]  ;;  %v7041_v51 = vld [vmem:[#allocation5 + $0x8c] sm:$0xf] }
 0x1ab   :  { %4259 = vmatpush.bf16.msrb.mxu3 %v6843_v38  ;;  %v6778_v38 = vld [vmem:[#allocation5 + $0xf08] sm:$0xf]  ;;  %v5071_v40 = vor.u32 %v7077_v33, %v5068_v57  ;;  %v7073_v3 = vld [vmem:[#allocation5 + $0x18c] sm:$0xf]  ;;  %v5180_v17 = vld [vmem:[#allocation5 + $0x298] sm:$0xf0] }
 0x1ac   :  { %4221 = vmatpush.bf16.msrb.mxu0 %v6443_v59  ;;  %v6395_v59 = vor.u32 %v7411_v6, %v6394_v5  ;;  %v6779_v50 = vor.u32 %v7507_v34, %v6778_v38  ;;  %v5196_v5 = vld [vmem:[#allocation5 + $0x2b8] sm:$0xf0]  ;;  %v7141_v6 = vld [vmem:[#allocation5 + $0x3ac] sm:$0xf] }
 0x1ad   :  { %4234 = vmatpush.bf16.msrb.mxu1 %v6571_v60  ;;  %4247 = vmatpush.bf16.msrb.mxu2 %v6699_v37  ;;  %v5100_v60 = vld [vmem:[#allocation5 + $0x1f8] sm:$0xf0]  ;;  %v7117_v37 = vld [vmem:[#allocation5 + $0x2ec] sm:$0xf] }
 0x1ae   :  { %v5103_v1 = vor.u32 %v7085_v48, %v5100_v60  ;;  %v5231_v21 = vor.u32 %v7117_v37, %v5228_v35  ;;  %v5052_v34 = vld [vmem:[#allocation5 + $0x198] sm:$0xf0]  ;;  %v7105_v7 = vld [vmem:[#allocation5 + $0x28c] sm:$0xf] }
 0x1af   :  { %4260 = vmatpush.bf16.msrb.mxu3 %v6827_v25  ;;  %v7149_v25 = vld [vmem:[#allocation5 + $0x3ec] sm:$0xf]  ;;  %v5308_v46 = vld [vmem:[#allocation5 + $0x398] sm:$0xf0]  ;;  %v5055_v35 = vor.u32 %v7073_v3, %v5052_v34 }
 0x1b0   :  { %4222 = vmatpush.bf16.msrb.mxu0 %v6427_v31  ;;  %v5359_v10 = vor.u32 %v7149_v25, %v5356_v20  ;;  %v5084_v31 = vld [vmem:[#allocation5 + $0x1d8] sm:$0xf0]  ;;  %v7137_v48 = vld [vmem:[#allocation5 + $0x38c] sm:$0xf] }
 0x1b1   :  { %4235 = vmatpush.bf16.msrb.mxu1 %v6555_v28  ;;  %4248 = vmatpush.bf16.msrb.mxu2 %v6683_v58  ;;  %v5212_v28 = vld [vmem:[#allocation5 + $0x2d8] sm:$0xf0]  ;;  %v7145_v58 = vld [vmem:[#allocation5 + $0x3cc] sm:$0xf]  ;;  %v5087_v36 = vor.u32 %v7081_v61, %v5084_v31 }
 0x1b2   :  { %v5343_v12 = vor.u32 %v7145_v58, %v5340_v23  ;;  %v4908_v25 = vld [vmem:[#allocation5 + $0x78] sm:$0xf0]  ;;  %v7069_v20 = vld [vmem:[#allocation5 + $0x16c] sm:$0xf] }
 0x1b3   :  { %4261 = vmatpush.bf16.msrb.mxu3 %v6811_v13  ;;  %v5215_v13 = vor.u32 %v7113_v47, %v5212_v28  ;;  %v5164_v9 = vld [vmem:[#allocation5 + $0x278] sm:$0xf0]  ;;  %v7133_v41 = vld [vmem:[#allocation5 + $0x36c] sm:$0xf] }
 0x1b4   :  { %4223 = vmatpush.bf16.msrb.mxu0 %v6411_v4  ;;  %v7109_v4 = vld [vmem:[#allocation5 + $0x2ac] sm:$0xf]  ;;  %v5292_v61 = vld [vmem:[#allocation5 + $0x378] sm:$0xf0] }
 0x1b5   :  { %4236 = vmatpush.bf16.msrb.mxu1 %v6539_v62  ;;  %4249 = vmatpush.bf16.msrb.mxu2 %v6667_v14  ;;  %v5324_v62 = vld [vmem:[#allocation5 + $0x3b8] sm:$0xf0]  ;;  %v4943_v14 = vor.u32 %v7045_v55, %v4940_v19  ;;  %v5199_v0 = vor.u32 %v7109_v4, %v5196_v5  ;;  %v7033_v47 = vld [vmem:[#allocation5 + $0x4c] sm:$0xf]  ;;  %v5295_v23 = vor.u32 %v7133_v41, %v5292_v61 }
 0x1b6   :  { %v5327_v38 = vor.u32 %v7141_v6, %v5324_v62  ;;  %v4892_v28 = vld [vmem:[#allocation5 + $0x58] sm:$0xf0]  ;;  %v7065_v58 = vld [vmem:[#allocation5 + $0x14c] sm:$0xf] }
 0x1b7   :  { %4262 = vmatpush.bf16.msrb.mxu3 %v6795_v11  ;;  %v4924_v11 = vld [vmem:[#allocation5 + $0x98] sm:$0xf0]  ;;  %v4895_v5 = vor.u32 %v7033_v47, %v4892_v28  ;;  %v7093_v34 = vld [vmem:[#allocation5 + $0x22c] sm:$0xf] }
 0x1b8   :  { %4224 = vmatpush.bf16.msrb.mxu0 %v6395_v59  ;;  %v4018_v8 = vpop.f32.mrf.mxu0  ;;  %v4927_v60 = vor.u32 %v7041_v51, %v4924_v11  ;;  %v5148_v55 = vld [vmem:[#allocation5 + $0x258] sm:$0xf0]  ;;  %v7061_v11 = vld [vmem:[#allocation5 + $0x12c] sm:$0xf] }
 0x1b9   :  { %4237 = vmatpush.bf16.msrb.mxu1 %v6523_v2  ;;  %4250 = vmatpush.bf16.msrb.mxu2 %v6651_v42  ;;  %v4019_v59 = vadd.f32 %v4018_v8, %v8550_v18  ;;  %v5183_v2 = vor.u32 %v7105_v7, %v5180_v17  ;;  %v7037_v42 = vld [vmem:[#allocation5 + $0x6c] sm:$0xf]  ;;  %v5276_v57 = vld [vmem:[#allocation5 + $0x358] sm:$0xf0] }
 0x1ba   :  { %v4876_v51 = vld [vmem:[#allocation5 + $0x38] sm:$0xf0]  ;;  %v7125_v17 = vld [vmem:[#allocation5 + $0x32c] sm:$0xf] }
 0x1bb   :  { %4263 = vmatpush.bf16.msrb.mxu3 %v6779_v50  ;;  %4225 = vmatmul.bf16.vlgmr.msrb.gmra.mxu0 %v8490_v39  ;;  %v4031_v37 = vpop.f32.mrf.mxu1  ;;  %v5311_v50 = vor.u32 %v7137_v48, %v5308_v46  ;;  %v5132_v7 = vld [vmem:[#allocation5 + $0x238] sm:$0xf0]  ;;  %v7025_v46 = vld [vmem:[#allocation5 + $0xc] sm:$0xf] }
 0x1bc   :  { %4269 = vmatpush.bf16.msra.mxu0 %v4975_v24  ;;  %4251 = vmatmul.bf16.vlgmr.msrb.gmra.mxu2 %v8493_v32  ;;  %v4032_v24 = vadd.f32 %v4031_v37, %v4019_v59  ;;  %v5260_v8 = vld [vmem:[#allocation5 + $0x338] sm:$0xf0]  ;;  %v5135_v37 = vor.u32 %v7093_v34, %v5132_v7  ;;  %v7213_v41 = vld [vmem:[#allocation5 + $0x5ec] sm:$0xf] }
 0x1bd   :  { %4282 = vmatpush.bf16.msra.mxu1 %v5103_v1  ;;  %4295 = vmatpush.bf16.msra.mxu2 %v5231_v21  ;;  %v5036_v1 = vld [vmem:[#allocation5 + $0x178] sm:$0xf0]  ;;  %v7101_v21 = vld [vmem:[#allocation5 + $0x26c] sm:$0xf] }
 0x1be   :  { %4238 = vmatmul.bf16.vlgmr.msrb.gmra.mxu1 %v8498_v27  ;;  %4264 = vmatmul.bf16.vlgmr.msrb.gmra.mxu3 %v8502_v44  ;;  %v5039_v18 = vor.u32 %v7069_v20, %v5036_v1  ;;  %v5167_v31 = vor.u32 %v7101_v21, %v5164_v9  ;;  %v4860_v59 = vld [vmem:[#allocation5 + $0x18] sm:$0xf0]  ;;  %v7181_v21 = vld [vmem:[#allocation5 + $0x4ec] sm:$0xf] }
 0x1bf   :  { %4308 = vmatpush.bf16.msra.mxu3 %v5359_v10  ;;  %v4911_v10 = vor.u32 %v7037_v42, %v4908_v25  ;;  %v7089_v42 = vld [vmem:[#allocation5 + $0x20c] sm:$0xf]  ;;  %v5263_v25 = vor.u32 %v7125_v17, %v5260_v8  ;;  %v5116_v20 = vld [vmem:[#allocation5 + $0x218] sm:$0xf0] }
 0x1c0   :  { %4270 = vmatpush.bf16.msra.mxu0 %v4959_v22  ;;  %v4044_v22 = vpop.f32.mrf.mxu2  ;;  %v4020_v4 = vpop.f32.mrf.mxu0  ;;  %v5484_v9 = vld [vmem:[#allocation5 + $0x4f8] sm:$0xf0]  ;;  %v7205_v7 = vld [vmem:[#allocation5 + $0x5ac] sm:$0xf] }
 0x1c1   :  { %4283 = vmatpush.bf16.msra.mxu1 %v5087_v36  ;;  %4296 = vmatpush.bf16.msra.mxu2 %v5215_v13  ;;  %v5020_v36 = vld [vmem:[#allocation5 + $0x158] sm:$0xf0]  ;;  %v7097_v13 = vld [vmem:[#allocation5 + $0x24c] sm:$0xf]  ;;  %v4045_v19 = vadd.f32 %v4044_v22, %v4032_v24  ;;  %v4057_v33 = vpop.f32.mrf.mxu3 }
 0x1c2   :  { %v5244_v24 = vld [vmem:[#allocation5 + $0x318] sm:$0xf0] }
 0x1c3   :  { %4309 = vmatpush.bf16.msra.mxu3 %v5343_v12  ;;  %v7129_v12 = vld [vmem:[#allocation5 + $0x34c] sm:$0xf]  ;;  %v4033_v6 = vpop.f32.mrf.mxu1  ;;  %v8557_v62 = vadd.f32 %v4057_v33, %v4045_v19  ;;  %v5740_v47 = vld [vmem:[#allocation5 + $0x6f8] sm:$0xf0] }
 0x1c4   :  { %4271 = vmatpush.bf16.msra.mxu0 %v4943_v14  ;;  %v5023_v14 = vor.u32 %v7065_v58, %v5020_v36  ;;  %v5279_v3 = vor.u32 %v7129_v12, %v5276_v57  ;;  %v5119_v58 = vor.u32 %v7089_v42, %v5116_v20  ;;  %v5868_v22 = vld [vmem:[#allocation5 + $0x7f8] sm:$0xf0]  ;;  %v7177_v33 = vld [vmem:[#allocation5 + $0x4cc] sm:$0xf] }
 0x1c5   :  { %4284 = vmatpush.bf16.msra.mxu1 %v5071_v40  ;;  %4297 = vmatpush.bf16.msra.mxu2 %v5199_v0  ;;  %v5151_v40 = vor.u32 %v7097_v13, %v5148_v55  ;;  %v7029_v0 = vld [vmem:[#allocation5 + $0x2c] sm:$0xf]  ;;  %v5487_v13 = vor.u32 %v7181_v21, %v5484_v9  ;;  %v5468_v12 = vld [vmem:[#allocation5 + $0x4d8] sm:$0xf0] }
 0x1c6   :  { %v4879_v48 = vor.u32 %v7029_v0, %v4876_v51  ;;  %v7209_v57 = vld [vmem:[#allocation5 + $0x5cc] sm:$0xf]  ;;  %v5852_v0 = vld [vmem:[#allocation5 + $0x7d8] sm:$0xf0]  ;;  %v5471_v51 = vor.u32 %v7177_v33, %v5468_v12 }
 0x1c7   :  { %4310 = vmatpush.bf16.msra.mxu3 %v5327_v38  ;;  %v5004_v38 = vld [vmem:[#allocation5 + $0x138] sm:$0xf0]  ;;  %v7241_v6 = vld [vmem:[#allocation5 + $0x6cc] sm:$0xf] }
 0x1c8   :  { %4272 = vmatpush.bf16.msra.mxu0 %v4927_v60  ;;  %v5007_v60 = vor.u32 %v7061_v11, %v5004_v38  ;;  %v4046_v1 = vpop.f32.mrf.mxu2  ;;  %v7173_v38 = vld [vmem:[#allocation5 + $0x4ac] sm:$0xf]  ;;  %v5452_v34 = vld [vmem:[#allocation5 + $0x4b8] sm:$0xf0] }
 0x1c9   :  { %4285 = vmatpush.bf16.msra.mxu1 %v5055_v35  ;;  %4298 = vmatpush.bf16.msra.mxu2 %v5183_v2  ;;  %v7057_v35 = vld [vmem:[#allocation5 + $0x10c] sm:$0xf]  ;;  %v4988_v2 = vld [vmem:[#allocation5 + $0x118] sm:$0xf0]  ;;  %v4059_v61 = vpop.f32.mrf.mxu3 }
 0x1ca   :  { %v4991_v28 = vor.u32 %v7057_v35, %v4988_v2  ;;  %v5580_v8 = vld [vmem:[#allocation5 + $0x5b8] sm:$0xf0]  ;;  %v7169_v35 = vld [vmem:[#allocation5 + $0x48c] sm:$0xf] }
 0x1cb   :  { %4311 = vmatpush.bf16.msra.mxu3 %v5311_v50  ;;  %v7121_v50 = vld [vmem:[#allocation5 + $0x30c] sm:$0xf]  ;;  %v5583_v2 = vor.u32 %v7205_v7, %v5580_v8  ;;  %v5820_v9 = vld [vmem:[#allocation5 + $0x798] sm:$0xf0] }
 0x1cc   :  { %4273 = vmatpush.bf16.msra.mxu0 %v4911_v10  ;;  %v4863_v10 = vor.u32 %v7025_v46, %v4860_v59  ;;  %v5247_v36 = vor.u32 %v7121_v50, %v5244_v24  ;;  %v5708_v46 = vld [vmem:[#allocation5 + $0x6b8] sm:$0xf0]  ;;  %v7269_v59 = vld [vmem:[#allocation5 + $0x7ac] sm:$0xf]  ;;  %v8563_v50 = vld [vmem:[#allocation7] sm:$0xf] }
 0x1cd   :  { %4286 = vmatpush.bf16.msra.mxu1 %v5039_v18  ;;  %4299 = vmatpush.bf16.msra.mxu2 %v5167_v31  ;;  %v5612_v18 = vld [vmem:[#allocation5 + $0x5f8] sm:$0xf0]  ;;  %v7245_v31 = vld [vmem:[#allocation5 + $0x6ec] sm:$0xf] }
 0x1ce   :  { %v5615_v55 = vor.u32 %v7213_v41, %v5612_v18  ;;  %v5743_v19 = vor.u32 %v7245_v31, %v5740_v47  ;;  %v7201_v20 = vld [vmem:[#allocation5 + $0x58c] sm:$0xf]  ;;  %v5420_v31 = vld [vmem:[#allocation5 + $0x478] sm:$0xf0] }
 0x1cf   :  { %4312 = vmatpush.bf16.msra.mxu3 %v5295_v23  ;;  %v7277_v23 = vld [vmem:[#allocation5 + $0x7ec] sm:$0xf] }
 0x1d0   :  { %4274 = vmatpush.bf16.msra.mxu0 %v4895_v5  ;;  %v5871_v4 = vor.u32 %v7277_v23, %v5868_v22  ;;  %v5596_v5 = vld [vmem:[#allocation5 + $0x5d8] sm:$0xf0]  ;;  %v7233_v1 = vld [vmem:[#allocation5 + $0x68c] sm:$0xf] }
 0x1d1   :  { %4287 = vmatpush.bf16.msra.mxu1 %v5023_v14  ;;  %4300 = vmatpush.bf16.msra.mxu2 %v5151_v40  ;;  %v5724_v14 = vld [vmem:[#allocation5 + $0x6d8] sm:$0xf0]  ;;  %v7273_v40 = vld [vmem:[#allocation5 + $0x7cc] sm:$0xf]  ;;  %v5599_v11 = vor.u32 %v7209_v57, %v5596_v5 }
 0x1d2   :  { %v5855_v17 = vor.u32 %v7273_v40, %v5852_v0  ;;  %v7265_v21 = vld [vmem:[#allocation5 + $0x78c] sm:$0xf]  ;;  %v5548_v22 = vld [vmem:[#allocation5 + $0x578] sm:$0xf0] }
 0x1d3   :  { %4313 = vmatpush.bf16.msra.mxu3 %v5279_v3  ;;  %v5727_v3 = vor.u32 %v7241_v6, %v5724_v14  ;;  %v7165_v18 = vld [vmem:[#allocation5 + $0x46c] sm:$0xf]  ;;  %v5823_v23 = vor.u32 %v7265_v21, %v5820_v9  ;;  %v5404_v6 = vld [vmem:[#allocation5 + $0x458] sm:$0xf0] }
 0x1d4   :  { %4275 = vmatpush.bf16.msra.mxu0 %v4879_v48  ;;  %v7237_v48 = vld [vmem:[#allocation5 + $0x6ac] sm:$0xf]  ;;  %v5423_v12 = vor.u32 %v7165_v18, %v5420_v31  ;;  %v5372_v9 = vld [vmem:[#allocation5 + $0x418] sm:$0xf0] }
 0x1d5   :  { %4288 = vmatpush.bf16.msra.mxu1 %v5007_v60  ;;  %4301 = vmatpush.bf16.msra.mxu2 %v5135_v37  ;;  %v5836_v60 = vld [vmem:[#allocation5 + $0x7b8] sm:$0xf0]  ;;  %v5455_v37 = vor.u32 %v7173_v38, %v5452_v34  ;;  %v5711_v42 = vor.u32 %v7237_v48, %v5708_v46  ;;  %v7197_v47 = vld [vmem:[#allocation5 + $0x56c] sm:$0xf] }
 0x1d6   :  { %v5839_v24 = vor.u32 %v7269_v59, %v5836_v60  ;;  %v5551_v57 = vor.u32 %v7197_v47, %v5548_v22  ;;  %v7161_v5 = vld [vmem:[#allocation5 + $0x44c] sm:$0xf] }
 0x1d7   :  { %4314 = vmatpush.bf16.msra.mxu3 %v5263_v25  ;;  %v5436_v25 = vld [vmem:[#allocation5 + $0x498] sm:$0xf0]  ;;  %v7193_v14 = vld [vmem:[#allocation5 + $0x54c] sm:$0xf]  ;;  %v5407_v8 = vor.u32 %v7161_v5, %v5404_v6 }
 0x1d8   :  { %4276 = vmatpush.bf16.msra.mxu0 %v4863_v10  ;;  %v5439_v41 = vor.u32 %v7169_v35, %v5436_v25  ;;  %v7257_v7 = vld [vmem:[#allocation5 + $0x74c] sm:$0xf]  ;;  %v5388_v35 = vld [vmem:[#allocation5 + $0x438] sm:$0xf0] }
 0x1d9   :  { %4289 = vmatpush.bf16.msra.mxu1 %v4991_v28  ;;  %4302 = vmatpush.bf16.msra.mxu2 %v5119_v58  ;;  %v7153_v21 = vld [vmem:[#allocation5 + $0x40c] sm:$0xf] }
 0x1da   :  { %v7217_v18 = vld [vmem:[#allocation5 + $0x60c] sm:$0xf] }
 0x1db   :  { %4315 = vmatpush.bf16.msra.mxu3 %v5247_v36  ;;  %4277 = vmatmul.bf16.vlgmr.msra.gmra.mxu0 %v8676_v63  ;;  %v5564_v63 = vld [vmem:[#allocation5 + $0x598] sm:$0xf0]  ;;  %v4083_v58 = vpop.f32.mrf.mxu1  ;;  %v7229_v36 = vld [vmem:[#allocation5 + $0x66c] sm:$0xf] }
 0x1dc   :  { %4321 = vmatpush.bf16.msrb.mxu0 %v5487_v13  ;;  %4303 = vmatmul.bf16.vlgmr.msra.gmra.mxu2 %v8051_v53  ;;  %v966_v53 = vperm.slane %v8563_v50, 2  ;;  %v5567_v61 = vor.u32 %v7201_v20, %v5564_v63  ;;  %v5676_v13 = vld [vmem:[#allocation5 + $0x678] sm:$0xf0]  ;;  %v7253_v63 = vld [vmem:[#allocation5 + $0x72c] sm:$0xf] }
 0x1dd   :  { %4334 = vmatpush.bf16.msrb.mxu1 %v5615_v55  ;;  %4347 = vmatpush.bf16.msrb.mxu2 %v5743_v19  ;;  %v7261_v55 = vld [vmem:[#allocation5 + $0x76c] sm:$0xf]  ;;  %v5804_v19 = vld [vmem:[#allocation5 + $0x778] sm:$0xf0] }
 0x1de   :  { %4316 = vmatmul.bf16.vlgmr.msra.gmra.mxu3 %v8677_v49  ;;  %4290 = vmatmul.bf16.vlgmr.msra.gmra.mxu1 %v8090_v29  ;;  %v5692_v49 = vld [vmem:[#allocation5 + $0x698] sm:$0xf0]  ;;  %v4070_v29 = vpop.f32.mrf.mxu0  ;;  %v5807_v0 = vor.u32 %v7261_v55, %v5804_v19  ;;  %v7341_v55 = vld [vmem:[#allocation5 + $0x9ec] sm:$0xf]  ;;  %v5375_v19 = vor.u32 %v7153_v21, %v5372_v9 }
 0x1df   :  { %4360 = vmatpush.bf16.msrb.mxu3 %v5871_v4  ;;  %v5695_v10 = vor.u32 %v7233_v1, %v5692_v49  ;;  %v4071_v28 = vadd.f32 %v4070_v29, %v966_v53  ;;  %v5679_v4 = vor.u32 %v7229_v36, %v5676_v13  ;;  %v4096_v40 = vpop.f32.mrf.mxu2  ;;  %v5516_v20 = vld [vmem:[#allocation5 + $0x538] sm:$0xf0]  ;;  %v7221_v53 = vld [vmem:[#allocation5 + $0x62c] sm:$0xf] }
 0x1e0   :  { %4322 = vmatpush.bf16.msrb.mxu0 %v5471_v51  ;;  %v5532_v51 = vld [vmem:[#allocation5 + $0x558] sm:$0xf0]  ;;  %v7309_v36 = vld [vmem:[#allocation5 + $0x8ec] sm:$0xf] }
 0x1e1   :  { %4335 = vmatpush.bf16.msrb.mxu1 %v5599_v11  ;;  %4348 = vmatpush.bf16.msrb.mxu2 %v5727_v3  ;;  %v4084_v33 = vadd.f32 %v4083_v58, %v4071_v28  ;;  %v7225_v11 = vld [vmem:[#allocation5 + $0x64c] sm:$0xf]  ;;  %v5660_v3 = vld [vmem:[#allocation5 + $0x658] sm:$0xf0]  ;;  %v4109_v34 = vpop.f32.mrf.mxu3  ;;  %v5535_v59 = vor.u32 %v7193_v14, %v5532_v51 }
 0x1e2   :  { %v5663_v60 = vor.u32 %v7225_v11, %v5660_v3  ;;  %v5772_v1 = vld [vmem:[#allocation5 + $0x738] sm:$0xf0]  ;;  %v7249_v58 = vld [vmem:[#allocation5 + $0x70c] sm:$0xf] }
 0x1e3   :  { %4361 = vmatpush.bf16.msrb.mxu3 %v5855_v17  ;;  %v4097_v38 = vadd.f32 %v4096_v40, %v4084_v33  ;;  %v5788_v17 = vld [vmem:[#allocation5 + $0x758] sm:$0xf0]  ;;  %v5775_v47 = vor.u32 %v7253_v63, %v5772_v1  ;;  %v7405_v6 = vld [vmem:[#allocation5 + $0xbec] sm:$0xf] }
 0x1e4   :  { %4323 = vmatpush.bf16.msrb.mxu0 %v5455_v37  ;;  %v7157_v37 = vld [vmem:[#allocation5 + $0x42c] sm:$0xf]  ;;  %v5791_v25 = vor.u32 %v7257_v7, %v5788_v17  ;;  %v5628_v28 = vld [vmem:[#allocation5 + $0x618] sm:$0xf0] }
 0x1e5   :  { %4336 = vmatpush.bf16.msrb.mxu1 %v5583_v2  ;;  %4349 = vmatpush.bf16.msrb.mxu2 %v5711_v42  ;;  %v8566_v48 = vadd.f32 %v4109_v34, %v4097_v38  ;;  %v7189_v2 = vld [vmem:[#allocation5 + $0x52c] sm:$0xf]  ;;  %v4085_v42 = vpop.f32.mrf.mxu1  ;;  %v5391_v49 = vor.u32 %v7157_v37, %v5388_v35  ;;  %v5996_v13 = vld [vmem:[#allocation5 + $0x8f8] sm:$0xf0]  ;;  %v5631_v5 = vor.u32 %v7217_v18, %v5628_v28 }
 0x1e6   :  { %v4072_v46 = vpop.f32.mrf.mxu0  ;;  %v6124_v33 = vld [vmem:[#allocation5 + $0x9f8] sm:$0xf0]  ;;  %v7305_v3 = vld [vmem:[#allocation5 + $0x8cc] sm:$0xf] }
 0x1e7   :  { %4362 = vmatpush.bf16.msrb.mxu3 %v5839_v24  ;;  %v5644_v24 = vld [vmem:[#allocation5 + $0x638] sm:$0xf0]  ;;  %v4098_v31 = vpop.f32.mrf.mxu2  ;;  %v6127_v51 = vor.u32 %v7341_v55, %v6124_v33  ;;  %v7337_v34 = vld [vmem:[#allocation5 + $0x9cc] sm:$0xf] }
 0x1e8   :  { %4324 = vmatpush.bf16.msrb.mxu0 %v5439_v41  ;;  %v5519_v41 = vor.u32 %v7189_v2, %v5516_v20  ;;  %v5647_v29 = vor.u32 %v7221_v53, %v5644_v24  ;;  %v6380_v14 = vld [vmem:[#allocation5 + $0xbf8] sm:$0xf0]  ;;  %v7301_v42 = vld [vmem:[#allocation5 + $0x8ac] sm:$0xf] }
 0x1e9   :  { %4337 = vmatpush.bf16.msrb.mxu1 %v5567_v61  ;;  %4350 = vmatpush.bf16.msrb.mxu2 %v5695_v10  ;;  %v7185_v61 = vld [vmem:[#allocation5 + $0x50c] sm:$0xf]  ;;  %v5500_v10 = vld [vmem:[#allocation5 + $0x518] sm:$0xf0]  ;;  %v4111_v22 = vpop.f32.mrf.mxu3  ;;  %v6383_v7 = vor.u32 %v7405_v6, %v6380_v14 }
 0x1ea   :  { %v5980_v38 = vld [vmem:[#allocation5 + $0x8d8] sm:$0xf0]  ;;  %v7333_v20 = vld [vmem:[#allocation5 + $0x9ac] sm:$0xf] }
 0x1eb   :  { %4363 = vmatpush.bf16.msrb.mxu3 %v5823_v23  ;;  %v5756_v23 = vld [vmem:[#allocation5 + $0x718] sm:$0xf0]  ;;  %v5983_v37 = vor.u32 %v7305_v3, %v5980_v38  ;;  %v7365_v63 = vld [vmem:[#allocation5 + $0xaac] sm:$0xf] }
 0x1ec   :  { %4325 = vmatpush.bf16.msrb.mxu0 %v5423_v12  ;;  %v7373_v12 = vld [vmem:[#allocation5 + $0xaec] sm:$0xf]  ;;  %v5759_v40 = vor.u32 %v7249_v58, %v5756_v23  ;;  %v6108_v17 = vld [vmem:[#allocation5 + $0x9d8] sm:$0xf0] }
 0x1ed   :  { %4338 = vmatpush.bf16.msrb.mxu1 %v5551_v57  ;;  %4351 = vmatpush.bf16.msrb.mxu2 %v5679_v4  ;;  %v6252_v57 = vld [vmem:[#allocation5 + $0xaf8] sm:$0xf0]  ;;  %v5503_v4 = vor.u32 %v7185_v61, %v5500_v10  ;;  %v6111_v35 = vor.u32 %v7337_v34, %v6108_v17  ;;  %v7297_v61 = vld [vmem:[#allocation5 + $0x88c] sm:$0xf] }
 0x1ee   :  { %v6255_v11 = vor.u32 %v7373_v12, %v6252_v57  ;;  %v6236_v46 = vld [vmem:[#allocation5 + $0xad8] sm:$0xf0]  ;;  %v7393_v58 = vld [vmem:[#allocation5 + $0xb8c] sm:$0xf] }
 0x1ef   :  { %4364 = vmatpush.bf16.msrb.mxu3 %v5807_v0  ;;  %v5999_v0 = vor.u32 %v7309_v36, %v5996_v13  ;;  %v6092_v24 = vld [vmem:[#allocation5 + $0x9b8] sm:$0xf0]  ;;  %v7293_v36 = vld [vmem:[#allocation5 + $0x86c] sm:$0xf] }
 0x1f0   :  { %4326 = vmatpush.bf16.msrb.mxu0 %v5407_v8  ;;  %v7369_v8 = vld [vmem:[#allocation5 + $0xacc] sm:$0xf]  ;;  %v6220_v1 = vld [vmem:[#allocation5 + $0xab8] sm:$0xf0] }
 0x1f1   :  { %4339 = vmatpush.bf16.msrb.mxu1 %v5535_v59  ;;  %4352 = vmatpush.bf16.msrb.mxu2 %v5663_v60  ;;  %v7401_v59 = vld [vmem:[#allocation5 + $0xbcc] sm:$0xf]  ;;  %v6364_v60 = vld [vmem:[#allocation5 + $0xbd8] sm:$0xf0]  ;;  %v6239_v2 = vor.u32 %v7369_v8, %v6236_v46 }
 0x1f2   :  { %v6367_v53 = vor.u32 %v7401_v59, %v6364_v60  ;;  %v6348_v21 = vld [vmem:[#allocation5 + $0xbb8] sm:$0xf0]  ;;  %v7325_v55 = vld [vmem:[#allocation5 + $0x96c] sm:$0xf] }
 0x1f3   :  { %4365 = vmatpush.bf16.msrb.mxu3 %v5791_v25  ;;  %v5964_v25 = vld [vmem:[#allocation5 + $0x8b8] sm:$0xf0]  ;;  %v7357_v57 = vld [vmem:[#allocation5 + $0xa6c] sm:$0xf] }
 0x1f4   :  { %4327 = vmatpush.bf16.msrb.mxu0 %v5391_v49  ;;  %v7397_v49 = vld [vmem:[#allocation5 + $0xbac] sm:$0xf]  ;;  %v5967_v9 = vor.u32 %v7301_v42, %v5964_v25  ;;  %v5948_v10 = vld [vmem:[#allocation5 + $0x898] sm:$0xf0] }
 0x1f5   :  { %4340 = vmatpush.bf16.msrb.mxu1 %v5519_v41  ;;  %4353 = vmatpush.bf16.msrb.mxu2 %v5647_v29  ;;  %v6095_v41 = vor.u32 %v7333_v20, %v6092_v24  ;;  %v6223_v29 = vor.u32 %v7365_v63, %v6220_v1  ;;  %v6351_v18 = vor.u32 %v7397_v49, %v6348_v21  ;;  %v6076_v31 = vld [vmem:[#allocation5 + $0x998] sm:$0xf0]  ;;  %v7321_v3 = vld [vmem:[#allocation5 + $0x94c] sm:$0xf] }
 0x1f6   :  { %v6204_v28 = vld [vmem:[#allocation5 + $0xa98] sm:$0xf0]  ;;  %v7353_v17 = vld [vmem:[#allocation5 + $0xa4c] sm:$0xf] }
 0x1f7   :  { %4366 = vmatpush.bf16.msrb.mxu3 %v5775_v47  ;;  %v7361_v47 = vld [vmem:[#allocation5 + $0xa8c] sm:$0xf]  ;;  %v5932_v13 = vld [vmem:[#allocation5 + $0x878] sm:$0xf0] }
 0x1f8   :  { %4328 = vmatpush.bf16.msrb.mxu0 %v5375_v19  ;;  %v8572_v23 = vpop.f32.mrf.mxu0  ;;  %v6207_v22 = vor.u32 %v7361_v47, %v6204_v28  ;;  %v6060_v12 = vld [vmem:[#allocation5 + $0x978] sm:$0xf0]  ;;  %v5935_v14 = vor.u32 %v7293_v36, %v5932_v13  ;;  %v7385_v59 = vld [vmem:[#allocation5 + $0xb4c] sm:$0xf] }
 0x1f9   :  { %4341 = vmatpush.bf16.msrb.mxu1 %v5503_v4  ;;  %4354 = vmatpush.bf16.msrb.mxu2 %v5631_v5  ;;  %v6188_v4 = vld [vmem:[#allocation5 + $0xa78] sm:$0xf0]  ;;  %v7389_v5 = vld [vmem:[#allocation5 + $0xb6c] sm:$0xf] }
 0x1fa   :  { %v6316_v6 = vld [vmem:[#allocation5 + $0xb78] sm:$0xf0]  ;;  %v7285_v25 = vld [vmem:[#allocation5 + $0x82c] sm:$0xf] }
 0x1fb   :  { %4367 = vmatpush.bf16.msrb.mxu3 %v5759_v40  ;;  %4329 = vmatmul.bf16.vlgmr.msrb.gmra.mxu0 %v8680_v45  ;;  %v6332_v45 = vld [vmem:[#allocation5 + $0xb98] sm:$0xf0]  ;;  %v8574_v19 = vpop.f32.mrf.mxu1  ;;  %v6063_v40 = vor.u32 %v7325_v55, %v6060_v12  ;;  %v6319_v34 = vor.u32 %v7389_v5, %v6316_v6  ;;  %v7349_v49 = vld [vmem:[#allocation5 + $0xa2c] sm:$0xf] }
 0x1fc   :  { %4373 = vmatpush.bf16.msra.mxu0 %v5999_v0  ;;  %4355 = vmatmul.bf16.vlgmr.msrb.gmra.mxu2 %v8678_v15  ;;  %v7329_v15 = vld [vmem:[#allocation5 + $0x98c] sm:$0xf]  ;;  %v6335_v33 = vor.u32 %v7393_v58, %v6332_v45  ;;  %v6191_v0 = vor.u32 %v7357_v57, %v6188_v4  ;;  %v6172_v8 = vld [vmem:[#allocation5 + $0xa58] sm:$0xf0] }
 0x1fd   :  { %4386 = vmatpush.bf16.msra.mxu1 %v6127_v51  ;;  %4399 = vmatpush.bf16.msra.mxu2 %v6255_v11  ;;  %v7289_v51 = vld [vmem:[#allocation5 + $0x84c] sm:$0xf]  ;;  %v5916_v11 = vld [vmem:[#allocation5 + $0x858] sm:$0xf0]  ;;  %v6175_v42 = vor.u32 %v7353_v17, %v6172_v8 }
 0x1fe   :  { %4368 = vmatmul.bf16.vlgmr.msrb.gmra.mxu3 %v8681_v52  ;;  %4342 = vmatmul.bf16.vlgmr.msrb.gmra.mxu1 %v8679_v30  ;;  %v5951_v52 = vor.u32 %v7297_v61, %v5948_v10  ;;  %v6079_v30 = vor.u32 %v7329_v15, %v6076_v31  ;;  %v6300_v60 = vld [vmem:[#allocation5 + $0xb58] sm:$0xf0]  ;;  %v7281_v61 = vld [vmem:[#allocation5 + $0x80c] sm:$0xf] }
 0x1ff   :  { %4412 = vmatpush.bf16.msra.mxu3 %v6383_v7  ;;  %v8576_v38 = vpop.f32.mrf.mxu2  ;;  %v6044_v7 = vld [vmem:[#allocation5 + $0x958] sm:$0xf0]  ;;  %v6303_v63 = vor.u32 %v7385_v59, %v6300_v60  ;;  %v7313_v31 = vld [vmem:[#allocation5 + $0x90c] sm:$0xf] }
 0x200   :  { %4374 = vmatpush.bf16.msra.mxu0 %v5983_v37  ;;  %v5919_v37 = vor.u32 %v7289_v51, %v5916_v11  ;;  %v5900_v20 = vld [vmem:[#allocation5 + $0x838] sm:$0xf0]  ;;  %v7345_v28 = vld [vmem:[#allocation5 + $0xa0c] sm:$0xf] }
 0x201   :  { %4387 = vmatpush.bf16.msra.mxu1 %v6111_v35  ;;  %4400 = vmatpush.bf16.msra.mxu2 %v6239_v2  ;;  %v8578_v46 = vpop.f32.mrf.mxu3  ;;  %v4124_v35 = vpop.f32.mrf.mxu0  ;;  %v6047_v2 = vor.u32 %v7321_v3, %v6044_v7  ;;  %v6028_v1 = vld [vmem:[#allocation5 + $0x938] sm:$0xf0]  ;;  %v7437_v13 = vld [vmem:[#allocation5 + $0xcec] sm:$0xf] }
 0x202   :  { %v6156_v21 = vld [vmem:[#allocation5 + $0xa38] sm:$0xf0]  ;;  %v7501_v4 = vld [vmem:[#allocation5 + $0xeec] sm:$0xf] }
 0x203   :  { %4413 = vmatpush.bf16.msra.mxu3 %v6367_v53  ;;  %v7317_v53 = vld [vmem:[#allocation5 + $0x92c] sm:$0xf]  ;;  %v4137_v24 = vpop.f32.mrf.mxu1  ;;  %v5884_v10 = vld [vmem:[#allocation5 + $0x818] sm:$0xf0] }
 0x204   :  { %4375 = vmatpush.bf16.msra.mxu0 %v5967_v9  ;;  %v7381_v9 = vld [vmem:[#allocation5 + $0xb2c] sm:$0xf]  ;;  %v6031_v15 = vor.u32 %v7317_v53, %v6028_v1  ;;  %v6012_v47 = vld [vmem:[#allocation5 + $0x918] sm:$0xf0]  ;;  %v5887_v12 = vor.u32 %v7281_v61, %v5884_v10 }
 0x205   :  { %4388 = vmatpush.bf16.msra.mxu1 %v6095_v41  ;;  %4401 = vmatpush.bf16.msra.mxu2 %v6223_v29  ;;  %v6284_v41 = vld [vmem:[#allocation5 + $0xb38] sm:$0xf0]  ;;  %v5903_v29 = vor.u32 %v7285_v25, %v5900_v20  ;;  %v6015_v6 = vor.u32 %v7313_v31, %v6012_v47  ;;  %v7433_v7 = vld [vmem:[#allocation5 + $0xccc] sm:$0xf] }
 0x206   :  { %v6287_v45 = vor.u32 %v7381_v9, %v6284_v41  ;;  %v6508_v55 = vld [vmem:[#allocation5 + $0xcf8] sm:$0xf0]  ;;  %v7465_v8 = vld [vmem:[#allocation5 + $0xdcc] sm:$0xf] }
 0x207   :  { %4414 = vmatpush.bf16.msra.mxu3 %v6351_v18  ;;  %v6159_v18 = vor.u32 %v7349_v49, %v6156_v21  ;;  %v4150_v58 = vpop.f32.mrf.mxu2  ;;  %v6636_v57 = vld [vmem:[#allocation5 + $0xdf8] sm:$0xf0]  ;;  %v6511_v11 = vor.u32 %v7437_v13, %v6508_v55  ;;  %v7429_v24 = vld [vmem:[#allocation5 + $0xcac] sm:$0xf] }
 0x208   :  { %4376 = vmatpush.bf16.msra.mxu0 %v5951_v52  ;;  %v6140_v52 = vld [vmem:[#allocation5 + $0xa18] sm:$0xf0]  ;;  %v7461_v1 = vld [vmem:[#allocation5 + $0xdac] sm:$0xf] }
 0x209   :  { %4389 = vmatpush.bf16.msra.mxu1 %v6079_v30  ;;  %4402 = vmatpush.bf16.msra.mxu2 %v6207_v22  ;;  %v7377_v30 = vld [vmem:[#allocation5 + $0xb0c] sm:$0xf]  ;;  %v6268_v22 = vld [vmem:[#allocation5 + $0xb18] sm:$0xf0]  ;;  %v4163_v36 = vpop.f32.mrf.mxu3 }
 0x20a   :  { %v6764_v5 = vld [vmem:[#allocation5 + $0xef8] sm:$0xf0]  ;;  %v6271_v51 = vor.u32 %v7377_v30, %v6268_v22  ;;  %v7493_v9 = vld [vmem:[#allocation5 + $0xeac] sm:$0xf] }
 0x20b   :  { %4415 = vmatpush.bf16.msra.mxu3 %v6335_v33  ;;  %v7469_v33 = vld [vmem:[#allocation5 + $0xdec] sm:$0xf]  ;;  %v6492_v17 = vld [vmem:[#allocation5 + $0xcd8] sm:$0xf0] }
 0x20c   :  { %4377 = vmatpush.bf16.msra.mxu0 %v5935_v14  ;;  %v6143_v14 = vor.u32 %v7345_v28, %v6140_v52  ;;  %v6639_v3 = vor.u32 %v7469_v33, %v6636_v57  ;;  %v6620_v60 = vld [vmem:[#allocation5 + $0xdd8] sm:$0xf0]  ;;  %v6495_v25 = vor.u32 %v7433_v7, %v6492_v17  ;;  %v7425_v31 = vld [vmem:[#allocation5 + $0xc8c] sm:$0xf] }
 0x20d   :  { %4390 = vmatpush.bf16.msra.mxu1 %v6063_v40  ;;  %4403 = vmatpush.bf16.msra.mxu2 %v6191_v0  ;;  %v7533_v40 = vld [vmem:[#allocation5 + $0xfec] sm:$0xf]  ;;  %v6892_v0 = vld [vmem:[#allocation5 + $0xff8] sm:$0xf0]  ;;  %v6623_v20 = vor.u32 %v7465_v8, %v6620_v60 }
 0x20e   :  { %v6895_v59 = vor.u32 %v7533_v40, %v6892_v0  ;;  %v6748_v35 = vld [vmem:[#allocation5 + $0xed8] sm:$0xf0]  ;;  %v7457_v47 = vld [vmem:[#allocation5 + $0xd8c] sm:$0xf] }
 0x20f   :  { %4416 = vmatpush.bf16.msra.mxu3 %v6319_v34  ;;  %v6767_v34 = vor.u32 %v7501_v4, %v6764_v5  ;;  %v6604_v21 = vld [vmem:[#allocation5 + $0xdb8] sm:$0xf0]  ;;  %v7421_v55 = vld [vmem:[#allocation5 + $0xc6c] sm:$0xf] }
 0x210   :  { %4378 = vmatpush.bf16.msra.mxu0 %v5919_v37  ;;  %v7497_v37 = vld [vmem:[#allocation5 + $0xecc] sm:$0xf]  ;;  %v6732_v41 = vld [vmem:[#allocation5 + $0xeb8] sm:$0xf0] }
 0x211   :  { %4391 = vmatpush.bf16.msra.mxu1 %v6047_v2  ;;  %4404 = vmatpush.bf16.msra.mxu2 %v6175_v42  ;;  %v7529_v2 = vld [vmem:[#allocation5 + $0xfcc] sm:$0xf]  ;;  %v6876_v42 = vld [vmem:[#allocation5 + $0xfd8] sm:$0xf0]  ;;  %v6751_v53 = vor.u32 %v7497_v37, %v6748_v35 }
 0x212   :  { %v6879_v49 = vor.u32 %v7529_v2, %v6876_v42  ;;  %v6860_v61 = vld [vmem:[#allocation5 + $0xfb8] sm:$0xf0]  ;;  %v7485_v5 = vld [vmem:[#allocation5 + $0xe6c] sm:$0xf] }
 0x213   :  { %4417 = vmatpush.bf16.msra.mxu3 %v6303_v63  ;;  %v6476_v63 = vld [vmem:[#allocation5 + $0xcb8] sm:$0xf0]  ;;  %v7449_v7 = vld [vmem:[#allocation5 + $0xd4c] sm:$0xf] }
 0x214   :  { %4379 = vmatpush.bf16.msra.mxu0 %v5903_v29  ;;  %v7525_v29 = vld [vmem:[#allocation5 + $0xfac] sm:$0xf]  ;;  %v6479_v10 = vor.u32 %v7429_v24, %v6476_v63  ;;  %v6588_v58 = vld [vmem:[#allocation5 + $0xd98] sm:$0xf0] }
 0x215   :  { %4392 = vmatpush.bf16.msra.mxu1 %v6031_v15  ;;  %4405 = vmatpush.bf16.msra.mxu2 %v6159_v18  ;;  %v6607_v15 = vor.u32 %v7461_v1, %v6604_v21  ;;  %v6735_v18 = vor.u32 %v7493_v9, %v6732_v41  ;;  %v6863_v28 = vor.u32 %v7525_v29, %v6860_v61  ;;  %v6844_v30 = vld [vmem:[#allocation5 + $0xf98] sm:$0xf0]  ;;  %v7481_v60 = vld [vmem:[#allocation5 + $0xe4c] sm:$0xf] }
 0x216   :  { %v6591_v36 = vor.u32 %v7457_v47, %v6588_v58  ;;  %v6444_v33 = vld [vmem:[#allocation5 + $0xc78] sm:$0xf0]  ;;  %v7513_v2 = vld [vmem:[#allocation5 + $0xf4c] sm:$0xf] }
 0x217   :  { %4418 = vmatpush.bf16.msra.mxu3 %v6287_v45  ;;  %v7489_v45 = vld [vmem:[#allocation5 + $0xe8c] sm:$0xf]  ;;  %v6572_v4 = vld [vmem:[#allocation5 + $0xd78] sm:$0xf0]  ;;  %v6447_v0 = vor.u32 %v7421_v55, %v6444_v33 }
 0x218   :  { %4380 = vmatpush.bf16.msra.mxu0 %v5887_v12  ;;  %v8584_v52 = vpop.f32.mrf.mxu0  ;;  %v7453_v12 = vld [vmem:[#allocation5 + $0xd6c] sm:$0xf]  ;;  %v6828_v40 = vld [vmem:[#allocation5 + $0xf78] sm:$0xf0] }
 0x219   :  { %4393 = vmatpush.bf16.msra.mxu1 %v6015_v6  ;;  %4406 = vmatpush.bf16.msra.mxu2 %v6143_v14  ;;  %v6700_v6 = vld [vmem:[#allocation5 + $0xe78] sm:$0xf0]  ;;  %v7517_v14 = vld [vmem:[#allocation5 + $0xf6c] sm:$0xf] }
 0x21a   :  { %v6831_v17 = vor.u32 %v7517_v14, %v6828_v40  ;;  %v6684_v37 = vld [vmem:[#allocation5 + $0xe58] sm:$0xf0]  ;;  %v7445_v9 = vld [vmem:[#allocation5 + $0xd2c] sm:$0xf] }
 0x21b   :  { %4419 = vmatpush.bf16.msra.mxu3 %v6271_v51  ;;  %4381 = vmatmul.bf16.vlgmr.msra.gmra.mxu0 %v8682_v56  ;;  %v6460_v56 = vld [vmem:[#allocation5 + $0xc98] sm:$0xf0]  ;;  %v8586_v22 = vpop.f32.mrf.mxu1  ;;  %v6575_v51 = vor.u32 %v7453_v12, %v6572_v4  ;;  %v6687_v1 = vor.u32 %v7481_v60, %v6684_v37  ;;  %v7477_v61 = vld [vmem:[#allocation5 + $0xe2c] sm:$0xf] }
 0x21c   :  { %4425 = vmatpush.bf16.msrb.mxu0 %v6511_v11  ;;  %4407 = vmatmul.bf16.vlgmr.msra.gmra.mxu2 %v8683_v16  ;;  %v6716_v16 = vld [vmem:[#allocation5 + $0xe98] sm:$0xf0]  ;;  %v6703_v11 = vor.u32 %v7485_v5, %v6700_v6  ;;  %v7409_v47 = vld [vmem:[#allocation5 + $0xc0c] sm:$0xf] }
 0x21d   :  { %4438 = vmatpush.bf16.msrb.mxu1 %v6639_v3  ;;  %4451 = vmatpush.bf16.msrb.mxu2 %v6767_v34  ;;  %v6719_v13 = vor.u32 %v7489_v45, %v6716_v16  ;;  %v7417_v3 = vld [vmem:[#allocation5 + $0xc4c] sm:$0xf]  ;;  %v6428_v34 = vld [vmem:[#allocation5 + $0xc58] sm:$0xf0] }
 0x21e   :  { %4394 = vmatmul.bf16.vlgmr.msra.gmra.mxu1 %v8684_v54  ;;  %4420 = vmatmul.bf16.vlgmr.msra.gmra.mxu3 %v8685_v26  ;;  %v7521_v54 = vld [vmem:[#allocation5 + $0xf8c] sm:$0xf]  ;;  %v6463_v26 = vor.u32 %v7425_v31, %v6460_v56  ;;  %v6812_v42 = vld [vmem:[#allocation5 + $0xf58] sm:$0xf0] }
 0x21f   :  { %4464 = vmatpush.bf16.msrb.mxu3 %v6895_v59  ;;  %v6847_v57 = vor.u32 %v7521_v54, %v6844_v30  ;;  %v8588_v8 = vpop.f32.mrf.mxu2  ;;  %v6556_v59 = vld [vmem:[#allocation5 + $0xd58] sm:$0xf0]  ;;  %v6815_v41 = vor.u32 %v7513_v2, %v6812_v42  ;;  %v7441_v58 = vld [vmem:[#allocation5 + $0xd0c] sm:$0xf] }
 0x220   :  { %4426 = vmatpush.bf16.msrb.mxu0 %v6495_v25  ;;  %v4176_v25 = vpop.f32.mrf.mxu0  ;;  %v6559_v63 = vor.u32 %v7449_v7, %v6556_v59  ;;  %v6412_v21 = vld [vmem:[#allocation5 + $0xc38] sm:$0xf0]  ;;  %v7473_v54 = vld [vmem:[#allocation5 + $0xe0c] sm:$0xf]  ;;  %v7540_v59 = vld [vmem:[#allocation8 + $0x20] sm:$0xff] }
 0x221   :  { %4439 = vmatpush.bf16.msrb.mxu1 %v6623_v20  ;;  %4452 = vmatpush.bf16.msrb.mxu2 %v6751_v53  ;;  %v8590_v35 = vpop.f32.mrf.mxu3  ;;  %v4123_v20 = vadd.f32 %v8572_v23, %v8566_v48  ;;  %v6431_v53 = vor.u32 %v7417_v3, %v6428_v34  ;;  %v6540_v29 = vld [vmem:[#allocation5 + $0xd38] sm:$0xf0]  ;;  %v7541_v3 = vld [vmem:[#allocation8 + $0x28] sm:$0xff] }
 0x222   :  { %v6543_v23 = vor.u32 %v7445_v9, %v6540_v29  ;;  %v6524_v16 = vld [vmem:[#allocation5 + $0xd18] sm:$0xf0]  ;;  %v7557_v34 = vld [vmem:[#allocation8 + $0xa8] sm:$0xff] }
 0x223   :  { %4465 = vmatpush.bf16.msrb.mxu3 %v6879_v49  ;;  %v4189_v24 = vpop.f32.mrf.mxu1  ;;  %v7413_v49 = vld [vmem:[#allocation5 + $0xc2c] sm:$0xf]  ;;  %v4136_v31 = vadd.f32 %v8574_v19, %v4123_v20  ;;  %v6652_v30 = vld [vmem:[#allocation5 + $0xe18] sm:$0xf0]  ;;  %v6527_v12 = vor.u32 %v7441_v58, %v6524_v16  ;;  %v967_v58 = vperm.slane %v8563_v50, 3  ;;  %v7566_v50 = vld [vmem:[#allocation8 + $0xf0] sm:$0xff] }
 0x224   :  { %4427 = vmatpush.bf16.msrb.mxu0 %v6479_v10  ;;  %v6668_v10 = vld [vmem:[#allocation5 + $0xe38] sm:$0xf0]  ;;  %v6415_v48 = vor.u32 %v7413_v49, %v6412_v21  ;;  %v7545_v21 = vld [vmem:[#allocation8 + $0x48] sm:$0xff] }
 0x225   :  { %4440 = vmatpush.bf16.msrb.mxu1 %v6607_v15  ;;  %4453 = vmatpush.bf16.msrb.mxu2 %v6735_v18  ;;  %v7509_v15 = vld [vmem:[#allocation5 + $0xf2c] sm:$0xf]  ;;  %v6796_v18 = vld [vmem:[#allocation5 + $0xf38] sm:$0xf0]  ;;  %v6671_v56 = vor.u32 %v7477_v61, %v6668_v10  ;;  %v4149_v19 = vadd.f32 %v8576_v38, %v4136_v31  ;;  %v7542_v38 = vld [vmem:[#allocation8 + $0x30] sm:$0xff] }
 0x226   :  { %v6799_v45 = vor.u32 %v7509_v15, %v6796_v18  ;;  %v7543_v5 = vld [vmem:[#allocation8 + $0x38] sm:$0xff]  ;;  %v7553_v9 = vld [vmem:[#allocation8 + $0x88] sm:$0xff]  ;;  %v7536_v10 = vld [vmem:[#allocation8] sm:$0xff]  ;;  %v4492_v15 = vmax.f32 %v8530_v43, 0.0 }
 0x227   :  { %4466 = vmatpush.bf16.msrb.mxu3 %v6863_v28  ;;  %v6396_v28 = vld [vmem:[#allocation5 + $0xc18] sm:$0xf0]  ;;  %v4162_v40 = vadd.f32 %v8578_v46, %v4149_v19  ;;  %v7544_v18 = vld [vmem:[#allocation8 + $0x40] sm:$0xff] }
 0x228   :  { %4428 = vmatpush.bf16.msrb.mxu0 %v6463_v26  ;;  %v4202_v26 = vpop.f32.mrf.mxu2  ;;  %v6399_v33 = vor.u32 %v7409_v47, %v6396_v28  ;;  %v7551_v6 = vld [vmem:[#allocation8 + $0x78] sm:$0xff]  ;;  %v7552_v31 = vld [vmem:[#allocation8 + $0x80] sm:$0xff] }
 0x229   :  { %4441 = vmatpush.bf16.msrb.mxu1 %v6591_v36  ;;  %4454 = vmatpush.bf16.msrb.mxu2 %v6719_v13  ;;  %v7505_v36 = vld [vmem:[#allocation5 + $0xf0c] sm:$0xf]  ;;  %v6780_v13 = vld [vmem:[#allocation5 + $0xf18] sm:$0xf0]  ;;  %v4215_v55 = vpop.f32.mrf.mxu3 }
 0x22a   :  { %v6783_v4 = vor.u32 %v7505_v36, %v6780_v13  ;;  %v7559_v14 = vld [vmem:[#allocation8 + $0xb8] sm:$0xff] }
 0x22b   :  { %4467 = vmatpush.bf16.msrb.mxu3 %v6847_v57  ;;  %v6655_v57 = vor.u32 %v7473_v54, %v6652_v30  ;;  %v7547_v37 = vld [vmem:[#allocation8 + $0x58] sm:$0xff] }
 0x22c   :  { %4429 = vmatpush.bf16.msrb.mxu0 %v6447_v0  ;;  %v4175_v0 = vadd.f32 %v8584_v52, %v4162_v40  ;;  %v7549_v52 = vld [vmem:[#allocation8 + $0x68] sm:$0xff]  ;;  %v7555_v2 = vld [vmem:[#allocation8 + $0x98] sm:$0xff] }
 0x22d   :  { %4442 = vmatpush.bf16.msrb.mxu1 %v6575_v51  ;;  %4455 = vmatpush.bf16.msrb.mxu2 %v6703_v11  ;;  %v7550_v51 = vld [vmem:[#allocation8 + $0x70] sm:$0xff]  ;;  %v7567_v40 = vld [vmem:[#allocation8 + $0xf8] sm:$0xff] }
 0x22e   :  { %v7558_v11 = vld [vmem:[#allocation8 + $0xb0] sm:$0xff]  ;;  %v4188_v46 = vadd.f32 %v8586_v22, %v4175_v0  ;;  %v7539_v22 = vld [vmem:[#allocation8 + $0x18] sm:$0xff] }
 0x22f   :  { %4468 = vmatpush.bf16.msrb.mxu3 %v6831_v17 }
 0x230   :  { %4430 = vmatpush.bf16.msrb.mxu0 %v6431_v53  ;;  %v4201_v7 = vadd.f32 %v8588_v8, %v4188_v46  ;;  %v7538_v53 = vld [vmem:[#allocation8 + $0x10] sm:$0xff] }
 0x231   :  { %4443 = vmatpush.bf16.msrb.mxu1 %v6559_v63  ;;  %4456 = vmatpush.bf16.msrb.mxu2 %v6687_v1  ;;  %v7546_v63 = vld [vmem:[#allocation8 + $0x50] sm:$0xff] }
 0x232   :  { %v7554_v1 = vld [vmem:[#allocation8 + $0x90] sm:$0xff] }
 0x233   :  { %4469 = vmatpush.bf16.msrb.mxu3 %v6815_v41 }
 0x234   :  { %4431 = vmatpush.bf16.msrb.mxu0 %v6415_v48  ;;  %v4493_v48 = vmax.f32 %v8557_v62, 0.0 }
 0x235   :  { %4444 = vmatpush.bf16.msrb.mxu1 %v6543_v23  ;;  %4457 = vmatpush.bf16.msrb.mxu2 %v6671_v56  ;;  %v4496_v56 = vpack.c.bf16 %v4492_v15, %v4492_v15 }
 0x236   :  { %v4497_v47 = vpack.c.bf16 %v4493_v48, %v4493_v48 }
 0x237   :  { %4470 = vmatpush.bf16.msrb.mxu3 %v6799_v45 }
 0x238   :  { %4432 = vmatpush.bf16.msrb.mxu0 %v6399_v33  ;;  %v4226_v17 = vpop.f32.mrf.mxu0 }
 0x239   :  { %4445 = vmatpush.bf16.msrb.mxu1 %v6527_v12  ;;  %4458 = vmatpush.bf16.msrb.mxu2 %v6655_v57 }
 0x23b   :  { %4471 = vmatpush.bf16.msrb.mxu3 %v6783_v4  ;;  %4433 = vmatmul.bf16.vlgmr.msrb.gmra.mxu0 %v8490_v39  ;;  %v4239_v39 = vpop.f32.mrf.mxu1 }
 0x23c   :  { %4760 = vmatpush.bf16.msra.mxu0 %v7543_v5  ;;  %4446 = vmatmul.bf16.vlgmr.msrb.gmra.mxu1 %v8498_v27  ;;  %v7548_v27 = vld [vmem:[#allocation8 + $0x60] sm:$0xff] }
 0x23d   :  { %4773 = vmatpush.bf16.msra.mxu1 %v7551_v6  ;;  %4786 = vmatpush.bf16.msra.mxu2 %v7559_v14 }
 0x23e   :  { %4459 = vmatmul.bf16.vlgmr.msrb.gmra.mxu2 %v8493_v32  ;;  %4472 = vmatmul.bf16.vlgmr.msrb.gmra.mxu3 %v8502_v44  ;;  %v7556_v32 = vld [vmem:[#allocation8 + $0xa0] sm:$0xff]  ;;  %v4214_v44 = vadd.f32 %v8590_v35, %v4201_v7  ;;  %v7537_v35 = vld [vmem:[#allocation8 + $0x8] sm:$0xff] }
 0x23f   :  { %v4252_v42 = vpop.f32.mrf.mxu2  ;;  %4799 = vmatpush.bf16.msra.mxu3 %v7567_v40 }
 0x240   :  { %4761 = vmatpush.bf16.msra.mxu0 %v7542_v38  ;;  %v4227_v60 = vadd.f32 %v4226_v17, %v4214_v44  ;;  %v4228_v8 = vpop.f32.mrf.mxu0  ;;  %v7562_v17 = vld [vmem:[#allocation8 + $0xd0] sm:$0xff] }
 0x241   :  { %4774 = vmatpush.bf16.msra.mxu1 %v7550_v51  ;;  %4787 = vmatpush.bf16.msra.mxu2 %v7558_v11  ;;  %v4265_v25 = vpop.f32.mrf.mxu3  ;;  %v7565_v11 = vld [vmem:[#allocation8 + $0xe8] sm:$0xff] }
 0x242   :  { %v4240_v20 = vadd.f32 %v4239_v39, %v4227_v60 }
 0x243   :  { %v4241_v24 = vpop.f32.mrf.mxu1  ;;  %4800 = vmatpush.bf16.msra.mxu3 %v7566_v50 }
 0x244   :  { %4762 = vmatpush.bf16.msra.mxu0 %v7541_v3  ;;  %v4253_v49 = vadd.f32 %v4252_v42, %v4240_v20  ;;  %v7564_v3 = vld [vmem:[#allocation8 + $0xe0] sm:$0xff] }
 0x245   :  { %4775 = vmatpush.bf16.msra.mxu1 %v7549_v52  ;;  %4788 = vmatpush.bf16.msra.mxu2 %v7557_v34  ;;  %v7563_v52 = vld [vmem:[#allocation8 + $0xd8] sm:$0xff] }
 0x246   :  { %v8605_v41 = vadd.f32 %v4265_v25, %v4253_v49 }
 0x247   :  { %v4254_v29 = vpop.f32.mrf.mxu2  ;;  %4801 = vmatpush.bf16.msra.mxu3 %v7565_v11 }
 0x248   :  { %4763 = vmatpush.bf16.msra.mxu0 %v7540_v59  ;;  %v4494_v23 = vmax.f32 %v8605_v41, 0.0  ;;  %v7561_v59 = vld [vmem:[#allocation8 + $0xc8] sm:$0xff]  ;;  %v4482_v48 = vrot.slane %v8605_v41, 4 }
 0x249   :  { %4776 = vmatpush.bf16.msra.mxu1 %v7548_v27  ;;  %4789 = vmatpush.bf16.msra.mxu2 %v7556_v32  ;;  %v4267_v61 = vpop.f32.mrf.mxu3 }
 0x24a   :  { %v4498_v28 = vpack.c.bf16 %v4494_v23, %v4494_v23 }
 0x24b   :  { %4802 = vmatpush.bf16.msra.mxu3 %v7564_v3 }
 0x24c   :  { %4764 = vmatpush.bf16.msra.mxu0 %v7539_v22  ;;  %v7560_v22 = vld [vmem:[#allocation8 + $0xc0] sm:$0xff] }
 0x24d   :  { %4777 = vmatpush.bf16.msra.mxu1 %v7547_v37  ;;  %4790 = vmatpush.bf16.msra.mxu2 %v7555_v2 }
 0x24f   :  { %4803 = vmatpush.bf16.msra.mxu3 %v7563_v52 }
 0x250   :  { %4765 = vmatpush.bf16.msra.mxu0 %v7538_v53 }
 0x251   :  { %4778 = vmatpush.bf16.msra.mxu1 %v7546_v63  ;;  %4791 = vmatpush.bf16.msra.mxu2 %v7554_v1 }
 0x253   :  { %4804 = vmatpush.bf16.msra.mxu3 %v7562_v17 }
 0x254   :  { %4766 = vmatpush.bf16.msra.mxu0 %v7537_v35 }
 0x255   :  { %4779 = vmatpush.bf16.msra.mxu1 %v7545_v21  ;;  %4792 = vmatpush.bf16.msra.mxu2 %v7553_v9 }
 0x257   :  { %4805 = vmatpush.bf16.msra.mxu3 %v7561_v59 }
 0x258   :  { %4767 = vmatpush.bf16.msra.mxu0 %v7536_v10  ;;  %v4278_v45 = vpop.f32.mrf.mxu0 }
 0x259   :  { %4780 = vmatpush.bf16.msra.mxu1 %v7544_v18  ;;  %4793 = vmatpush.bf16.msra.mxu2 %v7552_v31  ;;  %v4279_v16 = vadd.f32 %v4278_v45, %v967_v58  ;;  %v4481_v18 = vrot.slane %v8557_v62, 6  ;;  %v7580_v62 = vld [vmem:[#allocation10] ss:$0 sm:$0xff] }
 0x25b   :  { %4768 = vmatmul.bf16.vlgmr.msra.gmra.mxu0 %v4496_v56  ;;  %v4291_v54 = vpop.f32.mrf.mxu1  ;;  %4806 = vmatpush.bf16.msra.mxu3 %v7560_v22 }
 0x25c   :  { %4781 = vmatmul.bf16.vlgmr.msra.gmra.mxu1 %v4497_v47  ;;  %4794 = vmatmul.bf16.vlgmr.msra.gmra.mxu2 %v4498_v28  ;;  %v4292_v30 = vadd.f32 %v4291_v54, %v4279_v16  ;;  %v4485_v28 = vsel %vm4484_vm1, %v8530_v43, %v4481_v18 }
 0x25f   :  { %v4304_v26 = vpop.f32.mrf.mxu2 }
 0x260   :  { %v4305_v36 = vadd.f32 %v4304_v26, %v4292_v30  ;;  %v4280_v19 = vpop.f32.mrf.mxu0 }
 0x261   :  { %v4317_v13 = vpop.f32.mrf.mxu3 }
 0x262   :  { %v4318_v55 = vadd.f32 %v4317_v13, %v4305_v36 }
 0x263   :  { %v4293_v33 = vpop.f32.mrf.mxu1 }
 0x267   :  { %v4306_v12 = vpop.f32.mrf.mxu2 }
 0x269   :  { %v4319_v57 = vpop.f32.mrf.mxu3 }
 0x278   :  { %v4330_v4 = vpop.f32.mrf.mxu0 }
 0x279   :  { %v4331_v39 = vadd.f32 %v4330_v4, %v4318_v55 }
 0x27b   :  { %v4343_v5 = vpop.f32.mrf.mxu1 }
 0x27c   :  { %v4344_v37 = vadd.f32 %v4343_v5, %v4331_v39 }
 0x27f   :  { %v4356_v6 = vpop.f32.mrf.mxu2 }
 0x280   :  { %v4332_v0 = vpop.f32.mrf.mxu0  ;;  %v4357_v2 = vadd.f32 %v4356_v6, %v4344_v37 }
 0x281   :  { %v4369_v14 = vpop.f32.mrf.mxu3 }
 0x282   :  { %v4370_v8 = vadd.f32 %v4369_v14, %v4357_v2 }
 0x283   :  { %v4345_v38 = vpop.f32.mrf.mxu1 }
 0x287   :  { %v4358_v51 = vpop.f32.mrf.mxu2 }
 0x289   :  { %v4371_v46 = vpop.f32.mrf.mxu3 }
 0x298   :  { %v4382_v34 = vpop.f32.mrf.mxu0 }
 0x299   :  { %v4383_v20 = vadd.f32 %v4382_v34, %v4370_v8 }
 0x29b   :  { %v4395_v7 = vpop.f32.mrf.mxu1 }
 0x29c   :  { %v4396_v53 = vadd.f32 %v4395_v7, %v4383_v20 }
 0x29f   :  { %v4408_v27 = vpop.f32.mrf.mxu2 }
 0x2a0   :  { %v4384_v44 = vpop.f32.mrf.mxu0  ;;  %v4409_v24 = vadd.f32 %v4408_v27, %v4396_v53 }
 0x2a1   :  { %v4421_v32 = vpop.f32.mrf.mxu3 }
 0x2a2   :  { %v4422_v63 = vadd.f32 %v4421_v32, %v4409_v24 }
 0x2a3   :  { %v4397_v60 = vpop.f32.mrf.mxu1 }
 0x2a7   :  { %v4410_v42 = vpop.f32.mrf.mxu2 }
 0x2a9   :  { %v4423_v25 = vpop.f32.mrf.mxu3 }
 0x2b8   :  { %v4434_v1 = vpop.f32.mrf.mxu0 }
 0x2b9   :  { %v4447_v49 = vpop.f32.mrf.mxu1  ;;  %v4435_v35 = vadd.f32 %v4434_v1, %v4422_v63 }
 0x2bb   :  { %v4448_v21 = vadd.f32 %v4447_v49, %v4435_v35 }
 0x2c0   :  { %v4436_v10 = vpop.f32.mrf.mxu0 }
 0x2c1   :  { %v4460_v9 = vpop.f32.mrf.mxu2  ;;  %v4473_v29 = vpop.f32.mrf.mxu3 }
 0x2c2   :  { %v4461_v61 = vadd.f32 %v4460_v9, %v4448_v21  ;;  %v4449_v15 = vpop.f32.mrf.mxu1 }
 0x2c4   :  { %v4474_v31 = vadd.f32 %v4473_v29, %v4461_v61 }
 0x2c6   :  { %v4483_v23 = vrot.slane %v4474_v31, 2  ;;  %v4495_v56 = vmax.f32 %v4474_v31, 0.0 }
 0x2c8   :  { %v4499_v47 = vpack.c.bf16 %v4495_v56, %v4495_v56  ;;  %v4487_v58 = vsel %vm4486_vm2, %v4482_v48, %v4483_v23 }
 0x2c9   :  { %v4462_v45 = vpop.f32.mrf.mxu2  ;;  %v4475_v16 = vpop.f32.mrf.mxu3  ;;  %v4489_v54 = vsel %vm4488_vm3, %v4485_v28, %v4487_v58 }
 0x2ca   :  { %4807 = vmatmul.bf16.vlgmr.msra.gmra.mxu3 %v4499_v47  ;;  %4491 = vst [vmem:[#allocation11] sm:$0xff] %v4489_v54 }
 0x2cb   :  { %4823 = dma.vmem_to_hbm [thread:$0]  %s4819_s4, 128, %s4821_s26, [#allocation4]  }
 0x2d8   :  { %v4769_v41 = vpop.f32.mrf.mxu0 }
 0x2d9   :  { %v4770_v30 = vadd.f32 %v7580_v62, %v4769_v41  ;;  %v4782_v26 = vpop.f32.mrf.mxu1 }
 0x2db   :  { %v4783_v43 = vadd.f32 %v4782_v26, %v4770_v30 }
 0x2df   :  { %v4795_v36 = vpop.f32.mrf.mxu2 }
 0x2e0   :  { %v4796_v13 = vadd.f32 %v4795_v36, %v4783_v43  ;;  %v4771_v55 = vpop.f32.mrf.mxu0 }
 0x2e1   :  { %v4784_v19 = vpop.f32.mrf.mxu1 }
 0x2e7   :  { %v4797_v33 = vpop.f32.mrf.mxu2 }
 0x34d   :  { %v4808_v12 = vpop.f32.mrf.mxu3 }
 0x34e   :  { %v4809_v57 = vadd.f32 %v4808_v12, %v4796_v13 }
 0x350   :  { %4812 = vst [vmem:[#allocation12] sm:$0x3] %v4809_v57 }
 0x351   :  { %4834 = dma.vmem_to_hbm [thread:$0]  %s4830_s28, 32, %s4832_s7, [#allocation13]  }
 0x355   :  { %v4810_v4 = vpop.f32.mrf.mxu3 }
 0x356   :  { %7757 = dma.done.wait [#allocation4], 128  }
 0x357   :  { %7758 = vsyncadd [#allocation4], 4294967168 }
 0x358   :  { %7759 = dma.done.wait [#allocation13], 32  }
 0x359   :  { %7760 = vsyncadd [#allocation13], 4294967264 }
 0x35a   :  { %4843 = vsyncpa [#allocation3], 1 }
 0x35b   :  { %4844 = vsyncpa [#allocation6], 1 }
 0x35c   :  { %4845 = vsyncpa [#allocation9], 1 }
 0x35d   :  { %4846 = vsyncpa [#allocation4], 1 }
 0x35e   :  { %4847 = vsyncpa [#allocation13], 1 }

</bundles_post_ra>
